<compile_context>
chip_gen: v7x
topology: tpu7x:2x2x1
jax: 0.10.0
libtpu: 0.0.40
codegen_flags: <defaults>
</compile_context>

<pallas_src>
import functools

import jax
import jax.numpy as jnp
from jax.experimental import pallas as pl
from jax.experimental.pallas import tpu as pltpu

N_EMBD = 384
N_HEAD = 6
HEAD_SIZE = N_EMBD // N_HEAD   # 64
LN_EPS = 1e-5                  # PyTorch nn.LayerNorm default
NEG_BIG = -1e30                # finite additive mask bias


def _layernorm(x, gamma, beta):
    mu = jnp.mean(x, axis=-1, keepdims=True)
    var = jnp.mean((x - mu) ** 2, axis=-1, keepdims=True)
    return (x - mu) * jax.lax.rsqrt(var + LN_EPS) * gamma + beta


def _block_kernel(x_ref, wqkv_ref, wo_ref, bo_ref,
                  w1_ref, b1_ref, w2_ref, b2_ref,
                  g1_ref, bt1_ref, g2_ref, bt2_ref,
                  bias_ref, o_ref, *, seq_len):
    x = x_ref[...]                              # (R, C) f32, R = Bb * seq_len
    R, C = x.shape
    bb = R // seq_len                           # whole sequences per grid step

    # ----- x = x + MultiHeadAttention(LayerNorm1(x)) -----
    xn = _layernorm(x, g1_ref[...], bt1_ref[...])
    xn_b = xn.astype(jnp.bfloat16)

    # Fused QKV matmul; 1/sqrt(D) already folded into the Q weights host-side.
    qkv = jnp.dot(xn_b, wqkv_ref[...], preferred_element_type=jnp.float32)
    q = qkv[:, 0 * C:1 * C].astype(jnp.bfloat16).reshape(bb, seq_len, C)
    k = qkv[:, 1 * C:2 * C].astype(jnp.bfloat16).reshape(bb, seq_len, C)
    v = qkv[:, 2 * C:3 * C].astype(jnp.bfloat16).reshape(bb, seq_len, C)

    bias = bias_ref[...]                        # (T, T) additive causal bias

    head_outs = []
    for h in range(N_HEAD):                     # static unroll over 6 heads
        sl = slice(h * HEAD_SIZE, (h + 1) * HEAD_SIZE)
        qh, kh, vh = q[:, :, sl], k[:, :, sl], v[:, :, sl]   # (bb, T, D) bf16
        wei = jnp.einsum('bqd,bkd->bqk', qh, kh,
                         preferred_element_type=jnp.float32)  # (bb, T, T)
        wei = wei + bias                        # broadcast over bb
        wei = wei - jnp.max(wei, axis=-1, keepdims=True)
        p = jnp.exp(wei)
        inv = pl.reciprocal(jnp.sum(p, axis=-1, keepdims=True), approx=True)
        p = (p * inv).astype(jnp.bfloat16)
        # TODO(synk): attention-weight dropout omitted (eval mode -> identity)
        oh = jnp.einsum('bqk,bkd->bqd', p, vh,
                        preferred_element_type=jnp.float32)   # (bb, T, D)
        head_outs.append(oh)

    # Single output projection over the concatenated heads (K = C = 384).
    heads = jnp.concatenate(head_outs, axis=-1).reshape(R, C)
    sa = jnp.dot(heads.astype(jnp.bfloat16), wo_ref[...],
                 preferred_element_type=jnp.float32)
    x = x + sa + bo_ref[...]

    # ----- x = x + FeedForward(LayerNorm2(x)) -----
    xn2 = _layernorm(x, g2_ref[...], bt2_ref[...]).astype(jnp.bfloat16)
    h1 = jnp.dot(xn2, w1_ref[...], preferred_element_type=jnp.float32) + b1_ref[...]
    h1 = jnp.maximum(h1, 0.0).astype(jnp.bfloat16)            # ReLU
    ff = jnp.dot(h1, w2_ref[...], preferred_element_type=jnp.float32) + b2_ref[...]
    # TODO(synk): feed-forward dropout omitted (eval mode -> identity)
    o_ref[...] = (x + ff).astype(o_ref.dtype)


def transformer_block(x, params):
    B, T, C = x.shape
    H4 = 4 * C
    wq, wk, wv, wo, bo, w1, b1, w2, b2, g1, bt1, g2, bt2 = params

    bf = jnp.bfloat16
    scale = HEAD_SIZE ** -0.5
    # Fused QKV weights (scale folded into Q); all matmul weights in bf16.
    wqkv_b = jnp.concatenate([wq * scale, wk, wv], axis=1).astype(bf)  # (C, 3C)
    wo_b = wo.astype(bf)
    w1_b, w2_b = w1.astype(bf), w2.astype(bf)

    # Additive causal mask bias (T, T): 0 on/below diagonal, -1e30 above.
    tril = jnp.tril(jnp.ones((T, T), bool))
    bias = jnp.where(tril, 0.0, NEG_BIG).astype(jnp.float32)

    # Sequences per grid step: prefer >= 2 grid steps whenever B allows it
    # (v7x megacore sharding + pipelining of the x tile), while targeting
    # >= ~512 rows per step when the batch is large enough.
    target_rows = 512
    divisors = [d for d in range(1, B + 1) if B % d == 0]
    multi = [d for d in divisors if B // d >= 2]
    cands = multi if multi else divisors
    bb = next((d for d in cands if d * T >= target_rows), cands[-1])
    R = bb * T
    steps = B // bb
    assert steps == 1 or R % 8 == 0, "rows-per-step must be sublane aligned"

    x2 = x.reshape(B * T, C)            # rows for the kernel (lane-dense C)

    def full2(shape):
        return pl.BlockSpec(shape, lambda i: (0, 0))

    in_specs = [
        pl.BlockSpec((R, C), lambda i: (i, 0)),          # x rows
        full2((C, 3 * C)),                               # fused Wqkv
        full2((C, C)), full2((1, C)),                    # Wo, bo
        full2((C, H4)), full2((1, H4)),                  # W1, b1
        full2((H4, C)), full2((1, C)),                   # W2, b2
        full2((1, C)), full2((1, C)),                    # ln1 gamma, beta
        full2((1, C)), full2((1, C)),                    # ln2 gamma, beta
        full2((T, T)),                                   # causal mask bias
    ]

    inputs = (x2, wqkv_b, wo_b, bo, w1_b, b1, w2_b, b2,
              g1, bt1, g2, bt2, bias)

    param_bytes = sum(int(a.size) * a.dtype.itemsize for a in inputs[1:])
    # QKV + proj + FFN dense flops + per-sequence attention flops.
    flops = 24 * B * T * C * C + 4 * B * T * T * C
    cost = pl.CostEstimate(
        flops=int(flops),
        transcendentals=int(B * N_HEAD * T * T),
        bytes_accessed=int(2 * B * T * C * 4 + steps * param_bytes),
    )

    out2 = pl.pallas_call(
        functools.partial(_block_kernel, seq_len=T),
        out_shape=jax.ShapeDtypeStruct((B * T, C), x.dtype),
        grid_spec=pltpu.PrefetchScalarGridSpec(
            num_scalar_prefetch=0,
            grid=(steps,),
            in_specs=in_specs,
            out_specs=pl.BlockSpec((R, C), lambda i: (i, 0)),
        ),
        compiler_params=pltpu.CompilerParams(
            dimension_semantics=("parallel",),
            vmem_limit_bytes=48 * 1024 * 1024),
        cost_estimate=cost,
    )(*inputs)
    return out2.reshape(B, T, C)


def init_params(key, C=N_EMBD):
    H = 4 * C
    ks = jax.random.split(key, 6)
    scale = 0.02
    wq = scale * jax.random.normal(ks[0], (C, C), jnp.float32)
    wk = scale * jax.random.normal(ks[1], (C, C), jnp.float32)
    wv = scale * jax.random.normal(ks[2], (C, C), jnp.float32)
    wo = scale * jax.random.normal(ks[3], (C, C), jnp.float32)
    bo = jnp.zeros((1, C), jnp.float32)
    w1 = scale * jax.random.normal(ks[4], (C, H), jnp.float32)
    b1 = jnp.zeros((1, H), jnp.float32)
    w2 = scale * jax.random.normal(ks[5], (H, C), jnp.float32)
    b2 = jnp.zeros((1, C), jnp.float32)
    g1 = jnp.ones((1, C), jnp.float32)
    bt1 = jnp.zeros((1, C), jnp.float32)
    g2 = jnp.ones((1, C), jnp.float32)
    bt2 = jnp.zeros((1, C), jnp.float32)
    return (wq, wk, wv, wo, bo, w1, b1, w2, b2, g1, bt1, g2, bt2)


def reference_block(x, params):
    """Pure-JAX f32 reference (mirrors the PyTorch forward in eval mode)."""
    wq, wk, wv, wo, bo, w1, b1, w2, b2, g1, bt1, g2, bt2 = params
    B, T, C = x.shape

    def ln(z, g, b):
        mu = jnp.mean(z, -1, keepdims=True)
        var = jnp.mean((z - mu) ** 2, -1, keepdims=True)
        return (z - mu) / jnp.sqrt(var + LN_EPS) * g + b

    xn = ln(x, g1[0], bt1[0])
    q = xn @ wq
    k = xn @ wk
    v = xn @ wv
    q = q.reshape(B, T, N_HEAD, HEAD_SIZE).transpose(0, 2, 1, 3)
    k = k.reshape(B, T, N_HEAD, HEAD_SIZE).transpose(0, 2, 1, 3)
    v = v.reshape(B, T, N_HEAD, HEAD_SIZE).transpose(0, 2, 1, 3)
    wei = jnp.einsum("bhqd,bhkd->bhqk", q, k) * HEAD_SIZE ** -0.5
    mask = jnp.tril(jnp.ones((T, T), bool))
    wei = jnp.where(mask, wei, -jnp.inf)
    wei = jax.nn.softmax(wei, axis=-1)
    out = jnp.einsum("bhqk,bhkd->bhqd", wei, v)
    out = out.transpose(0, 2, 1, 3).reshape(B, T, C)
    x = x + out @ wo + bo[0]
    xn2 = ln(x, g2[0], bt2[0])
    ff = jnp.maximum(xn2 @ w1 + b1[0], 0.0) @ w2 + b2[0]
    return x + ff


if __name__ == "__main__":
    key = jax.random.PRNGKey(0)
    k_x, k_p = jax.random.split(key)
    B, T = 2, 16                      # small shapes; T <= block_size (256)
    x = jax.random.normal(k_x, (B, T, N_EMBD), jnp.float32)
    params = init_params(k_p)

    out = jax.block_until_ready(transformer_block(x, params))
    ref = jax.block_until_ready(reference_block(x, params))

    assert out.shape == (B, T, N_EMBD)
    assert jnp.allclose(out, ref, rtol=2e-2, atol=2e-2), "mismatch vs reference"

    print("KERNEL_OK")
</pallas_src>

<mosaic_0001>
module attributes {stable_mosaic.version = 11 : i64} {
  func.func @_block_kernel(%arg0: i32, %arg1: memref<16x384xf32, #tpu.memory_space<vmem>>, %arg2: memref<384x1152xbf16, #tpu.memory_space<vmem>>, %arg3: memref<384x384xbf16, #tpu.memory_space<vmem>>, %arg4: memref<1x384xf32, #tpu.memory_space<vmem>>, %arg5: memref<384x1536xbf16, #tpu.memory_space<vmem>>, %arg6: memref<1x1536xf32, #tpu.memory_space<vmem>>, %arg7: memref<1536x384xbf16, #tpu.memory_space<vmem>>, %arg8: memref<1x384xf32, #tpu.memory_space<vmem>>, %arg9: memref<1x384xf32, #tpu.memory_space<vmem>>, %arg10: memref<1x384xf32, #tpu.memory_space<vmem>>, %arg11: memref<1x384xf32, #tpu.memory_space<vmem>>, %arg12: memref<1x384xf32, #tpu.memory_space<vmem>>, %arg13: memref<16x16xf32, #tpu.memory_space<vmem>>, %arg14: memref<16x384xf32, #tpu.memory_space<vmem>>) attributes {dimension_semantics = [#tpu.dimension_semantics<parallel>], iteration_bounds = array<i64: 2>, scalar_prefetch = 0 : i64, scratch_operands = 0 : i64, tpu.core_type = #tpu.core_type<tc>, window_params = [{transform_indices = @transform_0, window_bounds = array<i64: 16, 384>}, {pipeline_mode = #tpu.pipeline_mode<synchronous>, transform_indices = @transform_1, window_bounds = array<i64: 384, 1152>}, {pipeline_mode = #tpu.pipeline_mode<synchronous>, transform_indices = @transform_2, window_bounds = array<i64: 384, 384>}, {pipeline_mode = #tpu.pipeline_mode<synchronous>, transform_indices = @transform_3, window_bounds = array<i64: 1, 384>}, {pipeline_mode = #tpu.pipeline_mode<synchronous>, transform_indices = @transform_4, window_bounds = array<i64: 384, 1536>}, {pipeline_mode = #tpu.pipeline_mode<synchronous>, transform_indices = @transform_5, window_bounds = array<i64: 1, 1536>}, {pipeline_mode = #tpu.pipeline_mode<synchronous>, transform_indices = @transform_6, window_bounds = array<i64: 1536, 384>}, {pipeline_mode = #tpu.pipeline_mode<synchronous>, transform_indices = @transform_7, window_bounds = array<i64: 1, 384>}, {pipeline_mode = #tpu.pipeline_mode<synchronous>, transform_indices = @transform_8, window_bounds = array<i64: 1, 384>}, {pipeline_mode = #tpu.pipeline_mode<synchronous>, transform_indices = @transform_9, window_bounds = array<i64: 1, 384>}, {pipeline_mode = #tpu.pipeline_mode<synchronous>, transform_indices = @transform_10, window_bounds = array<i64: 1, 384>}, {pipeline_mode = #tpu.pipeline_mode<synchronous>, transform_indices = @transform_11, window_bounds = array<i64: 1, 384>}, {pipeline_mode = #tpu.pipeline_mode<synchronous>, transform_indices = @transform_12, window_bounds = array<i64: 16, 16>}, {transform_indices = @transform_13, window_bounds = array<i64: 16, 384>}]} {
    %c0 = arith.constant 0 : index
    %c0_0 = arith.constant 0 : index
    %0 = vector.load %arg1[%c0, %c0_0] : memref<16x384xf32, #tpu.memory_space<vmem>>, vector<16x384xf32>
    %c0_1 = arith.constant 0 : index
    %c0_2 = arith.constant 0 : index
    %1 = vector.load %arg9[%c0_1, %c0_2] : memref<1x384xf32, #tpu.memory_space<vmem>>, vector<1x384xf32>
    %c0_3 = arith.constant 0 : index
    %c0_4 = arith.constant 0 : index
    %2 = vector.load %arg10[%c0_3, %c0_4] : memref<1x384xf32, #tpu.memory_space<vmem>>, vector<1x384xf32>
    %cst = arith.constant dense<0.000000e+00> : vector<16xf32>
    %3 = vector.multi_reduction <add>, %0, %cst [1] : vector<16x384xf32> to vector<16xf32>
    %4 = vector.shape_cast %3 : vector<16xf32> to vector<16x1xf32>
    %cst_5 = arith.constant 3.840000e+02 : f32
    %5 = vector.broadcast %cst_5 : f32 to vector<16x1xf32>
    %6 = arith.divf %4, %5 : vector<16x1xf32>
    %7 = vector.broadcast %6 : vector<16x1xf32> to vector<16x384xf32>
    %8 = arith.subf %0, %7 : vector<16x384xf32>
    %9 = arith.mulf %8, %8 : vector<16x384xf32>
    %cst_6 = arith.constant dense<0.000000e+00> : vector<16xf32>
    %10 = vector.multi_reduction <add>, %9, %cst_6 [1] : vector<16x384xf32> to vector<16xf32>
    %11 = vector.shape_cast %10 : vector<16xf32> to vector<16x1xf32>
    %cst_7 = arith.constant 3.840000e+02 : f32
    %12 = vector.broadcast %cst_7 : f32 to vector<16x1xf32>
    %13 = arith.divf %11, %12 : vector<16x1xf32>
    %14 = vector.broadcast %6 : vector<16x1xf32> to vector<16x384xf32>
    %15 = arith.subf %0, %14 : vector<16x384xf32>
    %cst_8 = arith.constant 9.99999974E-6 : f32
    %16 = vector.broadcast %cst_8 : f32 to vector<16x1xf32>
    %17 = arith.addf %13, %16 : vector<16x1xf32>
    %18 = math.rsqrt %17 : vector<16x1xf32>
    %19 = vector.broadcast %18 : vector<16x1xf32> to vector<16x384xf32>
    %20 = arith.mulf %15, %19 : vector<16x384xf32>
    %21 = vector.broadcast %1 : vector<1x384xf32> to vector<16x384xf32>
    %22 = arith.mulf %20, %21 : vector<16x384xf32>
    %23 = vector.broadcast %2 : vector<1x384xf32> to vector<16x384xf32>
    %24 = arith.addf %22, %23 : vector<16x384xf32>
    %25 = arith.truncf %24 : vector<16x384xf32> to vector<16x384xbf16>
    %c0_9 = arith.constant 0 : index
    %c0_10 = arith.constant 0 : index
    %26 = vector.load %arg2[%c0_9, %c0_10] : memref<384x1152xbf16, #tpu.memory_space<vmem>>, vector<384x1152xbf16>
    %cst_11 = arith.constant dense<0.000000e+00> : vector<16x1152xf32>
    %27 = tpu.matmul %25, %26, %cst_11 {dimension_numbers = #tpu.dot_dimension_numbers<[1], [0], [0], [1], [0, 0, 1, 1], [], []>} : vector<16x384xbf16>, vector<384x1152xbf16>, vector<16x1152xf32> -> vector<16x1152xf32>
    %28 = vector.extract_strided_slice %27 {offsets = [0, 0], sizes = [16, 384], strides = [1, 1]} : vector<16x1152xf32> to vector<16x384xf32>
    %29 = arith.truncf %28 : vector<16x384xf32> to vector<16x384xbf16>
    %30 = vector.shape_cast %29 : vector<16x384xbf16> to vector<1x16x384xbf16>
    %31 = vector.extract_strided_slice %27 {offsets = [0, 384], sizes = [16, 384], strides = [1, 1]} : vector<16x1152xf32> to vector<16x384xf32>
    %32 = arith.truncf %31 : vector<16x384xf32> to vector<16x384xbf16>
    %33 = vector.shape_cast %32 : vector<16x384xbf16> to vector<1x16x384xbf16>
    %34 = vector.extract_strided_slice %27 {offsets = [0, 768], sizes = [16, 384], strides = [1, 1]} : vector<16x1152xf32> to vector<16x384xf32>
    %35 = arith.truncf %34 : vector<16x384xf32> to vector<16x384xbf16>
    %36 = vector.shape_cast %35 : vector<16x384xbf16> to vector<1x16x384xbf16>
    %c0_12 = arith.constant 0 : index
    %c0_13 = arith.constant 0 : index
    %37 = vector.load %arg13[%c0_12, %c0_13] : memref<16x16xf32, #tpu.memory_space<vmem>>, vector<16x16xf32>
    %38 = vector.extract_strided_slice %30 {offsets = [0, 0, 0], sizes = [1, 16, 64], strides = [1, 1, 1]} : vector<1x16x384xbf16> to vector<1x16x64xbf16>
    %39 = vector.extract_strided_slice %33 {offsets = [0, 0, 0], sizes = [1, 16, 64], strides = [1, 1, 1]} : vector<1x16x384xbf16> to vector<1x16x64xbf16>
    %40 = vector.extract_strided_slice %36 {offsets = [0, 0, 0], sizes = [1, 16, 64], strides = [1, 1, 1]} : vector<1x16x384xbf16> to vector<1x16x64xbf16>
    "tpu.trace_start"() <{level = 10 : i32, message = "bqd,bkd->bqk"}> : () -> ()
    %cst_14 = arith.constant dense<0.000000e+00> : vector<1x16x16xf32>
    %41 = tpu.matmul %38, %39, %cst_14 {dimension_numbers = #tpu.dot_dimension_numbers<[2], [2], [1], [1], [0, 0, 0, 1, 1, 1], [0], [0]>} : vector<1x16x64xbf16>, vector<1x16x64xbf16>, vector<1x16x16xf32> -> vector<1x16x16xf32>
    "tpu.trace_stop"() : () -> ()
    %42 = vector.shape_cast %37 : vector<16x16xf32> to vector<1x16x16xf32>
    %43 = arith.addf %41, %42 : vector<1x16x16xf32>
    %cst_15 = arith.constant dense<0xFF800000> : vector<1x16xf32>
    %44 = vector.multi_reduction <maximumf>, %43, %cst_15 [2] : vector<1x16x16xf32> to vector<1x16xf32>
    %45 = vector.shape_cast %44 : vector<1x16xf32> to vector<1x16x1xf32>
    %46 = vector.broadcast %45 : vector<1x16x1xf32> to vector<1x16x16xf32>
    %47 = arith.subf %43, %46 : vector<1x16x16xf32>
    %48 = math.exp %47 : vector<1x16x16xf32>
    %cst_16 = arith.constant dense<0.000000e+00> : vector<1x16xf32>
    %49 = vector.multi_reduction <add>, %48, %cst_16 [2] : vector<1x16x16xf32> to vector<1x16xf32>
    %50 = vector.shape_cast %49 : vector<1x16xf32> to vector<1x16x1xf32>
    %51 = tpu.reciprocal %50 {approx = true} : vector<1x16x1xf32> -> vector<1x16x1xf32>
    %52 = vector.broadcast %51 : vector<1x16x1xf32> to vector<1x16x16xf32>
    %53 = arith.mulf %48, %52 : vector<1x16x16xf32>
    %54 = arith.truncf %53 : vector<1x16x16xf32> to vector<1x16x16xbf16>
    "tpu.trace_start"() <{level = 10 : i32, message = "bqk,bkd->bqd"}> : () -> ()
    %cst_17 = arith.constant dense<0.000000e+00> : vector<1x16x64xf32>
    %55 = tpu.matmul %54, %40, %cst_17 {dimension_numbers = #tpu.dot_dimension_numbers<[2], [1], [1], [2], [0, 0, 0, 1, 1, 2], [0], [0]>} : vector<1x16x16xbf16>, vector<1x16x64xbf16>, vector<1x16x64xf32> -> vector<1x16x64xf32>
    "tpu.trace_stop"() : () -> ()
    %56 = vector.extract_strided_slice %30 {offsets = [0, 0, 64], sizes = [1, 16, 64], strides = [1, 1, 1]} : vector<1x16x384xbf16> to vector<1x16x64xbf16>
    %57 = vector.extract_strided_slice %33 {offsets = [0, 0, 64], sizes = [1, 16, 64], strides = [1, 1, 1]} : vector<1x16x384xbf16> to vector<1x16x64xbf16>
    %58 = vector.extract_strided_slice %36 {offsets = [0, 0, 64], sizes = [1, 16, 64], strides = [1, 1, 1]} : vector<1x16x384xbf16> to vector<1x16x64xbf16>
    "tpu.trace_start"() <{level = 10 : i32, message = "bqd,bkd->bqk"}> : () -> ()
    %cst_18 = arith.constant dense<0.000000e+00> : vector<1x16x16xf32>
    %59 = tpu.matmul %56, %57, %cst_18 {dimension_numbers = #tpu.dot_dimension_numbers<[2], [2], [1], [1], [0, 0, 0, 1, 1, 1], [0], [0]>} : vector<1x16x64xbf16>, vector<1x16x64xbf16>, vector<1x16x16xf32> -> vector<1x16x16xf32>
    "tpu.trace_stop"() : () -> ()
    %60 = vector.shape_cast %37 : vector<16x16xf32> to vector<1x16x16xf32>
    %61 = arith.addf %59, %60 : vector<1x16x16xf32>
    %cst_19 = arith.constant dense<0xFF800000> : vector<1x16xf32>
    %62 = vector.multi_reduction <maximumf>, %61, %cst_19 [2] : vector<1x16x16xf32> to vector<1x16xf32>
    %63 = vector.shape_cast %62 : vector<1x16xf32> to vector<1x16x1xf32>
    %64 = vector.broadcast %63 : vector<1x16x1xf32> to vector<1x16x16xf32>
    %65 = arith.subf %61, %64 : vector<1x16x16xf32>
    %66 = math.exp %65 : vector<1x16x16xf32>
    %cst_20 = arith.constant dense<0.000000e+00> : vector<1x16xf32>
    %67 = vector.multi_reduction <add>, %66, %cst_20 [2] : vector<1x16x16xf32> to vector<1x16xf32>
    %68 = vector.shape_cast %67 : vector<1x16xf32> to vector<1x16x1xf32>
    %69 = tpu.reciprocal %68 {approx = true} : vector<1x16x1xf32> -> vector<1x16x1xf32>
    %70 = vector.broadcast %69 : vector<1x16x1xf32> to vector<1x16x16xf32>
    %71 = arith.mulf %66, %70 : vector<1x16x16xf32>
    %72 = arith.truncf %71 : vector<1x16x16xf32> to vector<1x16x16xbf16>
    "tpu.trace_start"() <{level = 10 : i32, message = "bqk,bkd->bqd"}> : () -> ()
    %cst_21 = arith.constant dense<0.000000e+00> : vector<1x16x64xf32>
    %73 = tpu.matmul %72, %58, %cst_21 {dimension_numbers = #tpu.dot_dimension_numbers<[2], [1], [1], [2], [0, 0, 0, 1, 1, 2], [0], [0]>} : vector<1x16x16xbf16>, vector<1x16x64xbf16>, vector<1x16x64xf32> -> vector<1x16x64xf32>
    "tpu.trace_stop"() : () -> ()
    %74 = vector.extract_strided_slice %30 {offsets = [0, 0, 128], sizes = [1, 16, 64], strides = [1, 1, 1]} : vector<1x16x384xbf16> to vector<1x16x64xbf16>
    %75 = vector.extract_strided_slice %33 {offsets = [0, 0, 128], sizes = [1, 16, 64], strides = [1, 1, 1]} : vector<1x16x384xbf16> to vector<1x16x64xbf16>
    %76 = vector.extract_strided_slice %36 {offsets = [0, 0, 128], sizes = [1, 16, 64], strides = [1, 1, 1]} : vector<1x16x384xbf16> to vector<1x16x64xbf16>
    "tpu.trace_start"() <{level = 10 : i32, message = "bqd,bkd->bqk"}> : () -> ()
    %cst_22 = arith.constant dense<0.000000e+00> : vector<1x16x16xf32>
    %77 = tpu.matmul %74, %75, %cst_22 {dimension_numbers = #tpu.dot_dimension_numbers<[2], [2], [1], [1], [0, 0, 0, 1, 1, 1], [0], [0]>} : vector<1x16x64xbf16>, vector<1x16x64xbf16>, vector<1x16x16xf32> -> vector<1x16x16xf32>
    "tpu.trace_stop"() : () -> ()
    %78 = vector.shape_cast %37 : vector<16x16xf32> to vector<1x16x16xf32>
    %79 = arith.addf %77, %78 : vector<1x16x16xf32>
    %cst_23 = arith.constant dense<0xFF800000> : vector<1x16xf32>
    %80 = vector.multi_reduction <maximumf>, %79, %cst_23 [2] : vector<1x16x16xf32> to vector<1x16xf32>
    %81 = vector.shape_cast %80 : vector<1x16xf32> to vector<1x16x1xf32>
    %82 = vector.broadcast %81 : vector<1x16x1xf32> to vector<1x16x16xf32>
    %83 = arith.subf %79, %82 : vector<1x16x16xf32>
    %84 = math.exp %83 : vector<1x16x16xf32>
    %cst_24 = arith.constant dense<0.000000e+00> : vector<1x16xf32>
    %85 = vector.multi_reduction <add>, %84, %cst_24 [2] : vector<1x16x16xf32> to vector<1x16xf32>
    %86 = vector.shape_cast %85 : vector<1x16xf32> to vector<1x16x1xf32>
    %87 = tpu.reciprocal %86 {approx = true} : vector<1x16x1xf32> -> vector<1x16x1xf32>
    %88 = vector.broadcast %87 : vector<1x16x1xf32> to vector<1x16x16xf32>
    %89 = arith.mulf %84, %88 : vector<1x16x16xf32>
    %90 = arith.truncf %89 : vector<1x16x16xf32> to vector<1x16x16xbf16>
    "tpu.trace_start"() <{level = 10 : i32, message = "bqk,bkd->bqd"}> : () -> ()
    %cst_25 = arith.constant dense<0.000000e+00> : vector<1x16x64xf32>
    %91 = tpu.matmul %90, %76, %cst_25 {dimension_numbers = #tpu.dot_dimension_numbers<[2], [1], [1], [2], [0, 0, 0, 1, 1, 2], [0], [0]>} : vector<1x16x16xbf16>, vector<1x16x64xbf16>, vector<1x16x64xf32> -> vector<1x16x64xf32>
    "tpu.trace_stop"() : () -> ()
    %92 = vector.extract_strided_slice %30 {offsets = [0, 0, 192], sizes = [1, 16, 64], strides = [1, 1, 1]} : vector<1x16x384xbf16> to vector<1x16x64xbf16>
    %93 = vector.extract_strided_slice %33 {offsets = [0, 0, 192], sizes = [1, 16, 64], strides = [1, 1, 1]} : vector<1x16x384xbf16> to vector<1x16x64xbf16>
    %94 = vector.extract_strided_slice %36 {offsets = [0, 0, 192], sizes = [1, 16, 64], strides = [1, 1, 1]} : vector<1x16x384xbf16> to vector<1x16x64xbf16>
    "tpu.trace_start"() <{level = 10 : i32, message = "bqd,bkd->bqk"}> : () -> ()
    %cst_26 = arith.constant dense<0.000000e+00> : vector<1x16x16xf32>
    %95 = tpu.matmul %92, %93, %cst_26 {dimension_numbers = #tpu.dot_dimension_numbers<[2], [2], [1], [1], [0, 0, 0, 1, 1, 1], [0], [0]>} : vector<1x16x64xbf16>, vector<1x16x64xbf16>, vector<1x16x16xf32> -> vector<1x16x16xf32>
    "tpu.trace_stop"() : () -> ()
    %96 = vector.shape_cast %37 : vector<16x16xf32> to vector<1x16x16xf32>
    %97 = arith.addf %95, %96 : vector<1x16x16xf32>
    %cst_27 = arith.constant dense<0xFF800000> : vector<1x16xf32>
    %98 = vector.multi_reduction <maximumf>, %97, %cst_27 [2] : vector<1x16x16xf32> to vector<1x16xf32>
    %99 = vector.shape_cast %98 : vector<1x16xf32> to vector<1x16x1xf32>
    %100 = vector.broadcast %99 : vector<1x16x1xf32> to vector<1x16x16xf32>
    %101 = arith.subf %97, %100 : vector<1x16x16xf32>
    %102 = math.exp %101 : vector<1x16x16xf32>
    %cst_28 = arith.constant dense<0.000000e+00> : vector<1x16xf32>
    %103 = vector.multi_reduction <add>, %102, %cst_28 [2] : vector<1x16x16xf32> to vector<1x16xf32>
    %104 = vector.shape_cast %103 : vector<1x16xf32> to vector<1x16x1xf32>
    %105 = tpu.reciprocal %104 {approx = true} : vector<1x16x1xf32> -> vector<1x16x1xf32>
    %106 = vector.broadcast %105 : vector<1x16x1xf32> to vector<1x16x16xf32>
    %107 = arith.mulf %102, %106 : vector<1x16x16xf32>
    %108 = arith.truncf %107 : vector<1x16x16xf32> to vector<1x16x16xbf16>
    "tpu.trace_start"() <{level = 10 : i32, message = "bqk,bkd->bqd"}> : () -> ()
    %cst_29 = arith.constant dense<0.000000e+00> : vector<1x16x64xf32>
    %109 = tpu.matmul %108, %94, %cst_29 {dimension_numbers = #tpu.dot_dimension_numbers<[2], [1], [1], [2], [0, 0, 0, 1, 1, 2], [0], [0]>} : vector<1x16x16xbf16>, vector<1x16x64xbf16>, vector<1x16x64xf32> -> vector<1x16x64xf32>
    "tpu.trace_stop"() : () -> ()
    %110 = vector.extract_strided_slice %30 {offsets = [0, 0, 256], sizes = [1, 16, 64], strides = [1, 1, 1]} : vector<1x16x384xbf16> to vector<1x16x64xbf16>
    %111 = vector.extract_strided_slice %33 {offsets = [0, 0, 256], sizes = [1, 16, 64], strides = [1, 1, 1]} : vector<1x16x384xbf16> to vector<1x16x64xbf16>
    %112 = vector.extract_strided_slice %36 {offsets = [0, 0, 256], sizes = [1, 16, 64], strides = [1, 1, 1]} : vector<1x16x384xbf16> to vector<1x16x64xbf16>
    "tpu.trace_start"() <{level = 10 : i32, message = "bqd,bkd->bqk"}> : () -> ()
    %cst_30 = arith.constant dense<0.000000e+00> : vector<1x16x16xf32>
    %113 = tpu.matmul %110, %111, %cst_30 {dimension_numbers = #tpu.dot_dimension_numbers<[2], [2], [1], [1], [0, 0, 0, 1, 1, 1], [0], [0]>} : vector<1x16x64xbf16>, vector<1x16x64xbf16>, vector<1x16x16xf32> -> vector<1x16x16xf32>
    "tpu.trace_stop"() : () -> ()
    %114 = vector.shape_cast %37 : vector<16x16xf32> to vector<1x16x16xf32>
    %115 = arith.addf %113, %114 : vector<1x16x16xf32>
    %cst_31 = arith.constant dense<0xFF800000> : vector<1x16xf32>
    %116 = vector.multi_reduction <maximumf>, %115, %cst_31 [2] : vector<1x16x16xf32> to vector<1x16xf32>
    %117 = vector.shape_cast %116 : vector<1x16xf32> to vector<1x16x1xf32>
    %118 = vector.broadcast %117 : vector<1x16x1xf32> to vector<1x16x16xf32>
    %119 = arith.subf %115, %118 : vector<1x16x16xf32>
    %120 = math.exp %119 : vector<1x16x16xf32>
    %cst_32 = arith.constant dense<0.000000e+00> : vector<1x16xf32>
    %121 = vector.multi_reduction <add>, %120, %cst_32 [2] : vector<1x16x16xf32> to vector<1x16xf32>
    %122 = vector.shape_cast %121 : vector<1x16xf32> to vector<1x16x1xf32>
    %123 = tpu.reciprocal %122 {approx = true} : vector<1x16x1xf32> -> vector<1x16x1xf32>
    %124 = vector.broadcast %123 : vector<1x16x1xf32> to vector<1x16x16xf32>
    %125 = arith.mulf %120, %124 : vector<1x16x16xf32>
    %126 = arith.truncf %125 : vector<1x16x16xf32> to vector<1x16x16xbf16>
    "tpu.trace_start"() <{level = 10 : i32, message = "bqk,bkd->bqd"}> : () -> ()
    %cst_33 = arith.constant dense<0.000000e+00> : vector<1x16x64xf32>
    %127 = tpu.matmul %126, %112, %cst_33 {dimension_numbers = #tpu.dot_dimension_numbers<[2], [1], [1], [2], [0, 0, 0, 1, 1, 2], [0], [0]>} : vector<1x16x16xbf16>, vector<1x16x64xbf16>, vector<1x16x64xf32> -> vector<1x16x64xf32>
    "tpu.trace_stop"() : () -> ()
    %128 = vector.extract_strided_slice %30 {offsets = [0, 0, 320], sizes = [1, 16, 64], strides = [1, 1, 1]} : vector<1x16x384xbf16> to vector<1x16x64xbf16>
    %129 = vector.extract_strided_slice %33 {offsets = [0, 0, 320], sizes = [1, 16, 64], strides = [1, 1, 1]} : vector<1x16x384xbf16> to vector<1x16x64xbf16>
    %130 = vector.extract_strided_slice %36 {offsets = [0, 0, 320], sizes = [1, 16, 64], strides = [1, 1, 1]} : vector<1x16x384xbf16> to vector<1x16x64xbf16>
    "tpu.trace_start"() <{level = 10 : i32, message = "bqd,bkd->bqk"}> : () -> ()
    %cst_34 = arith.constant dense<0.000000e+00> : vector<1x16x16xf32>
    %131 = tpu.matmul %128, %129, %cst_34 {dimension_numbers = #tpu.dot_dimension_numbers<[2], [2], [1], [1], [0, 0, 0, 1, 1, 1], [0], [0]>} : vector<1x16x64xbf16>, vector<1x16x64xbf16>, vector<1x16x16xf32> -> vector<1x16x16xf32>
    "tpu.trace_stop"() : () -> ()
    %132 = vector.shape_cast %37 : vector<16x16xf32> to vector<1x16x16xf32>
    %133 = arith.addf %131, %132 : vector<1x16x16xf32>
    %cst_35 = arith.constant dense<0xFF800000> : vector<1x16xf32>
    %134 = vector.multi_reduction <maximumf>, %133, %cst_35 [2] : vector<1x16x16xf32> to vector<1x16xf32>
    %135 = vector.shape_cast %134 : vector<1x16xf32> to vector<1x16x1xf32>
    %136 = vector.broadcast %135 : vector<1x16x1xf32> to vector<1x16x16xf32>
    %137 = arith.subf %133, %136 : vector<1x16x16xf32>
    %138 = math.exp %137 : vector<1x16x16xf32>
    %cst_36 = arith.constant dense<0.000000e+00> : vector<1x16xf32>
    %139 = vector.multi_reduction <add>, %138, %cst_36 [2] : vector<1x16x16xf32> to vector<1x16xf32>
    %140 = vector.shape_cast %139 : vector<1x16xf32> to vector<1x16x1xf32>
    %141 = tpu.reciprocal %140 {approx = true} : vector<1x16x1xf32> -> vector<1x16x1xf32>
    %142 = vector.broadcast %141 : vector<1x16x1xf32> to vector<1x16x16xf32>
    %143 = arith.mulf %138, %142 : vector<1x16x16xf32>
    %144 = arith.truncf %143 : vector<1x16x16xf32> to vector<1x16x16xbf16>
    "tpu.trace_start"() <{level = 10 : i32, message = "bqk,bkd->bqd"}> : () -> ()
    %cst_37 = arith.constant dense<0.000000e+00> : vector<1x16x64xf32>
    %145 = tpu.matmul %144, %130, %cst_37 {dimension_numbers = #tpu.dot_dimension_numbers<[2], [1], [1], [2], [0, 0, 0, 1, 1, 2], [0], [0]>} : vector<1x16x16xbf16>, vector<1x16x64xbf16>, vector<1x16x64xf32> -> vector<1x16x64xf32>
    "tpu.trace_stop"() : () -> ()
    %146 = tpu.concatenate %55, %73, %91, %109, %127, %145 in 2 : vector<1x16x64xf32>, vector<1x16x64xf32>, vector<1x16x64xf32>, vector<1x16x64xf32>, vector<1x16x64xf32>, vector<1x16x64xf32> -> vector<1x16x384xf32>
    %147 = vector.shape_cast %146 : vector<1x16x384xf32> to vector<16x384xf32>
    %148 = arith.truncf %147 : vector<16x384xf32> to vector<16x384xbf16>
    %c0_38 = arith.constant 0 : index
    %c0_39 = arith.constant 0 : index
    %149 = vector.load %arg3[%c0_38, %c0_39] : memref<384x384xbf16, #tpu.memory_space<vmem>>, vector<384x384xbf16>
    %cst_40 = arith.constant dense<0.000000e+00> : vector<16x384xf32>
    %150 = tpu.matmul %148, %149, %cst_40 {dimension_numbers = #tpu.dot_dimension_numbers<[1], [0], [0], [1], [0, 0, 1, 1], [], []>} : vector<16x384xbf16>, vector<384x384xbf16>, vector<16x384xf32> -> vector<16x384xf32>
    %151 = arith.addf %0, %150 : vector<16x384xf32>
    %c0_41 = arith.constant 0 : index
    %c0_42 = arith.constant 0 : index
    %152 = vector.load %arg4[%c0_41, %c0_42] : memref<1x384xf32, #tpu.memory_space<vmem>>, vector<1x384xf32>
    %153 = vector.broadcast %152 : vector<1x384xf32> to vector<16x384xf32>
    %154 = arith.addf %151, %153 : vector<16x384xf32>
    %c0_43 = arith.constant 0 : index
    %c0_44 = arith.constant 0 : index
    %155 = vector.load %arg11[%c0_43, %c0_44] : memref<1x384xf32, #tpu.memory_space<vmem>>, vector<1x384xf32>
    %c0_45 = arith.constant 0 : index
    %c0_46 = arith.constant 0 : index
    %156 = vector.load %arg12[%c0_45, %c0_46] : memref<1x384xf32, #tpu.memory_space<vmem>>, vector<1x384xf32>
    %cst_47 = arith.constant dense<0.000000e+00> : vector<16xf32>
    %157 = vector.multi_reduction <add>, %154, %cst_47 [1] : vector<16x384xf32> to vector<16xf32>
    %158 = vector.shape_cast %157 : vector<16xf32> to vector<16x1xf32>
    %cst_48 = arith.constant 3.840000e+02 : f32
    %159 = vector.broadcast %cst_48 : f32 to vector<16x1xf32>
    %160 = arith.divf %158, %159 : vector<16x1xf32>
    %161 = vector.broadcast %160 : vector<16x1xf32> to vector<16x384xf32>
    %162 = arith.subf %154, %161 : vector<16x384xf32>
    %163 = arith.mulf %162, %162 : vector<16x384xf32>
    %cst_49 = arith.constant dense<0.000000e+00> : vector<16xf32>
    %164 = vector.multi_reduction <add>, %163, %cst_49 [1] : vector<16x384xf32> to vector<16xf32>
    %165 = vector.shape_cast %164 : vector<16xf32> to vector<16x1xf32>
    %cst_50 = arith.constant 3.840000e+02 : f32
    %166 = vector.broadcast %cst_50 : f32 to vector<16x1xf32>
    %167 = arith.divf %165, %166 : vector<16x1xf32>
    %168 = vector.broadcast %160 : vector<16x1xf32> to vector<16x384xf32>
    %169 = arith.subf %154, %168 : vector<16x384xf32>
    %cst_51 = arith.constant 9.99999974E-6 : f32
    %170 = vector.broadcast %cst_51 : f32 to vector<16x1xf32>
    %171 = arith.addf %167, %170 : vector<16x1xf32>
    %172 = math.rsqrt %171 : vector<16x1xf32>
    %173 = vector.broadcast %172 : vector<16x1xf32> to vector<16x384xf32>
    %174 = arith.mulf %169, %173 : vector<16x384xf32>
    %175 = vector.broadcast %155 : vector<1x384xf32> to vector<16x384xf32>
    %176 = arith.mulf %174, %175 : vector<16x384xf32>
    %177 = vector.broadcast %156 : vector<1x384xf32> to vector<16x384xf32>
    %178 = arith.addf %176, %177 : vector<16x384xf32>
    %179 = arith.truncf %178 : vector<16x384xf32> to vector<16x384xbf16>
    %c0_52 = arith.constant 0 : index
    %c0_53 = arith.constant 0 : index
    %180 = vector.load %arg5[%c0_52, %c0_53] : memref<384x1536xbf16, #tpu.memory_space<vmem>>, vector<384x1536xbf16>
    %cst_54 = arith.constant dense<0.000000e+00> : vector<16x1536xf32>
    %181 = tpu.matmul %179, %180, %cst_54 {dimension_numbers = #tpu.dot_dimension_numbers<[1], [0], [0], [1], [0, 0, 1, 1], [], []>} : vector<16x384xbf16>, vector<384x1536xbf16>, vector<16x1536xf32> -> vector<16x1536xf32>
    %c0_55 = arith.constant 0 : index
    %c0_56 = arith.constant 0 : index
    %182 = vector.load %arg6[%c0_55, %c0_56] : memref<1x1536xf32, #tpu.memory_space<vmem>>, vector<1x1536xf32>
    %183 = vector.broadcast %182 : vector<1x1536xf32> to vector<16x1536xf32>
    %184 = arith.addf %181, %183 : vector<16x1536xf32>
    %cst_57 = arith.constant 0.000000e+00 : f32
    %185 = vector.broadcast %cst_57 : f32 to vector<16x1536xf32>
    %186 = arith.maximumf %184, %185 : vector<16x1536xf32>
    %187 = arith.truncf %186 : vector<16x1536xf32> to vector<16x1536xbf16>
    %c0_58 = arith.constant 0 : index
    %c0_59 = arith.constant 0 : index
    %188 = vector.load %arg7[%c0_58, %c0_59] : memref<1536x384xbf16, #tpu.memory_space<vmem>>, vector<1536x384xbf16>
    %cst_60 = arith.constant dense<0.000000e+00> : vector<16x384xf32>
    %189 = tpu.matmul %187, %188, %cst_60 {dimension_numbers = #tpu.dot_dimension_numbers<[1], [0], [0], [1], [0, 0, 1, 1], [], []>} : vector<16x1536xbf16>, vector<1536x384xbf16>, vector<16x384xf32> -> vector<16x384xf32>
    %c0_61 = arith.constant 0 : index
    %c0_62 = arith.constant 0 : index
    %190 = vector.load %arg8[%c0_61, %c0_62] : memref<1x384xf32, #tpu.memory_space<vmem>>, vector<1x384xf32>
    %191 = vector.broadcast %190 : vector<1x384xf32> to vector<16x384xf32>
    %192 = arith.addf %189, %191 : vector<16x384xf32>
    %193 = arith.addf %154, %192 : vector<16x384xf32>
    %c0_63 = arith.constant 0 : index
    %c0_64 = arith.constant 0 : index
    %194 = vector.load %arg14[%c0_63, %c0_64] : memref<16x384xf32, #tpu.memory_space<vmem>>, vector<16x384xf32>
    tpu.vector_store %arg14[%c0_63, %c0_64], %193 {strides = array<i32>} : memref<16x384xf32, #tpu.memory_space<vmem>>, vector<16x384xf32>,
    return
  }
  func.func @transform_0(%arg0: i32) -> (i32, i32) {
    %c0_i32 = arith.constant 0 : i32
    %c0_i32_0 = arith.constant 0 : i32
    return %arg0, %c0_i32 : i32, i32
  }
  func.func @transform_1(%arg0: i32) -> (i32, i32) {
    %c0_i32 = arith.constant 0 : i32
    %c0_i32_0 = arith.constant 0 : i32
    %c0_i32_1 = arith.constant 0 : i32
    return %c0_i32, %c0_i32_0 : i32, i32
  }
  func.func @transform_2(%arg0: i32) -> (i32, i32) {
    %c0_i32 = arith.constant 0 : i32
    %c0_i32_0 = arith.constant 0 : i32
    %c0_i32_1 = arith.constant 0 : i32
    return %c0_i32, %c0_i32_0 : i32, i32
  }
  func.func @transform_3(%arg0: i32) -> (i32, i32) {
    %c0_i32 = arith.constant 0 : i32
    %c0_i32_0 = arith.constant 0 : i32
    %c0_i32_1 = arith.constant 0 : i32
    return %c0_i32, %c0_i32_0 : i32, i32
  }
  func.func @transform_4(%arg0: i32) -> (i32, i32) {
    %c0_i32 = arith.constant 0 : i32
    %c0_i32_0 = arith.constant 0 : i32
    %c0_i32_1 = arith.constant 0 : i32
    return %c0_i32, %c0_i32_0 : i32, i32
  }
  func.func @transform_5(%arg0: i32) -> (i32, i32) {
    %c0_i32 = arith.constant 0 : i32
    %c0_i32_0 = arith.constant 0 : i32
    %c0_i32_1 = arith.constant 0 : i32
    return %c0_i32, %c0_i32_0 : i32, i32
  }
  func.func @transform_6(%arg0: i32) -> (i32, i32) {
    %c0_i32 = arith.constant 0 : i32
    %c0_i32_0 = arith.constant 0 : i32
    %c0_i32_1 = arith.constant 0 : i32
    return %c0_i32, %c0_i32_0 : i32, i32
  }
  func.func @transform_7(%arg0: i32) -> (i32, i32) {
    %c0_i32 = arith.constant 0 : i32
    %c0_i32_0 = arith.constant 0 : i32
    %c0_i32_1 = arith.constant 0 : i32
    return %c0_i32, %c0_i32_0 : i32, i32
  }
  func.func @transform_8(%arg0: i32) -> (i32, i32) {
    %c0_i32 = arith.constant 0 : i32
    %c0_i32_0 = arith.constant 0 : i32
    %c0_i32_1 = arith.constant 0 : i32
    return %c0_i32, %c0_i32_0 : i32, i32
  }
  func.func @transform_9(%arg0: i32) -> (i32, i32) {
    %c0_i32 = arith.constant 0 : i32
    %c0_i32_0 = arith.constant 0 : i32
    %c0_i32_1 = arith.constant 0 : i32
    return %c0_i32, %c0_i32_0 : i32, i32
  }
  func.func @transform_10(%arg0: i32) -> (i32, i32) {
    %c0_i32 = arith.constant 0 : i32
    %c0_i32_0 = arith.constant 0 : i32
    %c0_i32_1 = arith.constant 0 : i32
    return %c0_i32, %c0_i32_0 : i32, i32
  }
  func.func @transform_11(%arg0: i32) -> (i32, i32) {
    %c0_i32 = arith.constant 0 : i32
    %c0_i32_0 = arith.constant 0 : i32
    %c0_i32_1 = arith.constant 0 : i32
    return %c0_i32, %c0_i32_0 : i32, i32
  }
  func.func @transform_12(%arg0: i32) -> (i32, i32) {
    %c0_i32 = arith.constant 0 : i32
    %c0_i32_0 = arith.constant 0 : i32
    %c0_i32_1 = arith.constant 0 : i32
    return %c0_i32, %c0_i32_0 : i32, i32
  }
  func.func @transform_13(%arg0: i32) -> (i32, i32) {
    %c0_i32 = arith.constant 0 : i32
    %c0_i32_0 = arith.constant 0 : i32
    return %arg0, %c0_i32 : i32, i32
  }
}

</mosaic_0001>

<bundles_post_ra>
// kernel: tpu_custom_call.1
= control target key start
LH: loop header
LB: loop body
LE: loop exit
PB: predicated region body
PF: predicated region fallthrough
CT: control target
= control target key end

     0   :  { %s13339_s0 = inlined_call_operand.hbm [shape: f32[32,384], index: 0, kind: input, shape index: {}]   ;;  %s13340_s1 = inlined_call_operand.hbm [shape: bf16[384,1152], index: 1, kind: input, shape index: {}]   ;;  %s13341_s2 = inlined_call_operand.hbm [shape: bf16[384,384], index: 2, kind: input, shape index: {}]   ;;  %s13342_s3 = inlined_call_operand.hbm [shape: f32[1,384], index: 3, kind: input, shape index: {}]   ;;  %s13343_s4 = inlined_call_operand.hbm [shape: bf16[384,1536], index: 4, kind: input, shape index: {}]   ;;  %s13344_s5 = inlined_call_operand.hbm [shape: f32[1,1536], index: 5, kind: input, shape index: {}]   ;;  %s13345_s6 = inlined_call_operand.hbm [shape: bf16[1536,384], index: 6, kind: input, shape index: {}]   ;;  %s13346_s7 = inlined_call_operand.hbm [shape: f32[1,384], index: 7, kind: input, shape index: {}]   ;;  %s13347_s8 = inlined_call_operand.hbm [shape: f32[1,384], index: 8, kind: input, shape index: {}]   ;;  %s13348_s9 = inlined_call_operand.hbm [shape: f32[1,384], index: 9, kind: input, shape index: {}]   ;;  %s13349_s10 = inlined_call_operand.hbm [shape: f32[1,384], index: 10, kind: input, shape index: {}]   ;;  %s13350_s11 = inlined_call_operand.hbm [shape: f32[1,384], index: 11, kind: input, shape index: {}]   ;;  %s13351_s12 = inlined_call_operand.hbm [shape: f32[16,16], index: 12, kind: input, shape index: {}]   ;;  %s13352_s13 = inlined_call_operand.hbm [shape: f32[32,384], index: 13, kind: output, shape index: {}]  }
   0x1   :  { %13364 = sst [smem:[#allocation35_spill]] %s13339_s0 }
   0x2   :  { %13365 = sst [smem:[#allocation36_spill]] %s13340_s1 }
   0x3   :  { %13366 = sst [smem:[#allocation37_spill]] %s13341_s2 }
   0x4   :  { %13367 = sst [smem:[#allocation38_spill]] %s13342_s3 }
   0x5   :  { %13368 = sst [smem:[#allocation39_spill]] %s13352_s13 }
   0x6   :  { %18 = vsyncpa [#allocation3], 0 }
   0x7   :  { %20 = vsyncpa [#allocation3 + $0x1], 0 }
   0x8   :  { %21 = vsyncpa [#allocation6], 0 }
   0x9   :  { %22 = vsyncpa [#allocation9], 0 }
   0xa   :  { %23 = vsyncpa [#allocation12], 0 }
   0xb   :  { %24 = vsyncpa [#allocation15], 0 }
   0xc   :  { %25 = vsyncpa [#allocation18], 0 }
   0xd   :  { %26 = vsyncpa [#allocation21], 0 }
   0xe   :  { %27 = vsyncpa [#allocation4], 0 }
   0xf   :  { %29 = vsyncpa [#allocation4 + $0x1], 0  ;;  %s12398_s25 = smov 0   ;;  %s12400_s26 = smov 0  }
  0x10   :  { %s12402_s27 = smov 0   ;;  %s12404_s28 = smov 0  }
  0x11 LB: > { %13369 = sst [smem:[#allocation32_spill]] %s12284_s25  ;;  %s12298_s29 = smov [#allocation5]   ;;  %s12296_s28 = sphi %s12404_s28, %s13411_s28   ;;  %s12292_s27 = sphi %s12402_s27, %s13410_s27   ;;  %s12288_s26 = sphi %s12400_s26, %s13409_s26   ;;  %s12284_s25 = sphi %s12398_s25, %s13408_s25  }
  0x12   : > { %s356_s30 = sshll.u32 %s12298_s29, 4  ;;  %s12419_s14 = sadd.s32 4294967295, %s12296_s28   ;;  %s12424_s30 = int_to_ptr.vmem [resolvable:$true] %s356_s30 }
  0x13   : > { %13370 = sst [smem:[#allocation33_spill]] %s12419_s14  ;;  %p9019_p0 = scmp.ge.s32.totalorder %s12296_s28, 1 }
  0x14   : > { %p13359_p1 = scmp.eq.s32.totalorder %s12419_s14, 0  ;;  %p344_p2 = scmp.lt.s32.totalorder %s12296_s28, 3 }
  0x15   : > { %s12299_s16 = smov [#allocation8]   ;;  %s12300_s19 = smov [#allocation11]  }
  0x16   : > { %p12426_p3 = pnand %p9019_p0, %p344_p2  ;;  %s383_s17 = sshll.u32 %s12299_s16, 4  ;;  %s12439_s17 = int_to_ptr.vmem [resolvable:$true] %s383_s17 }
  0x17   : > { %s407_s20 = sshll.u32 %s12300_s19, 4  ;;  %s13374_s1 = sld [smem:[#allocation36_spill]]  ;;  %s12441_s20 = int_to_ptr.vmem [resolvable:$true] %s407_s20 }
  0x18   : > { %s13371_s15 = scalar_select %p12426_p3, 1, 0 }
  0x19   : > { %p10408_p5 = pneg %p12426_p3 }
  0x1a   : > { %13372 = sst [smem:[#allocation34_spill]] %s13371_s15 }
  0x1b   : > { %p12435_p6 = pnand %p10408_p5, %p13359_p1 }
  0x1d   : > { %s11840_s23 = scalar_lea.hbm %s13374_s1, 27648  ;;  %p12451_p8 = pneg %p12435_p6 }
  0x1e   : > { %p11841_p7 = scmp.ne.s32.totalorder %s13374_s1, %s11840_s23  ;;  %p11847_p11 = scmp.lt.u32.totalorder %s11840_s23, %s13374_s1 }
  0x20   : > { %p11843_p9 = pnand %p12451_p8, %p11841_p7 }
  0x22   : > { %p11844_p10 = pneg %p11843_p9 }
  0x24   : > { %p11849_p12 = pnand %p11847_p11, %p11844_p10 }
  0x26   : > { %11852 = shalt.err (!%p11849_p12)
}
  0x27   : > { %s11853_s21 = scalar_lea.vmem %s12424_s30, 27648  ;;  %p11861_p5 = scmp.lt.s32.totalorder %s12424_s30, %s12424_s30 }
  0x28   : > { %p11854_p13 = scmp.ne.s32.totalorder %s12424_s30, %s11853_s21  ;;  %p11862_p4 = scmp.lt.s32.totalorder %s11853_s21, %s11853_s21 }
  0x2a   : > { %p11856_p0 = pnand %p11854_p13, %p12451_p8  ;;  %p11863_p7 = por %p11862_p4, %p11861_p5 }
  0x2c   : > { %p11857_p2 = pneg %p11856_p0 }
  0x2e   : > { %p11864_p9 = pnand %p11863_p7, %p11857_p2 }
  0x30   : > { %11867 = shalt.err (!%p11864_p9)
}
  0x31   : > { %s12301_s22 = smov 576   ;;  %s12302_s13 = smov 36  }
  0x32   : > { %10411 = dma.hbm_to_vmem [thread:$0]  (!%p12435_p6), %s13374_s1, 27648, %s12424_s30, [#allocation6], %s12301_s22, %s12301_s22, %s12302_s13  }
  0x33   : > { %s13376_s3 = sld [smem:[#allocation38_spill]] }
  0x39   : > { %s11868_s15 = scalar_lea.hbm %s13376_s3, 48 }
  0x3a   : > { %p11869_p4 = scmp.ne.s32.totalorder %s13376_s3, %s11868_s15  ;;  %p11875_p12 = scmp.lt.u32.totalorder %s11868_s15, %s13376_s3 }
  0x3c   : > { %p11871_p10 = pnand %p11869_p4, %p12451_p8 }
  0x3e   : > { %p11872_p11 = pneg %p11871_p10 }
  0x40   : > { %p11877_p13 = pnand %p11875_p12, %p11872_p11 }
  0x42   : > { %11880 = shalt.err (!%p11877_p13)
}
  0x43   : > { %s11881_s30 = scalar_lea.vmem %s12439_s17, 48  ;;  %s11888_s0 = scalar_lea.vmem %s12439_s17, 64 }
  0x44   : > { %p11882_p0 = scmp.ne.s32.totalorder %s12439_s17, %s11881_s30  ;;  %p11889_p7 = scmp.lt.s32.totalorder %s12439_s17, %s12439_s17 }
  0x45   : > { %p11890_p9 = scmp.lt.s32.totalorder %s11888_s0, %s11881_s30 }
  0x46   : > { %p11884_p2 = pnand %p11882_p0, %p12451_p8 }
  0x47   : > { %p11891_p4 = por %p11890_p9, %p11889_p7 }
  0x48   : > { %p11885_p5 = pneg %p11884_p2 }
  0x4a   : > { %p11892_p10 = pnand %p11891_p4, %p11885_p5 }
  0x4c   : > { %11895 = shalt.err (!%p11892_p10)
}
  0x4d   : > { %10417 = dma.hbm_to_vmem [thread:$0]  (!%p12435_p6), %s13376_s3, 48, %s12439_s17, [#allocation9]  }
  0x4e   : > { %s11896_s13 = scalar_lea.hbm %s13344_s5, 192 }
  0x4f   : > { %p11897_p11 = scmp.ne.s32.totalorder %s13344_s5, %s11896_s13  ;;  %p11903_p0 = scmp.lt.u32.totalorder %s11896_s13, %s13344_s5 }
  0x51   : > { %p11899_p12 = pnand %p11897_p11, %p12451_p8 }
  0x53   : > { %p11900_p13 = pneg %p11899_p12 }
  0x55   : > { %p11905_p2 = pnand %p11903_p0, %p11900_p13 }
  0x57   : > { %11908 = shalt.err (!%p11905_p2)
}
  0x58   : > { %s11909_s17 = scalar_lea.vmem %s12441_s20, 192  ;;  %p11917_p4 = scmp.lt.s32.totalorder %s12441_s20, %s12441_s20 }
  0x59   : > { %p11910_p5 = scmp.ne.s32.totalorder %s12441_s20, %s11909_s17  ;;  %p11918_p10 = scmp.lt.s32.totalorder %s11909_s17, %s11909_s17 }
  0x5b   : > { %p11912_p7 = pnand %p11910_p5, %p12451_p8  ;;  %p11919_p11 = por %p11918_p10, %p11917_p4 }
  0x5d   : > { %p11913_p9 = pneg %p11912_p7 }
  0x5f   : > { %p11920_p12 = pnand %p11919_p11, %p11913_p9 }
  0x61   : > { %11923 = shalt.err (!%p11920_p12)
}
  0x62   : > { %10423 = dma.hbm_to_vmem [thread:$0]  (!%p12435_p6), %s13344_s5, 192, %s12441_s20, [#allocation12]  }
  0x63   : > { %s12303_s0 = smov [#allocation14]   ;;  %s12304_s14 = smov [#allocation17]  }
  0x64   : > { %s431_s25 = sshll.u32 %s12303_s0, 4  ;;  %s453_s15 = sshll.u32 %s12304_s14, 4  ;;  %s432_s25 = int_to_ptr.vmem [resolvable:$true] %s431_s25  ;;  %s454_s15 = int_to_ptr.vmem [resolvable:$true] %s453_s15 }
  0x65   : > { %s11924_s23 = scalar_lea.hbm %s13346_s7, 48 }
  0x66   : > { %p11925_p13 = scmp.ne.s32.totalorder %s13346_s7, %s11924_s23  ;;  %p11931_p5 = scmp.lt.u32.totalorder %s11924_s23, %s13346_s7 }
  0x68   : > { %p11927_p0 = pnand %p11925_p13, %p12451_p8 }
  0x6a   : > { %p11928_p2 = pneg %p11927_p0 }
  0x6c   : > { %p11933_p7 = pnand %p11931_p5, %p11928_p2 }
  0x6e   : > { %11936 = shalt.err (!%p11933_p7)
}
  0x6f   : > { %s11937_s20 = scalar_lea.vmem %s432_s25, 48  ;;  %s11944_s21 = scalar_lea.vmem %s432_s25, 64 }
  0x70   : > { %p11938_p9 = scmp.ne.s32.totalorder %s432_s25, %s11937_s20  ;;  %p11945_p11 = scmp.lt.s32.totalorder %s432_s25, %s432_s25 }
  0x71   : > { %p11946_p12 = scmp.lt.s32.totalorder %s11944_s21, %s11937_s20 }
  0x72   : > { %p11940_p4 = pnand %p11938_p9, %p12451_p8 }
  0x73   : > { %p11947_p1 = por %p11946_p12, %p11945_p11 }
  0x74   : > { %p11941_p10 = pneg %p11940_p4 }
  0x76   : > { %p11948_p3 = pnand %p11947_p1, %p11941_p10 }
  0x78   : > { %11951 = shalt.err (!%p11948_p3)
}
  0x79   : > { %10429 = dma.hbm_to_vmem [thread:$0]  (!%p12435_p6), %s13346_s7, 48, %s432_s25, [#allocation15]  }
  0x7a   : > { %s11952_s13 = scalar_lea.hbm %s13348_s9, 48 }
  0x7b   : > { %p11953_p13 = scmp.ne.s32.totalorder %s13348_s9, %s11952_s13  ;;  %p11959_p3 = scmp.lt.u32.totalorder %s11952_s13, %s13348_s9 }
  0x7d   : > { %p11955_p0 = pnand %p11953_p13, %p12451_p8 }
  0x7f   : > { %p11956_p1 = pneg %p11955_p0 }
  0x81   : > { %p11961_p2 = pnand %p11959_p3, %p11956_p1 }
  0x83   : > { %11964 = shalt.err (!%p11961_p2)
}
  0x84   : > { %s11965_s17 = scalar_lea.vmem %s454_s15, 48  ;;  %s11972_s25 = scalar_lea.vmem %s454_s15, 64 }
  0x85   : > { %p11966_p5 = scmp.ne.s32.totalorder %s454_s15, %s11965_s17  ;;  %p11973_p4 = scmp.lt.s32.totalorder %s454_s15, %s454_s15 }
  0x86   : > { %p11974_p10 = scmp.lt.s32.totalorder %s11972_s25, %s11965_s17 }
  0x87   : > { %p11968_p7 = pnand %p11966_p5, %p12451_p8 }
  0x88   : > { %p11975_p11 = por %p11974_p10, %p11973_p4 }
  0x89   : > { %p11969_p9 = pneg %p11968_p7 }
  0x8b   : > { %p11976_p12 = pnand %p11975_p11, %p11969_p9 }
  0x8d   : > { %11979 = shalt.err (!%p11976_p12)
}
  0x8e   : > { %10435 = dma.hbm_to_vmem [thread:$0]  (!%p12435_p6), %s13348_s9, 48, %s454_s15, [#allocation18]  }
  0x8f   : > { %s12305_s30 = smov [#allocation20]   ;;  %s12306_s14 = smov [#allocation7]  }
  0x90   : > { %s475_s0 = sshll.u32 %s12305_s30, 4  ;;  %s369_s22 = sshll.u32 %s12306_s14, 4  ;;  %s476_s0 = int_to_ptr.vmem [resolvable:$true] %s475_s0  ;;  %s370_s22 = int_to_ptr.vmem [resolvable:$true] %s369_s22 }
  0x91   : > { %s11980_s24 = scalar_lea.hbm %s13350_s11, 48 }
  0x92   : > { %p11981_p13 = scmp.ne.s32.totalorder %s13350_s11, %s11980_s24  ;;  %p11987_p3 = scmp.lt.u32.totalorder %s11980_s24, %s13350_s11 }
  0x94   : > { %p11983_p0 = pnand %p11981_p13, %p12451_p8 }
  0x96   : > { %p11984_p1 = pneg %p11983_p0 }
  0x98   : > { %p11989_p2 = pnand %p11987_p3, %p11984_p1 }
  0x9a   : > { %11992 = shalt.err (!%p11989_p2)
}
  0x9b   : > { %s11993_s15 = scalar_lea.vmem %s476_s0, 48  ;;  %s12000_s20 = scalar_lea.vmem %s476_s0, 64 }
  0x9c   : > { %p11994_p5 = scmp.ne.s32.totalorder %s476_s0, %s11993_s15  ;;  %p12001_p4 = scmp.lt.s32.totalorder %s476_s0, %s476_s0 }
  0x9d   : > { %p12002_p10 = scmp.lt.s32.totalorder %s12000_s20, %s11993_s15 }
  0x9e   : > { %p11996_p7 = pnand %p11994_p5, %p12451_p8 }
  0x9f   : > { %p12003_p11 = por %p12002_p10, %p12001_p4 }
  0xa0   : > { %p11997_p9 = pneg %p11996_p7 }
  0xa2   : > { %p12004_p12 = pnand %p12003_p11, %p11997_p9 }
  0xa4   : > { %12007 = shalt.err (!%p12004_p12)
}
  0xa5   : > { %10441 = dma.hbm_to_vmem [thread:$0]  (!%p12435_p6), %s13350_s11, 48, %s476_s0, [#allocation21]  }
  0xa6   : > { %s13377_s2 = sld [smem:[#allocation37_spill]] }
  0xac   : > { %s12008_s23 = scalar_lea.hbm %s13377_s2, 9216 }
  0xad   : > { %p12009_p13 = scmp.ne.s32.totalorder %s13377_s2, %s12008_s23  ;;  %p12015_p3 = scmp.lt.u32.totalorder %s12008_s23, %s13377_s2 }
  0xaf   : > { %p12011_p0 = pnand %p12009_p13, %p12451_p8 }
  0xb1   : > { %p12012_p1 = pneg %p12011_p0 }
  0xb3   : > { %p12017_p2 = pnand %p12015_p3, %p12012_p1 }
  0xb5   : > { %12020 = shalt.err (!%p12017_p2)
}
  0xb6   : > { %s12021_s25 = scalar_lea.vmem %s370_s22, 9216  ;;  %p12029_p4 = scmp.lt.s32.totalorder %s370_s22, %s370_s22 }
  0xb7   : > { %p12022_p5 = scmp.ne.s32.totalorder %s370_s22, %s12021_s25  ;;  %p12030_p10 = scmp.lt.s32.totalorder %s12021_s25, %s12021_s25 }
  0xb9   : > { %p12024_p7 = pnand %p12022_p5, %p12451_p8  ;;  %p12031_p11 = por %p12030_p10, %p12029_p4 }
  0xbb   : > { %p12025_p9 = pneg %p12024_p7 }
  0xbd   : > { %p12032_p12 = pnand %p12031_p11, %p12025_p9 }
  0xbf   : > { %12035 = shalt.err (!%p12032_p12)
}
  0xc0   : > { %s13361_s0 = smov 192   ;;  %s13362_s15 = smov 12  }
  0xc1   : > { %10414 = dma.hbm_to_vmem [thread:$0]  (!%p12435_p6), %s13377_s2, 9216, %s370_s22, [#allocation6], %s13361_s0, %s13361_s0, %s13362_s15  }
  0xc2   : > { %s12309_s30 = smov [#allocation10]   ;;  %s12036_s24 = scalar_lea.hbm %s13343_s4, 36864 }
  0xc3   : > { %s393_s14 = sshll.u32 %s12309_s30, 4  ;;  %p12037_p13 = scmp.ne.s32.totalorder %s13343_s4, %s12036_s24  ;;  %s394_s14 = int_to_ptr.vmem [resolvable:$true] %s393_s14 }
  0xc4   : > { %p12043_p3 = scmp.lt.u32.totalorder %s12036_s24, %s13343_s4 }
  0xc5   : > { %p12039_p0 = pnand %p12037_p13, %p12451_p8 }
  0xc7   : > { %p12040_p1 = pneg %p12039_p0 }
  0xc9   : > { %p12045_p2 = pnand %p12043_p3, %p12040_p1 }
  0xcb   : > { %12048 = shalt.err (!%p12045_p2)
}
  0xcc   : > { %s12049_s22 = scalar_lea.vmem %s394_s14, 36864  ;;  %p12057_p4 = scmp.lt.s32.totalorder %s394_s14, %s394_s14 }
  0xcd   : > { %p12050_p5 = scmp.ne.s32.totalorder %s394_s14, %s12049_s22  ;;  %p12058_p10 = scmp.lt.s32.totalorder %s12049_s22, %s12049_s22 }
  0xcf   : > { %p12052_p7 = pnand %p12050_p5, %p12451_p8  ;;  %p12059_p11 = por %p12058_p10, %p12057_p4 }
  0xd1   : > { %p12053_p9 = pneg %p12052_p7 }
  0xd3   : > { %p12060_p12 = pnand %p12059_p11, %p12053_p9 }
  0xd5   : > { %12063 = shalt.err (!%p12060_p12)
}
  0xd6   : > { %s12310_s20 = smov 768   ;;  %s12311_s21 = smov 48  }
  0xd7   : > { %10420 = dma.hbm_to_vmem [thread:$0]  (!%p12435_p6), %s13343_s4, 36864, %s394_s14, [#allocation9], %s12310_s20, %s12310_s20, %s12311_s21  }
  0xd8   : > { %s12312_s23 = smov [#allocation13]   ;;  %s12313_s29 = smov [#allocation16]  }
  0xd9   : > { %s417_s24 = sshll.u32 %s12312_s23, 4  ;;  %s442_s19 = sshll.u32 %s12313_s29, 4  ;;  %s418_s24 = int_to_ptr.vmem [resolvable:$true] %s417_s24  ;;  %s12612_s19 = int_to_ptr.vmem [resolvable:$true] %s442_s19 }
  0xda   : > { %s12064_s22 = scalar_lea.hbm %s13345_s6, 36864 }
  0xdb   : > { %p12065_p13 = scmp.ne.s32.totalorder %s13345_s6, %s12064_s22  ;;  %p12071_p3 = scmp.lt.u32.totalorder %s12064_s22, %s13345_s6 }
  0xdd   : > { %p12067_p0 = pnand %p12065_p13, %p12451_p8 }
  0xdf   : > { %p12068_p1 = pneg %p12067_p0 }
  0xe1   : > { %p12073_p2 = pnand %p12071_p3, %p12068_p1 }
  0xe3   : > { %12076 = shalt.err (!%p12073_p2)
}
  0xe4   : > { %s12077_s20 = scalar_lea.vmem %s418_s24, 36864  ;;  %p12085_p4 = scmp.lt.s32.totalorder %s418_s24, %s418_s24 }
  0xe5   : > { %p12078_p5 = scmp.ne.s32.totalorder %s418_s24, %s12077_s20  ;;  %p12086_p10 = scmp.lt.s32.totalorder %s12077_s20, %s12077_s20 }
  0xe7   : > { %p12080_p7 = pnand %p12078_p5, %p12451_p8  ;;  %p12087_p11 = por %p12086_p10, %p12085_p4 }
  0xe9   : > { %p12081_p9 = pneg %p12080_p7 }
  0xeb   : > { %p12088_p12 = pnand %p12087_p11, %p12081_p9 }
  0xed   : > { %12091 = shalt.err (!%p12088_p12)
}
  0xee   : > { %s13378_s0 = smov 12   ;;  %s13379_s15 = smov 192  }
  0xef   : > { %10426 = dma.hbm_to_vmem [thread:$0]  (!%p12435_p6), %s13345_s6, 36864, %s418_s24, [#allocation12], %s13379_s15, %s13379_s15, %s13378_s0  }
  0xf0   : > { %s12092_s17 = scalar_lea.hbm %s13347_s8, 48 }
  0xf1   : > { %p12093_p13 = scmp.ne.s32.totalorder %s13347_s8, %s12092_s17  ;;  %p12099_p3 = scmp.lt.u32.totalorder %s12092_s17, %s13347_s8 }
  0xf3   : > { %p12095_p0 = pnand %p12093_p13, %p12451_p8 }
  0xf5   : > { %p12096_p1 = pneg %p12095_p0 }
  0xf7   : > { %p12101_p2 = pnand %p12099_p3, %p12096_p1 }
  0xf9   : > { %12104 = shalt.err (!%p12101_p2)
}
  0xfa   : > { %s12105_s24 = scalar_lea.vmem %s12612_s19, 48  ;;  %s12112_s20 = scalar_lea.vmem %s12612_s19, 64 }
  0xfb   : > { %p12106_p5 = scmp.ne.s32.totalorder %s12612_s19, %s12105_s24  ;;  %p12113_p4 = scmp.lt.s32.totalorder %s12612_s19, %s12612_s19 }
  0xfc   : > { %p12114_p10 = scmp.lt.s32.totalorder %s12112_s20, %s12105_s24 }
  0xfd   : > { %p12108_p7 = pnand %p12106_p5, %p12451_p8 }
  0xfe   : > { %p12115_p11 = por %p12114_p10, %p12113_p4 }
  0xff   : > { %p12109_p9 = pneg %p12108_p7 }
 0x101   : > { %p12116_p12 = pnand %p12115_p11, %p12109_p9 }
 0x103   : > { %12119 = shalt.err (!%p12116_p12)
}
 0x104   : > { %10432 = dma.hbm_to_vmem [thread:$0]  (!%p12435_p6), %s13347_s8, 48, %s12612_s19, [#allocation15]  }
 0x105   : > { %s12314_s21 = smov [#allocation19]   ;;  %s12315_s23 = smov [#allocation22]  }
 0x106   : > { %s464_s13 = sshll.u32 %s12314_s21, 4  ;;  %s485_s29 = sshll.u32 %s12315_s23, 4  ;;  %s465_s13 = int_to_ptr.vmem [resolvable:$true] %s464_s13  ;;  %s12659_s29 = int_to_ptr.vmem [resolvable:$true] %s485_s29 }
 0x107   : > { %s12120_s22 = scalar_lea.hbm %s13349_s10, 48 }
 0x108   : > { %p12121_p13 = scmp.ne.s32.totalorder %s13349_s10, %s12120_s22  ;;  %p12127_p3 = scmp.lt.u32.totalorder %s12120_s22, %s13349_s10 }
 0x10a   : > { %p12123_p0 = pnand %p12121_p13, %p12451_p8 }
 0x10c   : > { %p12124_p1 = pneg %p12123_p0 }
 0x10e   : > { %p12129_p2 = pnand %p12127_p3, %p12124_p1 }
 0x110   : > { %12132 = shalt.err (!%p12129_p2)
}
 0x111   : > { %s12133_s20 = scalar_lea.vmem %s465_s13, 48  ;;  %s12140_s0 = scalar_lea.vmem %s465_s13, 64 }
 0x112   : > { %p12134_p5 = scmp.ne.s32.totalorder %s465_s13, %s12133_s20  ;;  %p12141_p4 = scmp.lt.s32.totalorder %s465_s13, %s465_s13 }
 0x113   : > { %p12142_p10 = scmp.lt.s32.totalorder %s12140_s0, %s12133_s20 }
 0x114   : > { %p12136_p7 = pnand %p12134_p5, %p12451_p8 }
 0x115   : > { %p12143_p11 = por %p12142_p10, %p12141_p4 }
 0x116   : > { %p12137_p9 = pneg %p12136_p7 }
 0x118   : > { %p12144_p12 = pnand %p12143_p11, %p12137_p9 }
 0x11a   : > { %12147 = shalt.err (!%p12144_p12)
}
 0x11b   : > { %10438 = dma.hbm_to_vmem [thread:$0]  (!%p12435_p6), %s13349_s10, 48, %s465_s13, [#allocation18]  }
 0x11c   : > { %s12148_s25 = scalar_lea.hbm %s13351_s12, 256 }
 0x11d   : > { %p12149_p13 = scmp.ne.s32.totalorder %s13351_s12, %s12148_s25  ;;  %p12155_p3 = scmp.lt.u32.totalorder %s12148_s25, %s13351_s12 }
 0x11f   : > { %p12151_p0 = pnand %p12149_p13, %p12451_p8 }
 0x121   : > { %p12152_p1 = pneg %p12151_p0 }
 0x123   : > { %p12157_p2 = pnand %p12155_p3, %p12152_p1 }
 0x125   : > { %12160 = shalt.err (!%p12157_p2)
}
 0x126   : > { %s12161_s13 = scalar_lea.vmem %s12659_s29, 256  ;;  %p12169_p4 = scmp.lt.s32.totalorder %s12659_s29, %s12659_s29 }
 0x127   : > { %p12162_p5 = scmp.ne.s32.totalorder %s12659_s29, %s12161_s13  ;;  %p12170_p10 = scmp.lt.s32.totalorder %s12161_s13, %s12161_s13 }
 0x129   : > { %p12164_p7 = pnand %p12162_p5, %p12451_p8  ;;  %p12171_p11 = por %p12170_p10, %p12169_p4 }
 0x12b   : > { %p12165_p9 = pneg %p12164_p7 }
 0x12d   : > { %p12172_p12 = pnand %p12171_p11, %p12165_p9 }
 0x12f   : > { %12175 = shalt.err (!%p12172_p12)
}
 0x130   : > { %s12316_s19 = smov 128   ;;  %s13380_s20 = sld [smem:[#allocation32_spill]] }
 0x131   : > { %s13381_s16 = sld [smem:[#allocation33_spill]]  ;;  %s12317_s0 = smov 8  }
 0x132   : > { %10444 = dma.hbm_to_vmem [thread:$0]  (!%p12435_p6), %s13351_s12, 256, %s12659_s29, [#allocation21], %s12316_s19, %s12316_s19, %s12317_s0  }
 0x133   : > { %s9018_s23 = sadd.s32 4294967294, %s12296_s28   ;;  %s12704_s17 = sadd.s32 1, %s12296_s28  }
 0x134   : > { %s39_s25 = ssub.s32 %s12296_s28, %s12704_s17  ;;  %s42_s22 = sadd.s32 1, %s12292_s27 }
 0x135   : > { %p40_p8 = scmp.eq.s32.totalorder %s39_s25, 0  ;;  %p49_p13 = scmp.ne.s32.totalorder %s12292_s27, %s12288_s26 }
 0x136   : > { %p50_p0 = scmp.eq.s32.totalorder %s12296_s28, 0  ;;  %p55_p1 = scmp.ne.s32.totalorder %s12288_s26, %s13380_s20 }
 0x137   : > { %s12715_s30 = scalar_select %p40_p8, %s12292_s27, %s42_s22  }
 0x138   : > { %p51_p3 = por %p50_p0, %p49_p13  ;;  %p13382_p2 = scmp.eq.s32.totalorder %s13381_s16, 0 }
 0x139   : > { %p331_p6 = scmp.eq.s32.totalorder %s13381_s16, 1  ;;  %p337_p7 = scmp.eq.s32.totalorder %s9018_s23, 1 }
 0x13a   : > { %p12719_p5 = por %p13382_p2, %p55_p1  ;;  %p10465_p9 = scmp.lt.s32.totalorder %s12296_s28, 2 }
 0x13b   : > { %s499_s29 = sand.u32 1, %s12292_s27   ;;  %p12726_p4 = por %p331_p6, %p49_p13 }
 0x13c   : > { %p12730_p10 = por %p337_p7, %p55_p1  ;;  %s10352_s13 = smul.u32 48, %s499_s29 }
 0x13d   : > { %s13384_s14 = scalar_select %p12726_p4, 1, 0 }
 0x13e   : > { %s13385_s24 = scalar_select %p12730_p10, 1, 0 }
 0x13f   : > { %s10353_s19 = smul.u32 768, %s12296_s28  ;;  %p12735_p11 = pnand %p10465_p9, %p51_p3 }
 0x140   : > { %s13387_s16 = sld [smem:[#allocation35_spill]]  ;;  %s503_s23 = scalar_lea.vmem [#allocation2], %s10352_s13 }
 0x141   : > { %s511_s25 = sshll.u32 %s503_s23, 4  ;;  %s12746_s22 = scalar_lea.sflag [#allocation3], %s499_s29  ;;  %s12744_s25 = int_to_ptr.vmem [resolvable:$true] %s511_s25 }
 0x142   : > { %p12178_p8 = pneg %p12735_p11 }
 0x146   : > { %s12742_s21 = scalar_lea.hbm %s13387_s16, %s10353_s19  ;;  %s12181_s15 = scalar_lea.hbm %s13387_s16, 1536 }
 0x147   : > { %s12176_s1 = scalar_lea.hbm %s12742_s21, 768  ;;  %p12182_p1 = scmp.lt.u32.totalorder %s12742_s21, %s13387_s16 }
 0x148   : > { %p12177_p12 = scmp.ne.s32.totalorder %s12742_s21, %s12176_s1  ;;  %p12183_p3 = scmp.lt.u32.totalorder %s12181_s15, %s12176_s1 }
 0x149   : > { %p12185_p6 = scmp.lt.u32.totalorder %s12176_s1, %s12742_s21 }
 0x14a   : > { %p12179_p13 = pnand %p12178_p8, %p12177_p12  ;;  %p12184_p2 = por %p12183_p3, %p12182_p1 }
 0x14c   : > { %p12180_p0 = pneg %p12179_p13  ;;  %p12186_p7 = por %p12185_p6, %p12184_p2 }
 0x14e   : > { %p12187_p9 = pnand %p12186_p7, %p12180_p0 }
 0x150   : > { %12190 = shalt.err (!%p12187_p9)
}
 0x151   : > { %s12191_s29 = scalar_lea.vmem %s12744_s25, 768  ;;  %s12318_s13 = smov [#allocation2]  }
 0x152   : > { %p12192_p12 = scmp.ne.s32.totalorder %s12744_s25, %s12191_s29  ;;  %s12196_s23 = sshll.u32 %s12318_s13, 4  ;;  %s12197_s23 = int_to_ptr.vmem [resolvable:$false] %s12196_s23 }
 0x153   : > { %s12198_s2 = scalar_lea.vmem %s12197_s23, 1536  ;;  %p12199_p4 = scmp.lt.s32.totalorder %s12744_s25, %s12197_s23 }
 0x154   : > { %p12194_p13 = pnand %p12192_p12, %p12178_p8  ;;  %p12200_p1 = scmp.lt.s32.totalorder %s12198_s2, %s12191_s29 }
 0x156   : > { %p12195_p10 = pneg %p12194_p13  ;;  %p12201_p3 = por %p12200_p1, %p12199_p4 }
 0x158   : > { %p12202_p2 = pnand %p12201_p3, %p12195_p10 }
 0x15a   : > { %12205 = shalt.err (!%p12202_p2)
}
 0x15b   : > { %s12319_s1 = smov 384   ;;  %s12320_s3 = smov 24  }
 0x15c   : > { %10448 = dma.hbm_to_vmem [thread:$0]  (!%p12735_p11), %s12742_s21, 768, %s12744_s25, %s12746_s22, %s12319_s1, %s12319_s1, %s12320_s3  }
 0x15d   : > { %s13388_s19 = sld [smem:[#allocation34_spill]] }
 0x163   : > { %p13389_p8 = scmp.ne.s32.totalorder %s13388_s19, 0 }
 0x164   : > { %s12777_s0 = sand.u32 (!%p13389_p8), 1, %s12288_s26  }
 0x165   : > { %523 = sbr.rel (%p13389_p8) target bundleno = 4417 (0x1141), region = 72  ;;  %s526_s29 = scalar_lea.sflag (!%p13389_p8), [#allocation3], %s12777_s0 }
 0x166   : > { %s10354_s15 = smul.u32 (!%p13389_p8), 48, %s12777_s0 }
 0x168   : > { %s12783_s13 = scalar_lea.vmem (!%p13389_p8), [#allocation2], %s10354_s15 }
 0x16c   : > { %12251 = dma.done.wait (%p12719_p5), %s526_s29, 768  }
 0x16d   : > { %12253 = vsyncadd (%p12719_p5), %s526_s29, 4294966528  ;;  %s13390_s20 = sld [smem:[#allocation33_spill]] }
 0x173   : > { %p13391_p4 = scmp.eq.s32.totalorder %s13390_s20, 0 }
 0x175   : > { %12255 = dma.done.wait (%p13391_p4), [#allocation6], 36864   ;;  %p13392_p10 = pmov %p13391_p4 }
 0x176   : > { %p13393_p11 = pmov %p13391_p4 }
 0x177   : > { %12257 = vsyncadd (%p13392_p10), [#allocation6], 4294930432 }
 0x178   : > { %12259 = dma.done.wait (%p13393_p11), [#allocation9], 36912   ;;  %p13394_p0 = pmov %p13391_p4 }
 0x17a   : > { %12261 = vsyncadd (%p13394_p0), [#allocation9], 4294930384  ;;  %p13395_p6 = pmov %p13394_p0 }
 0x17b   : > { %p13396_p7 = pmov %p13394_p0 }
 0x17c   : > { %12263 = dma.done.wait (%p13395_p6), [#allocation12], 37056  }
 0x17d   : > { %12265 = vsyncadd (%p13396_p7), [#allocation12], 4294930240  ;;  %p13397_p5 = pmov %p13394_p0 }
 0x17e   : > { %p13398_p9 = pmov %p13394_p0 }
 0x17f   : > { %12267 = dma.done.wait (%p13397_p5), [#allocation15], 96  }
 0x180   : > { %12269 = vsyncadd (%p13398_p9), [#allocation15], 4294967200  ;;  %p13399_p12 = pmov %p13394_p0 }
 0x181   : > { %p13400_p13 = pmov %p13394_p0 }
 0x182   : > { %12271 = dma.done.wait (%p13399_p12), [#allocation18], 96  }
 0x183   : > { %12273 = vsyncadd (%p13400_p13), [#allocation18], 4294967200  ;;  %p13401_p1 = pmov %p13394_p0 }
 0x184   : > { %p13402_p3 = pmov %p13394_p0 }
 0x185   : > { %12275 = dma.done.wait (%p13401_p1), [#allocation21], 304  }
 0x186   : > { %12277 = vsyncadd (%p13402_p3), [#allocation21], 4294966992  ;;  %v623_v0 = vld [vmem:[%s12783_s13] sm:$0xff]  ;;  %v624_v1 = vld [vmem:[%s12783_s13 + $0x8] sm:$0xff]  ;;  %vm12323_vm0 = vmmov 0   ;;  %vm2502_vm1 = vcmask 523264  }
 0x187   : > { %v625_v2 = vld [vmem:[%s12783_s13 + $0x10] sm:$0xff]  ;;  %v631_v3 = vadd.f32 %v624_v1, %v623_v0  ;;  %v12817_v4 = vld [vmem:[%s12783_s13 + $0x18] sm:$0xff]  ;;  %v12820_v5 = vld [vmem:[%s12783_s13 + $0x20] sm:$0xff]  ;;  %vm2550_vm2 = vcmask 130048   ;;  %s12324_s18 = smov 64   ;;  %s619_s21 = scalar_lea.vmem [#allocation23], %s10354_s15 }
 0x188   : > { %v12823_v6 = vld [vmem:[%s12783_s13 + $0x28] sm:$0xff]  ;;  %v635_v7 = vadd.f32 %v12820_v5, %v12817_v4  ;;  %v10556_v11 = vld [vmem:[#allocation5] ss:$36 sps:$4 sm:$0xff]   ;;  %v10562_v16 = vld [vmem:[#allocation5 + $0x90] ss:$36 sps:$4 sm:$0xff]   ;;  %s8831_s25 = sshll.u32 %s619_s21, 4  ;;  %s13287_s25 = int_to_ptr.vmem [resolvable:$true] %s8831_s25 }
 0x189   : > { %v632_v8 = vadd.f32 %v631_v3, %v625_v2  ;;  %v10554_v10 = vld [vmem:[#allocation5 + $0x4] ss:$36 sps:$4 sm:$0xff]   ;;  %v10557_v12 = vld [vmem:[#allocation5 + $0x4c] ss:$36 sps:$4 sm:$0xff]   ;;  %v10560_v14 = vld [vmem:[#allocation5 + $0x94] ss:$36 sps:$4 sm:$0xff]  }
 0x18a   : > { %v636_v9 = vadd.f32 %v635_v7, %v12823_v6  ;;  %2065 = vmatprep.subr.bf16.mxu0 %v10554_v10  ;;  %v10559_v13 = vld [vmem:[#allocation5 + $0x48] ss:$36 sps:$4 sm:$0xff]   ;;  %v10584_v18 = vld [vmem:[#allocation5 + $0x4d4] ss:$36 sps:$4 sm:$0xff]   ;;  %v10563_v19 = vld [vmem:[#allocation5 + $0xdc] ss:$36 sps:$4 sm:$0xff]  }
 0x18b   : > { %633 = vadd.xlane.f32.xlu0 %v632_v8  ;;  %2066 = vmatpush1.bf16.msra.mxu0 %v10556_v11  ;;  %v10578_v15 = vld [vmem:[#allocation5 + $0x48c] ss:$36 sps:$4 sm:$0xff]   ;;  %v10565_v21 = vld [vmem:[#allocation5 + $0xd8] ss:$36 sps:$4 sm:$0xff]   ;;  %v10566_v22 = vld [vmem:[#allocation5 + $0x124] ss:$36 sps:$4 sm:$0xff]  }
 0x18c   : > { %2067 = vmatprep.subr.bf16.mxu0 %v10557_v12  ;;  %v10582_v17 = vld [vmem:[#allocation5 + $0x488] ss:$36 sps:$4 sm:$0xff]   ;;  %2194 = vmatprep.subr.bf16.mxu1 %v10578_v15  ;;  %v10588_v20 = vld [vmem:[#allocation5 + $0x4d0] ss:$36 sps:$4 sm:$0xff]   ;;  %v10568_v23 = vld [vmem:[#allocation5 + $0x120] ss:$36 sps:$4 sm:$0xff]  }
 0x18d   : > { %2195 = vmatpush1.bf16.msra.mxu1 %v10582_v17  ;;  %v10569_v24 = vld [vmem:[#allocation5 + $0x16c] ss:$36 sps:$4 sm:$0xff]   ;;  %v10572_v26 = vld [vmem:[#allocation5 + $0x1b4] ss:$36 sps:$4 sm:$0xff]   ;;  %v10575_v28 = vld [vmem:[#allocation5 + $0x1fc] ss:$36 sps:$4 sm:$0xff]  }
 0x18e   : > { %2196 = vmatprep.subr.bf16.mxu1 %v10584_v18  ;;  %v10571_v25 = vld [vmem:[#allocation5 + $0x168] ss:$36 sps:$4 sm:$0xff]   ;;  %v10574_v27 = vld [vmem:[#allocation5 + $0x1b0] ss:$36 sps:$4 sm:$0xff]   ;;  %v10577_v29 = vld [vmem:[#allocation5 + $0x1f8] ss:$36 sps:$4 sm:$0xff]  }
 0x18f   : > { %637 = vadd.xlane.f32.xlu0 %v636_v9  ;;  %2068 = vmatpush1.bf16.msra.mxu0 %v10559_v13  ;;  %v10580_v30 = vld [vmem:[#allocation5 + $0x244] ss:$36 sps:$4 sm:$0xff]   ;;  %v10586_v32 = vld [vmem:[#allocation5 + $0x28c] ss:$36 sps:$4 sm:$0xff]   ;;  %v10590_v54 = vld [vmem:[#allocation5 + $0x51c] ss:$36 sps:$4 sm:$0xff]  }
 0x190   : > { %2069 = vmatprep.subr.bf16.mxu0 %v10560_v14  ;;  %v10583_v31 = vld [vmem:[#allocation5 + $0x240] ss:$36 sps:$4 sm:$0xff]   ;;  %v10589_v53 = vld [vmem:[#allocation5 + $0x288] ss:$36 sps:$4 sm:$0xff]   ;;  %v10592_v55 = vld [vmem:[#allocation5 + $0x2d4] ss:$36 sps:$4 sm:$0xff]  }
 0x191   : > { %2197 = vmatpush1.bf16.msra.mxu1 %v10588_v20  ;;  %v10594_v56 = vld [vmem:[#allocation5 + $0x518] ss:$36 sps:$4 sm:$0xff]   ;;  %v10595_v57 = vld [vmem:[#allocation5 + $0x2d0] ss:$36 sps:$4 sm:$0xff]   ;;  %v10596_v58 = vld [vmem:[#allocation5 + $0x564] ss:$36 sps:$4 sm:$0xff]   ;;  %v675_v20 = vlaneseq }
 0x192   : > { %2198 = vmatprep.subr.bf16.mxu1 %v10590_v54  ;;  %v10598_v59 = vld [vmem:[#allocation5 + $0x31c] ss:$36 sps:$4 sm:$0xff]   ;;  %v10602_v62 = vld [vmem:[#allocation5 + $0x5ac] ss:$36 sps:$4 sm:$0xff]   ;;  %v10604_v63 = vld [vmem:[#allocation5 + $0x364] ss:$36 sps:$4 sm:$0xff]  }
 0x193   : > { %2070 = vmatpush1.bf16.msra.mxu0 %v10562_v16  ;;  %v10600_v60 = vld [vmem:[#allocation5 + $0x560] ss:$36 sps:$4 sm:$0xff]   ;;  %v10601_v61 = vld [vmem:[#allocation5 + $0x318] ss:$36 sps:$4 sm:$0xff]   ;;  %v10610_v3 = vld [vmem:[#allocation5 + $0x3ac] ss:$36 sps:$4 sm:$0xff]  }
 0x194   : > { %2071 = vmatprep.subr.bf16.mxu0 %v10563_v19  ;;  %v10616_v7 = vld [vmem:[#allocation5 + $0x3f4] ss:$36 sps:$4 sm:$0xff]   ;;  %v10620_v10 = vld [vmem:[#allocation5 + $0x684] ss:$36 sps:$4 sm:$0xff]   ;;  %v12321_v11 = vmov 0   ;;  %s10355_s22 = smul.u32 768, %s13390_s20 }
 0x195   : > { %2199 = vmatpush1.bf16.msra.mxu1 %v10594_v56  ;;  %v10618_v8 = vld [vmem:[#allocation5 + $0x638] ss:$36 sps:$4 sm:$0xff]   ;;  %v10619_v9 = vld [vmem:[#allocation5 + $0x3f0] ss:$36 sps:$4 sm:$0xff]   ;;  %2226 = vmatprep.mubr.bf16.mxu1 %v12321_v11  ;;  %v10624_v13 = vld [vmem:[#allocation5 + $0x680] ss:$36 sps:$4 sm:$0xff]  }
 0x196   : > { %2200 = vmatprep.subr.bf16.mxu1 %v10596_v58  ;;  %v10622_v12 = vld [vmem:[#allocation5 + $0x43c] ss:$36 sps:$4 sm:$0xff]   ;;  %v10631_v16 = vld [vmem:[#allocation5 + $0x484] ss:$36 sps:$4 sm:$0xff]   ;;  %s13403_s1 = sld [smem:[#allocation39_spill]]  ;;  %s8817_s19 = scalar_lea.sflag [#allocation4], %s12777_s0 }
 0x197   : > { %2072 = vmatpush1.bf16.msra.mxu0 %v10565_v21  ;;  %v10625_v14 = vld [vmem:[#allocation5 + $0x438] ss:$36 sps:$4 sm:$0xff]   ;;  %v10629_v56 = vld [vmem:[#allocation5 + $0x480] ss:$36 sps:$4 sm:$0xff]   ;;  %s12206_s15 = scalar_lea.vmem %s13287_s25, 768  ;;  %p13404_p8 = scmp.ne.s32.totalorder %s13384_s14, 0 }
 0x198   : > { %2073 = vmatprep.subr.bf16.mxu0 %v10566_v22  ;;  %v10628_v15 = vld [vmem:[#allocation5 + $0x1c] ss:$36 sps:$4 sm:$0xff]   ;;  %p12207_p2 = scmp.ne.s32.totalorder %s13287_s25, %s12206_s15  ;;  %s12325_s29 = smov [#allocation23]  }
 0x199   : > { %2201 = vmatpush1.bf16.msra.mxu1 %v10600_v60  ;;  %v10634_v60 = vld [vmem:[#allocation5 + $0x64] ss:$36 sps:$4 sm:$0xff]  }
 0x19a   : > { %2202 = vmatprep.subr.bf16.mxu1 %v10602_v62  ;;  %v10632_v62 = vld [vmem:[#allocation5 + $0x60] ss:$36 sps:$4 sm:$0xff]   ;;  %p12208_p4 = pnand %p12207_p2, %p13404_p8 }
 0x19b   : > { %2074 = vmatpush1.bf16.msra.mxu0 %v10568_v23 }
 0x19c   : > { %2075 = vmatprep.subr.bf16.mxu0 %v10569_v24  ;;  %v12856_v24 = vshrl.u32 %v675_v20, 7  ;;  %v10662_v20 = vld [vmem:[#allocation5 + $0x1c8] ss:$36 sps:$4 sm:$0xff]   ;;  %s13295_s3 = scalar_lea.hbm %s13403_s1, %s10355_s22  ;;  %p12209_p10 = pneg %p12208_p4 }
 0x19f   : > { %2076 = vmatpush1.bf16.msra.mxu0 %v10571_v25  ;;  %v629_v25 = vld [vmem:[#allocation16] sm:$0x7] }
 0x1a0   : > { %2077 = vmatprep.subr.bf16.mxu0 %v10572_v26  ;;  %v12859_v26 = vsub.s32 1, %v12856_v24 }
 0x1a3   : > { %2078 = vmatpush1.bf16.msra.mxu0 %v10574_v27  ;;  %v12862_v27 = vsub.s32 2, %v12856_v24 }
 0x1a4   : > { %2079 = vmatprep.subr.bf16.mxu0 %v10575_v28  ;;  %v12865_v28 = vsub.s32 0, %v12856_v24 }
 0x1a7   : > { %2080 = vmatpush1.bf16.msra.mxu0 %v10577_v29 }
 0x1a8   : > { %2081 = vmatprep.subr.bf16.mxu0 %v10580_v30  ;;  %v630_v30 = vld [vmem:[#allocation17] sm:$0x7] }
 0x1ab   : > { %2082 = vmatpush1.bf16.msra.mxu0 %v10583_v31 }
 0x1ac   : > { %2083 = vmatprep.subr.bf16.mxu0 %v10586_v32  ;;  %v682_v32 = vrot.slane %v629_v25, %v12859_v26 }
 0x1af   : > { %2084 = vmatpush1.bf16.msra.mxu0 %v10589_v53 }
 0x1b0   : > { %2085 = vmatprep.subr.bf16.mxu0 %v10592_v55 }
 0x1b3   : > { %2086 = vmatpush1.bf16.msra.mxu0 %v10595_v57 }
 0x1b4   : > { %2087 = vmatprep.subr.bf16.mxu0 %v10598_v59 }
 0x1b7   : > { %2088 = vmatpush1.bf16.msra.mxu0 %v10601_v61 }
 0x1b8   : > { %2089 = vmatprep.subr.bf16.mxu0 %v10604_v63  ;;  %v10637_v63 = vld [vmem:[#allocation5 + $0x4cc] ss:$36 sps:$4 sm:$0xff]  }
 0x218   : > { %v634_v33 = vpop.xlane.xlu0 %633 }
 0x219   : > { %v640_v34 = vmul.f32 0.0026041667, %v634_v33 }
 0x21b   : > { %v12828_v35 = vsub.f32 %v623_v0, %v640_v34  ;;  %v12830_v36 = vsub.f32 %v624_v1, %v640_v34  ;;  %v12832_v37 = vsub.f32 %v625_v2, %v640_v34  ;;  %v10606_v0 = vld [vmem:[#allocation5 + $0x5a8] ss:$36 sps:$4 sm:$0xff]   ;;  %v10607_v1 = vld [vmem:[#allocation5 + $0x360] ss:$36 sps:$4 sm:$0xff]   ;;  %v10608_v2 = vld [vmem:[#allocation5 + $0x5f4] ss:$36 sps:$4 sm:$0xff]   ;;  %v686_v34 = vrot.slane %v629_v25, %v12862_v27 }
 0x21c   : > { %v638_v38 = vpop.xlane.xlu0 %637  ;;  %2203 = vmatpush1.bf16.msra.mxu1 %v10606_v0  ;;  %2090 = vmatpush1.bf16.msra.mxu0 %v10607_v1  ;;  %v10635_v0 = vld [vmem:[#allocation5 + $0x4c8] ss:$36 sps:$4 sm:$0xff]  }
 0x21d   : > { %v641_v39 = vmul.f32 0.0026041667, %v638_v38  ;;  %v648_v40 = vmul.f32 %v12828_v35, %v12828_v35  ;;  %v649_v41 = vmul.f32 %v12830_v36, %v12830_v36  ;;  %v650_v42 = vmul.f32 %v12832_v37, %v12832_v37  ;;  %2204 = vmatprep.subr.bf16.mxu1 %v10608_v2  ;;  %2091 = vmatprep.subr.bf16.mxu0 %v10610_v3  ;;  %v10640_v1 = vld [vmem:[#allocation5 + $0xac] ss:$36 sps:$4 sm:$0xff]   ;;  %v10643_v2 = vld [vmem:[#allocation5 + $0x514] ss:$36 sps:$4 sm:$0xff]  }
 0x21e   : > { %v10638_v3 = vld [vmem:[#allocation5 + $0xa8] ss:$36 sps:$4 sm:$0xff]  }
 0x21f   : > { %v12841_v43 = vsub.f32 %v12817_v4, %v641_v39  ;;  %v12844_v44 = vsub.f32 %v12820_v5, %v641_v39  ;;  %v12847_v45 = vsub.f32 %v12823_v6, %v641_v39  ;;  %v654_v46 = vadd.f32 %v649_v41, %v648_v40  ;;  %v10612_v4 = vld [vmem:[#allocation5 + $0x5f0] ss:$36 sps:$4 sm:$0xff]   ;;  %v10613_v5 = vld [vmem:[#allocation5 + $0x3a8] ss:$36 sps:$4 sm:$0xff]   ;;  %v10614_v6 = vld [vmem:[#allocation5 + $0x63c] ss:$36 sps:$4 sm:$0xff]  }
 0x220   : > { %2205 = vmatpush1.bf16.msra.mxu1 %v10612_v4  ;;  %2092 = vmatpush1.bf16.msra.mxu0 %v10613_v5  ;;  %v678_v39 = vrot.slane %v629_v25, %v12865_v28  ;;  %v704_v41 = vrot.slane %v630_v30, %v12859_v26  ;;  %v10641_v4 = vld [vmem:[#allocation5 + $0x510] ss:$36 sps:$4 sm:$0xff]  }
 0x221   : > { %v655_v47 = vadd.f32 %v654_v46, %v650_v42  ;;  %v651_v48 = vmul.f32 %v12841_v43, %v12841_v43  ;;  %v652_v49 = vmul.f32 %v12844_v44, %v12844_v44  ;;  %v653_v50 = vmul.f32 %v12847_v45, %v12847_v45  ;;  %2206 = vmatprep.subr.bf16.mxu1 %v10614_v6  ;;  %v10646_v5 = vld [vmem:[#allocation5 + $0xf4] ss:$36 sps:$4 sm:$0xff]   ;;  %v10649_v6 = vld [vmem:[#allocation5 + $0x55c] ss:$36 sps:$4 sm:$0xff]  }
 0x222   : > { %2093 = vmatprep.subr.bf16.mxu0 %v10616_v7  ;;  %v708_v42 = vrot.slane %v630_v30, %v12862_v27  ;;  %v10644_v7 = vld [vmem:[#allocation5 + $0xf0] ss:$36 sps:$4 sm:$0xff]  }
 0x223   : > { %656 = vadd.xlane.f32.xlu1 %v655_v47  ;;  %v658_v51 = vadd.f32 %v652_v49, %v651_v48  ;;  %v10668_v25 = vld [vmem:[#allocation5 + $0x210] ss:$36 sps:$4 sm:$0xff]  }
 0x224   : > { %2207 = vmatpush1.bf16.msra.mxu1 %v10618_v8  ;;  %2094 = vmatpush1.bf16.msra.mxu0 %v10619_v9  ;;  %v10647_v8 = vld [vmem:[#allocation5 + $0x558] ss:$36 sps:$4 sm:$0xff]  }
 0x225   : > { %v659_v52 = vadd.f32 %v658_v51, %v653_v50  ;;  %2208 = vmatprep.subr.bf16.mxu1 %v10620_v10  ;;  %2095 = vmatprep.subr.bf16.mxu0 %v10622_v12  ;;  %v700_v50 = vrot.slane %v630_v30, %v12865_v28  ;;  %v10652_v9 = vld [vmem:[#allocation5 + $0x13c] ss:$36 sps:$4 sm:$0xff]   ;;  %v10655_v10 = vld [vmem:[#allocation5 + $0x5a4] ss:$36 sps:$4 sm:$0xff]  }
 0x226   : > { %v10650_v12 = vld [vmem:[#allocation5 + $0x138] ss:$36 sps:$4 sm:$0xff]  }
 0x227   : > { %660 = vadd.xlane.f32.xlu1 %v659_v52  ;;  %v10626_v52 = vld [vmem:[#allocation5 + $0x18] ss:$36 sps:$4 sm:$0xff]  }
 0x228   : > { %2209 = vmatpush1.bf16.msra.mxu1 %v10624_v13  ;;  %2096 = vmatpush1.bf16.msra.mxu0 %v10625_v14  ;;  %v10653_v13 = vld [vmem:[#allocation5 + $0x5a0] ss:$36 sps:$4 sm:$0xff]  }
 0x229   : > { %2323 = vmatprep.subr.bf16.mxu1 %v10628_v15  ;;  %2108 = vmatprep.subr.bf16.mxu0 %v10631_v16  ;;  %v10658_v14 = vld [vmem:[#allocation5 + $0x184] ss:$36 sps:$4 sm:$0xff]   ;;  %v10661_v15 = vld [vmem:[#allocation5 + $0x5ec] ss:$36 sps:$4 sm:$0xff]   ;;  %v10676_v30 = vld [vmem:[#allocation5 + $0x25c] ss:$36 sps:$4 sm:$0xff]  }
 0x22a   : > { %v10656_v16 = vld [vmem:[#allocation5 + $0x180] ss:$36 sps:$4 sm:$0xff]  }
 0x2b0   : > { %v657_v17 = vpop.xlane.xlu1 %656 }
 0x2b1   : > { %v662_v18 = vmul.f32 0.0026041667, %v657_v17  ;;  %v10659_v17 = vld [vmem:[#allocation5 + $0x5e8] ss:$36 sps:$4 sm:$0xff]  }
 0x2b3   : > { %v664_v19 = vadd.f32 1e-05, %v662_v18  ;;  %v10664_v18 = vld [vmem:[#allocation5 + $0x1cc] ss:$36 sps:$4 sm:$0xff]  }
 0x2b4   : > { %v661_v21 = vpop.xlane.xlu1 %660 }
 0x2b5   : > { %11778 = vrsqrt.f32 %v664_v19  ;;  %v663_v22 = vmul.f32 0.0026041667, %v661_v21  ;;  %v10667_v19 = vld [vmem:[#allocation5 + $0x634] ss:$36 sps:$4 sm:$0xff]  }
 0x2b6   : > { %v10665_v21 = vld [vmem:[#allocation5 + $0x630] ss:$36 sps:$4 sm:$0xff]  }
 0x2b7   : > { %v665_v23 = vadd.f32 1e-05, %v663_v22  ;;  %v10670_v22 = vld [vmem:[#allocation5 + $0x214] ss:$36 sps:$4 sm:$0xff]  }
 0x2b9   : > { %11780 = vrsqrt.f32 %v665_v23  ;;  %v10673_v23 = vld [vmem:[#allocation5 + $0x67c] ss:$36 sps:$4 sm:$0xff]  }
 0x2bf   : > { %v11779_v29 = vpop.eup %11778 }
 0x2c0   : > { %v669_v31 = vmul.f32 %v11779_v29, %v12830_v36  ;;  %v670_v33 = vmul.f32 %v11779_v29, %v12832_v37  ;;  %v668_v38 = vmul.f32 %v11779_v29, %v12828_v35  ;;  %v10671_v29 = vld [vmem:[#allocation5 + $0x678] ss:$36 sps:$4 sm:$0xff]  }
 0x2c2   : > { %v691_v47 = vmul.f32 %v682_v32, %v669_v31  ;;  %v692_v48 = vmul.f32 %v686_v34, %v670_v33  ;;  %v690_v37 = vmul.f32 %v678_v39, %v668_v38  ;;  %v10679_v31 = vld [vmem:[#allocation5 + $0xc] ss:$36 sps:$4 sm:$0xff]   ;;  %v10680_v38 = vld [vmem:[#allocation5 + $0x2a0] ss:$36 sps:$4 sm:$0xff]  }
 0x2c3   : > { %v11781_v40 = vpop.eup %11780  ;;  %v10677_v33 = vld [vmem:[#allocation5 + $0x8] ss:$36 sps:$4 sm:$0xff]  }
 0x2c4   : > { %v672_v46 = vmul.f32 %v11781_v40, %v12844_v44  ;;  %v673_v36 = vmul.f32 %v11781_v40, %v12847_v45  ;;  %v671_v49 = vmul.f32 %v11781_v40, %v12841_v43  ;;  %v713_v54 = vadd.f32 %v704_v41, %v691_v47  ;;  %v10683_v40 = vld [vmem:[#allocation5 + $0x50] ss:$36 sps:$4 sm:$0xff]   ;;  %v10689_v47 = vld [vmem:[#allocation5 + $0x98] ss:$36 sps:$4 sm:$0xff]  }
 0x2c5   : > { %v714_v57 = vadd.f32 %v708_v42, %v692_v48  ;;  %v712_v59 = vadd.f32 %v700_v50, %v690_v37  ;;  %v10697_v48 = vld [vmem:[#allocation5 + $0xe4] ss:$36 sps:$4 sm:$0xff]  }
 0x2c6   : > { %v694_v51 = vmul.f32 %v682_v32, %v672_v46  ;;  %v695_v35 = vmul.f32 %v686_v34, %v673_v36  ;;  %v693_v53 = vmul.f32 %v678_v39, %v671_v49  ;;  %v10674_v32 = vld [vmem:[#allocation5 + $0x258] ss:$36 sps:$4 sm:$0xff]   ;;  %v10682_v34 = vld [vmem:[#allocation5 + $0x2a4] ss:$36 sps:$4 sm:$0xff]   ;;  %v10692_v49 = vld [vmem:[#allocation5 + $0x330] ss:$36 sps:$4 sm:$0xff]  }
 0x2c7   : > { %v10685_v39 = vld [vmem:[#allocation5 + $0x54] ss:$36 sps:$4 sm:$0xff]   ;;  %v10686_v46 = vld [vmem:[#allocation5 + $0x2e8] ss:$36 sps:$4 sm:$0xff]   ;;  %v10695_v37 = vld [vmem:[#allocation5 + $0xe0] ss:$36 sps:$4 sm:$0xff]  }
 0x2c8   : > { %v716_v55 = vadd.f32 %v704_v41, %v694_v51  ;;  %v717_v58 = vadd.f32 %v708_v42, %v695_v35  ;;  %v715_v44 = vadd.f32 %v700_v50, %v693_v53  ;;  %v10688_v41 = vld [vmem:[#allocation5 + $0x2ec] ss:$36 sps:$4 sm:$0xff]   ;;  %v10691_v42 = vld [vmem:[#allocation5 + $0x9c] ss:$36 sps:$4 sm:$0xff]   ;;  %v10694_v36 = vld [vmem:[#allocation5 + $0x334] ss:$36 sps:$4 sm:$0xff]  }
 0x2c9   : > { %v10700_v50 = vld [vmem:[#allocation5 + $0x37c] ss:$36 sps:$4 sm:$0xff]   ;;  %v10703_v51 = vld [vmem:[#allocation5 + $0x12c] ss:$36 sps:$4 sm:$0xff]   ;;  %v10706_v53 = vld [vmem:[#allocation5 + $0x3c4] ss:$36 sps:$4 sm:$0xff]  }
 0x2ca   : > { %v12879_v61 = vpack.c.bf16 %v716_v55, %v713_v54  ;;  %v12881_v45 = vpack.c.bf16 %v717_v58, %v714_v57  ;;  %v12883_v43 = vpack.c.bf16 %v715_v44, %v712_v59  ;;  %v10698_v35 = vld [vmem:[#allocation5 + $0x378] ss:$36 sps:$4 sm:$0xff]   ;;  %v10704_v55 = vld [vmem:[#allocation5 + $0x3c0] ss:$36 sps:$4 sm:$0xff]   ;;  %v10712_v57 = vld [vmem:[#allocation5 + $0x40c] ss:$36 sps:$4 sm:$0xff]  }
 0x2cb   : > { %v10709_v54 = vld [vmem:[#allocation5 + $0x174] ss:$36 sps:$4 sm:$0xff]   ;;  %v10715_v58 = vld [vmem:[#allocation5 + $0x1bc] ss:$36 sps:$4 sm:$0xff]   ;;  %v10710_v59 = vld [vmem:[#allocation5 + $0x408] ss:$36 sps:$4 sm:$0xff]  }
 0x2cc   : > { %2097 = vmatprep.mubr.bf16.mxu0 %v12879_v61  ;;  %2227 = vmatmul.mubr.bf16.vlgmr.msra.gmra.mrb[0].mxu1 %v12881_v45  ;;  %v10713_v44 = vld [vmem:[#allocation5 + $0x1b8] ss:$36 sps:$4 sm:$0xff]  }
 0x2cd   : > { %2324 = vmatpush1.bf16.msra.mxu1 %v10626_v52  ;;  %2098 = vmatmul.mubr.bf16.vlgmr.msra.gmra.mrb[0].mxu0 %v12883_v43  ;;  %v10701_v52 = vld [vmem:[#allocation5 + $0x128] ss:$36 sps:$4 sm:$0xff]  }
 0x2ce   : > { %2109 = vmatpush1.bf16.msra.mxu0 %v10629_v56  ;;  %2355 = vmatprep.mubr.bf16.mxu1 %v12879_v61  ;;  %v10707_v56 = vld [vmem:[#allocation5 + $0x170] ss:$36 sps:$4 sm:$0xff]  }
 0x2cf   : > { %2325 = vmatprep.subr.bf16.mxu1 %v10634_v60  ;;  %2110 = vmatprep.subr.bf16.mxu0 %v10637_v63  ;;  %v10718_v60 = vld [vmem:[#allocation5 + $0x454] ss:$36 sps:$4 sm:$0xff]  }
 0x2d0   : > { %2140 = vmatprep.mubr.bf16.mxu0 %v12321_v11  ;;  %v10716_v63 = vld [vmem:[#allocation5 + $0x450] ss:$36 sps:$4 sm:$0xff]  }
 0x2d1   : > { %2326 = vmatpush1.bf16.msra.mxu1 %v10632_v62  ;;  %v10721_v62 = vld [vmem:[#allocation5 + $0x204] ss:$36 sps:$4 sm:$0xff]  }
 0x2d2   : > { %2111 = vmatpush1.bf16.msra.mxu0 %v10635_v0  ;;  %2327 = vmatprep.subr.bf16.mxu1 %v10640_v1  ;;  %v10719_v0 = vld [vmem:[#allocation5 + $0x200] ss:$36 sps:$4 sm:$0xff]  }
 0x2d3   : > { %2112 = vmatprep.subr.bf16.mxu0 %v10643_v2  ;;  %v10724_v1 = vld [vmem:[#allocation5 + $0x49c] ss:$36 sps:$4 sm:$0xff]   ;;  %v10727_v2 = vld [vmem:[#allocation5 + $0x24c] ss:$36 sps:$4 sm:$0xff]  }
 0x2d5   : > { %2328 = vmatpush1.bf16.msra.mxu1 %v10638_v3  ;;  %v10722_v3 = vld [vmem:[#allocation5 + $0x498] ss:$36 sps:$4 sm:$0xff]  }
 0x2d6   : > { %2113 = vmatpush1.bf16.msra.mxu0 %v10641_v4  ;;  %2329 = vmatprep.subr.bf16.mxu1 %v10646_v5  ;;  %v10725_v4 = vld [vmem:[#allocation5 + $0x248] ss:$36 sps:$4 sm:$0xff]  }
 0x2d7   : > { %2114 = vmatprep.subr.bf16.mxu0 %v10649_v6  ;;  %v10730_v5 = vld [vmem:[#allocation5 + $0x4e4] ss:$36 sps:$4 sm:$0xff]  }
 0x2d8   : > { %v10728_v6 = vld [vmem:[#allocation5 + $0x4e0] ss:$36 sps:$4 sm:$0xff]  }
 0x2d9   : > { %2330 = vmatpush1.bf16.msra.mxu1 %v10644_v7  ;;  %v10733_v7 = vld [vmem:[#allocation5 + $0x294] ss:$36 sps:$4 sm:$0xff]  }
 0x2da   : > { %2115 = vmatpush1.bf16.msra.mxu0 %v10647_v8  ;;  %2331 = vmatprep.subr.bf16.mxu1 %v10652_v9  ;;  %v10731_v8 = vld [vmem:[#allocation5 + $0x290] ss:$36 sps:$4 sm:$0xff]  }
 0x2db   : > { %2116 = vmatprep.subr.bf16.mxu0 %v10655_v10  ;;  %v10736_v9 = vld [vmem:[#allocation5 + $0x52c] ss:$36 sps:$4 sm:$0xff]  }
 0x2dc   : > { %v10734_v10 = vld [vmem:[#allocation5 + $0x528] ss:$36 sps:$4 sm:$0xff]  }
 0x2dd   : > { %2332 = vmatpush1.bf16.msra.mxu1 %v10650_v12  ;;  %v10739_v12 = vld [vmem:[#allocation5 + $0x2dc] ss:$36 sps:$4 sm:$0xff]  }
 0x2de   : > { %2117 = vmatpush1.bf16.msra.mxu0 %v10653_v13  ;;  %2333 = vmatprep.subr.bf16.mxu1 %v10658_v14  ;;  %v10737_v13 = vld [vmem:[#allocation5 + $0x2d8] ss:$36 sps:$4 sm:$0xff]  }
 0x2df   : > { %2118 = vmatprep.subr.bf16.mxu0 %v10661_v15  ;;  %v10742_v14 = vld [vmem:[#allocation5 + $0x574] ss:$36 sps:$4 sm:$0xff]  }
 0x2e0   : > { %v10740_v15 = vld [vmem:[#allocation5 + $0x570] ss:$36 sps:$4 sm:$0xff]  }
 0x2e1   : > { %2334 = vmatpush1.bf16.msra.mxu1 %v10656_v16  ;;  %v10745_v16 = vld [vmem:[#allocation5 + $0x324] ss:$36 sps:$4 sm:$0xff]  }
 0x2e2   : > { %2119 = vmatpush1.bf16.msra.mxu0 %v10659_v17  ;;  %2335 = vmatprep.subr.bf16.mxu1 %v10664_v18  ;;  %v10743_v17 = vld [vmem:[#allocation5 + $0x320] ss:$36 sps:$4 sm:$0xff]  }
 0x2e3   : > { %2120 = vmatprep.subr.bf16.mxu0 %v10667_v19  ;;  %v10748_v18 = vld [vmem:[#allocation5 + $0x5bc] ss:$36 sps:$4 sm:$0xff]  }
 0x2e4   : > { %v10746_v19 = vld [vmem:[#allocation5 + $0x5b8] ss:$36 sps:$4 sm:$0xff]  }
 0x2e5   : > { %2336 = vmatpush1.bf16.msra.mxu1 %v10662_v20  ;;  %v10751_v20 = vld [vmem:[#allocation5 + $0x36c] ss:$36 sps:$4 sm:$0xff]  }
 0x2e6   : > { %2121 = vmatpush1.bf16.msra.mxu0 %v10665_v21  ;;  %2337 = vmatprep.subr.bf16.mxu1 %v10670_v22  ;;  %v10749_v21 = vld [vmem:[#allocation5 + $0x368] ss:$36 sps:$4 sm:$0xff]  }
 0x2e7   : > { %2122 = vmatprep.subr.bf16.mxu0 %v10673_v23  ;;  %v10754_v22 = vld [vmem:[#allocation5 + $0x604] ss:$36 sps:$4 sm:$0xff]  }
 0x2e8   : > { %v10752_v23 = vld [vmem:[#allocation5 + $0x600] ss:$36 sps:$4 sm:$0xff]  }
 0x2e9   : > { %2338 = vmatpush1.bf16.msra.mxu1 %v10668_v25  ;;  %v10757_v25 = vld [vmem:[#allocation5 + $0x3b4] ss:$36 sps:$4 sm:$0xff]  }
 0x2ea   : > { %2123 = vmatpush1.bf16.msra.mxu0 %v10671_v29  ;;  %2339 = vmatprep.subr.bf16.mxu1 %v10676_v30  ;;  %v10755_v29 = vld [vmem:[#allocation5 + $0x3b0] ss:$36 sps:$4 sm:$0xff]  }
 0x2eb   : > { %2151 = vmatprep.subr.bf16.mxu0 %v10679_v31  ;;  %v10760_v30 = vld [vmem:[#allocation5 + $0x64c] ss:$36 sps:$4 sm:$0xff]   ;;  %v10763_v31 = vld [vmem:[#allocation5 + $0x3fc] ss:$36 sps:$4 sm:$0xff]  }
 0x2ed   : > { %2141 = vmatmul.mubr.bf16.vlgmr.msra.gmra.mrb[0].mxu0 %v12881_v45  ;;  %2340 = vmatpush1.bf16.msra.mxu1 %v10674_v32  ;;  %v10758_v32 = vld [vmem:[#allocation5 + $0x648] ss:$36 sps:$4 sm:$0xff]  }
 0x2ee   : > { %2152 = vmatpush1.bf16.msra.mxu0 %v10677_v33  ;;  %2183 = vmatprep.mubr.bf16.mxu0 %v12879_v61  ;;  %v10761_v33 = vld [vmem:[#allocation5 + $0x3f8] ss:$36 sps:$4 sm:$0xff]  }
 0x2ef   : > { %2341 = vmatprep.subr.bf16.mxu1 %v10682_v34  ;;  %2153 = vmatprep.subr.bf16.mxu0 %v10685_v39  ;;  %v10766_v34 = vld [vmem:[#allocation5 + $0x694] ss:$36 sps:$4 sm:$0xff]  }
 0x2f0   : > { %v10764_v39 = vld [vmem:[#allocation5 + $0x690] ss:$36 sps:$4 sm:$0xff]  }
 0x2f1   : > { %2342 = vmatpush1.bf16.msra.mxu1 %v10680_v38  ;;  %v10769_v38 = vld [vmem:[#allocation5 + $0x444] ss:$36 sps:$4 sm:$0xff]  }
 0x2f2   : > { %2154 = vmatpush1.bf16.msra.mxu0 %v10683_v40  ;;  %2343 = vmatprep.subr.bf16.mxu1 %v10688_v41  ;;  %v10767_v40 = vld [vmem:[#allocation5 + $0x440] ss:$36 sps:$4 sm:$0xff]   ;;  %v10772_v41 = vld [vmem:[#allocation5 + $0x14] ss:$36 sps:$4 sm:$0xff]  }
 0x2f3   : > { %2155 = vmatprep.subr.bf16.mxu0 %v10691_v42  ;;  %v10773_v42 = vld [vmem:[#allocation5 + $0x4a0] ss:$36 sps:$4 sm:$0xff]  }
 0x2f5   : > { %2344 = vmatpush1.bf16.msra.mxu1 %v10686_v46  ;;  %v12322_v46 = vmov 0.0  }
 0x2f6   : > { %2156 = vmatpush1.bf16.msra.mxu0 %v10689_v47  ;;  %2345 = vmatprep.subr.bf16.mxu1 %v10694_v36  ;;  %v10770_v47 = vld [vmem:[#allocation5 + $0x10] ss:$36 sps:$4 sm:$0xff]   ;;  %v10776_v36 = vld [vmem:[#allocation5 + $0x5c] ss:$36 sps:$4 sm:$0xff]  }
 0x2f7   : > { %2157 = vmatprep.subr.bf16.mxu0 %v10697_v48  ;;  %v10777_v48 = vld [vmem:[#allocation5 + $0x4e8] ss:$36 sps:$4 sm:$0xff]  }
 0x2f9   : > { %2346 = vmatpush1.bf16.msra.mxu1 %v10692_v49  ;;  %v10774_v49 = vld [vmem:[#allocation5 + $0x58] ss:$36 sps:$4 sm:$0xff]  }
 0x2fa   : > { %2158 = vmatpush1.bf16.msra.mxu0 %v10695_v37  ;;  %2347 = vmatprep.subr.bf16.mxu1 %v10700_v50  ;;  %v10780_v37 = vld [vmem:[#allocation5 + $0xa4] ss:$36 sps:$4 sm:$0xff]   ;;  %v10781_v50 = vld [vmem:[#allocation5 + $0x530] ss:$36 sps:$4 sm:$0xff]  }
 0x2fb   : > { %2159 = vmatprep.subr.bf16.mxu0 %v10703_v51  ;;  %v10778_v51 = vld [vmem:[#allocation5 + $0xa0] ss:$36 sps:$4 sm:$0xff]  }
 0x2fd   : > { %2348 = vmatpush1.bf16.msra.mxu1 %v10698_v35  ;;  %v10784_v35 = vld [vmem:[#allocation5 + $0xec] ss:$36 sps:$4 sm:$0xff]  }
 0x2fe   : > { %2160 = vmatpush1.bf16.msra.mxu0 %v10701_v52  ;;  %2349 = vmatprep.subr.bf16.mxu1 %v10706_v53  ;;  %v10785_v52 = vld [vmem:[#allocation5 + $0x578] ss:$36 sps:$4 sm:$0xff]   ;;  %v10782_v53 = vld [vmem:[#allocation5 + $0xe8] ss:$36 sps:$4 sm:$0xff]  }
 0x2ff   : > { %2161 = vmatprep.subr.bf16.mxu0 %v10709_v54  ;;  %v10788_v54 = vld [vmem:[#allocation5 + $0x134] ss:$36 sps:$4 sm:$0xff]  }
 0x301   : > { %2350 = vmatpush1.bf16.msra.mxu1 %v10704_v55  ;;  %v10789_v55 = vld [vmem:[#allocation5 + $0x5c0] ss:$36 sps:$4 sm:$0xff]  }
 0x302   : > { %2162 = vmatpush1.bf16.msra.mxu0 %v10707_v56  ;;  %2351 = vmatprep.subr.bf16.mxu1 %v10712_v57  ;;  %v10786_v56 = vld [vmem:[#allocation5 + $0x130] ss:$36 sps:$4 sm:$0xff]   ;;  %v10792_v57 = vld [vmem:[#allocation5 + $0x17c] ss:$36 sps:$4 sm:$0xff]  }
 0x303   : > { %2163 = vmatprep.subr.bf16.mxu0 %v10715_v58  ;;  %v10793_v58 = vld [vmem:[#allocation5 + $0x608] ss:$36 sps:$4 sm:$0xff]  }
 0x305   : > { %2352 = vmatpush1.bf16.msra.mxu1 %v10710_v59  ;;  %v10790_v59 = vld [vmem:[#allocation5 + $0x178] ss:$36 sps:$4 sm:$0xff]  }
 0x306   : > { %2164 = vmatpush1.bf16.msra.mxu0 %v10713_v44  ;;  %2353 = vmatprep.subr.bf16.mxu1 %v10718_v60  ;;  %v10796_v44 = vld [vmem:[#allocation5 + $0x1c4] ss:$36 sps:$4 sm:$0xff]   ;;  %v10797_v60 = vld [vmem:[#allocation5 + $0x650] ss:$36 sps:$4 sm:$0xff]  }
 0x307   : > { %2165 = vmatprep.subr.bf16.mxu0 %v10721_v62  ;;  %v10794_v62 = vld [vmem:[#allocation5 + $0x1c0] ss:$36 sps:$4 sm:$0xff]  }
 0x309   : > { %2354 = vmatpush1.bf16.msra.mxu1 %v10716_v63  ;;  %v10800_v63 = vld [vmem:[#allocation5 + $0x20c] ss:$36 sps:$4 sm:$0xff]  }
 0x30a   : > { %2166 = vmatpush1.bf16.msra.mxu0 %v10719_v0  ;;  %2366 = vmatprep.subr.bf16.mxu1 %v10724_v1  ;;  %v10801_v0 = vld [vmem:[#allocation5 + $0x698] ss:$36 sps:$4 sm:$0xff]   ;;  %v10798_v1 = vld [vmem:[#allocation5 + $0x208] ss:$36 sps:$4 sm:$0xff]  }
 0x30b   : > { %2167 = vmatprep.subr.bf16.mxu0 %v10727_v2  ;;  %v10804_v2 = vld [vmem:[#allocation5 + $0x254] ss:$36 sps:$4 sm:$0xff]  }
 0x30c   : > { %2356 = vmatmul.mubr.bf16.vlgmr.msra.gmra.mrb[4].mxu1 %v12883_v43 }
 0x30d   : > { %2367 = vmatpush1.bf16.msra.mxu1 %v10722_v3  ;;  %2398 = vmatprep.mubr.bf16.mxu1 %v12321_v11  ;;  %v10802_v3 = vld [vmem:[#allocation5 + $0x250] ss:$36 sps:$4 sm:$0xff]  }
 0x30e   : > { %2168 = vmatpush1.bf16.msra.mxu0 %v10725_v4  ;;  %2368 = vmatprep.subr.bf16.mxu1 %v10730_v5  ;;  %v10807_v4 = vld [vmem:[#allocation5 + $0x29c] ss:$36 sps:$4 sm:$0xff]  }
 0x30f   : > { %2169 = vmatprep.subr.bf16.mxu0 %v10733_v7  ;;  %v10805_v5 = vld [vmem:[#allocation5 + $0x298] ss:$36 sps:$4 sm:$0xff]   ;;  %v10808_v7 = vld [vmem:[#allocation5 + $0x2e0] ss:$36 sps:$4 sm:$0xff]  }
 0x311   : > { %2369 = vmatpush1.bf16.msra.mxu1 %v10728_v6  ;;  %v10810_v6 = vld [vmem:[#allocation5 + $0x2e4] ss:$36 sps:$4 sm:$0xff]  }
 0x312   : > { %2170 = vmatpush1.bf16.msra.mxu0 %v10731_v8  ;;  %2370 = vmatprep.subr.bf16.mxu1 %v10736_v9  ;;  %v10813_v8 = vld [vmem:[#allocation5 + $0x32c] ss:$36 sps:$4 sm:$0xff]  }
 0x313   : > { %2171 = vmatprep.subr.bf16.mxu0 %v10739_v12  ;;  %v10811_v9 = vld [vmem:[#allocation5 + $0x328] ss:$36 sps:$4 sm:$0xff]   ;;  %v10814_v12 = vld [vmem:[#allocation5 + $0x370] ss:$36 sps:$4 sm:$0xff]  }
 0x315   : > { %2371 = vmatpush1.bf16.msra.mxu1 %v10734_v10  ;;  %v10816_v10 = vld [vmem:[#allocation5 + $0x374] ss:$36 sps:$4 sm:$0xff]  }
 0x316   : > { %2172 = vmatpush1.bf16.msra.mxu0 %v10737_v13  ;;  %2372 = vmatprep.subr.bf16.mxu1 %v10742_v14  ;;  %v10819_v13 = vld [vmem:[#allocation5 + $0x3bc] ss:$36 sps:$4 sm:$0xff]  }
 0x317   : > { %2173 = vmatprep.subr.bf16.mxu0 %v10745_v16  ;;  %v10817_v14 = vld [vmem:[#allocation5 + $0x3b8] ss:$36 sps:$4 sm:$0xff]   ;;  %v10820_v16 = vld [vmem:[#allocation5 + $0x400] ss:$36 sps:$4 sm:$0xff]  }
 0x319   : > { %2373 = vmatpush1.bf16.msra.mxu1 %v10740_v15  ;;  %v10822_v15 = vld [vmem:[#allocation5 + $0x404] ss:$36 sps:$4 sm:$0xff]  }
 0x31a   : > { %2174 = vmatpush1.bf16.msra.mxu0 %v10743_v17  ;;  %2374 = vmatprep.subr.bf16.mxu1 %v10748_v18  ;;  %v10825_v17 = vld [vmem:[#allocation5 + $0x44c] ss:$36 sps:$4 sm:$0xff]  }
 0x31b   : > { %2175 = vmatprep.subr.bf16.mxu0 %v10751_v20  ;;  %v10823_v18 = vld [vmem:[#allocation5 + $0x448] ss:$36 sps:$4 sm:$0xff]   ;;  %v10826_v20 = vld [vmem:[#allocation5 + $0x490] ss:$36 sps:$4 sm:$0xff]  }
 0x31d   : > { %2375 = vmatpush1.bf16.msra.mxu1 %v10746_v19  ;;  %v10828_v19 = vld [vmem:[#allocation5 + $0x494] ss:$36 sps:$4 sm:$0xff]  }
 0x31e   : > { %2176 = vmatpush1.bf16.msra.mxu0 %v10749_v21  ;;  %2376 = vmatprep.subr.bf16.mxu1 %v10754_v22  ;;  %v10831_v21 = vld [vmem:[#allocation5 + $0x4dc] ss:$36 sps:$4 sm:$0xff]  }
 0x31f   : > { %2177 = vmatprep.subr.bf16.mxu0 %v10757_v25  ;;  %v10829_v22 = vld [vmem:[#allocation5 + $0x4d8] ss:$36 sps:$4 sm:$0xff]   ;;  %v10832_v25 = vld [vmem:[#allocation5 + $0x520] ss:$36 sps:$4 sm:$0xff]  }
 0x321   : > { %2377 = vmatpush1.bf16.msra.mxu1 %v10752_v23  ;;  %v10834_v23 = vld [vmem:[#allocation5 + $0x524] ss:$36 sps:$4 sm:$0xff]  }
 0x322   : > { %2178 = vmatpush1.bf16.msra.mxu0 %v10755_v29  ;;  %2378 = vmatprep.subr.bf16.mxu1 %v10760_v30  ;;  %v10837_v29 = vld [vmem:[#allocation5 + $0x56c] ss:$36 sps:$4 sm:$0xff]  }
 0x323   : > { %2179 = vmatprep.subr.bf16.mxu0 %v10763_v31  ;;  %v10835_v30 = vld [vmem:[#allocation5 + $0x568] ss:$36 sps:$4 sm:$0xff]   ;;  %v10840_v31 = vld [vmem:[#allocation5 + $0x5b4] ss:$36 sps:$4 sm:$0xff]  }
 0x325   : > { %2379 = vmatpush1.bf16.msra.mxu1 %v10758_v32  ;;  %v10838_v32 = vld [vmem:[#allocation5 + $0x5b0] ss:$36 sps:$4 sm:$0xff]  }
 0x326   : > { %2180 = vmatpush1.bf16.msra.mxu0 %v10761_v33  ;;  %2380 = vmatprep.subr.bf16.mxu1 %v10766_v34  ;;  %v10843_v33 = vld [vmem:[#allocation5 + $0x5fc] ss:$36 sps:$4 sm:$0xff]  }
 0x327   : > { %2181 = vmatprep.subr.bf16.mxu0 %v10769_v38  ;;  %v10841_v34 = vld [vmem:[#allocation5 + $0x5f8] ss:$36 sps:$4 sm:$0xff]   ;;  %v10846_v38 = vld [vmem:[#allocation5 + $0x644] ss:$36 sps:$4 sm:$0xff]  }
 0x329   : > { %2381 = vmatpush1.bf16.msra.mxu1 %v10764_v39  ;;  %v10844_v39 = vld [vmem:[#allocation5 + $0x640] ss:$36 sps:$4 sm:$0xff]  }
 0x32a   : > { %2182 = vmatpush1.bf16.msra.mxu0 %v10767_v40  ;;  %10148 = vmatprep.subr.bf16.mxu1 %v12322_v46  ;;  %v10849_v40 = vld [vmem:[#allocation5 + $0x68c] ss:$36 sps:$4 sm:$0xff]  }
 0x32b   : > { %2237 = vmatprep.subr.bf16.mxu0 %v10772_v41  ;;  %v10847_v41 = vld [vmem:[#allocation5 + $0x688] ss:$36 sps:$4 sm:$0xff]  }
 0x32c   : > { %2399 = vmatmul.mubr.bf16.vlgmr.msra.gmra.mrb[4].mxu1 %v12881_v45 }
 0x32d   : > { %2184 = vmatmul.mubr.bf16.vlgmr.msra.gmra.mrb[4].mxu0 %v12883_v43  ;;  %10149 = vmatpush3.bf16.msra.mxu1 %v10773_v42  ;;  %v10850_v42 = vld [vmem:[#allocation5 + $0x260] ss:$36 sps:$4 sm:$0xff]  }
 0x32e   : > { %2238 = vmatpush1.bf16.msra.mxu0 %v10770_v47  ;;  %2269 = vmatprep.mubr.bf16.mxu0 %v12879_v61  ;;  %v10851_v47 = vld [vmem:[#allocation5 + $0x20] ss:$36 sps:$4 sm:$0xff]  }
 0x32f   : > { %10150 = vmatprep.subr.bf16.mxu1 %v12322_v46  ;;  %2239 = vmatprep.subr.bf16.mxu0 %v10776_v36  ;;  %v10852_v36 = vld [vmem:[#allocation5 + $0x2a8] ss:$36 sps:$4 sm:$0xff]  }
 0x330   : > { %10164 = vmatprep.mubr.msk.bf16.mxu1 %vm12323_vm0, %v12322_v46 }
 0x331   : > { %10151 = vmatpush3.bf16.msra.mxu1 %v10777_v48  ;;  %v10853_v48 = vld [vmem:[#allocation5 + $0x68] ss:$36 sps:$4 sm:$0xff]  }
 0x332   : > { %2240 = vmatpush1.bf16.msra.mxu0 %v10774_v49  ;;  %10152 = vmatprep.subr.bf16.mxu1 %v12322_v46  ;;  %v10854_v49 = vld [vmem:[#allocation5 + $0x2f0] ss:$36 sps:$4 sm:$0xff]  }
 0x333   : > { %2241 = vmatprep.subr.bf16.mxu0 %v10780_v37  ;;  %v10855_v37 = vld [vmem:[#allocation5 + $0xb0] ss:$36 sps:$4 sm:$0xff]  }
 0x335   : > { %10153 = vmatpush3.bf16.msra.mxu1 %v10781_v50  ;;  %v10856_v50 = vld [vmem:[#allocation5 + $0x338] ss:$36 sps:$4 sm:$0xff]  }
 0x336   : > { %2242 = vmatpush1.bf16.msra.mxu0 %v10778_v51  ;;  %10154 = vmatprep.subr.bf16.mxu1 %v12322_v46  ;;  %v10857_v51 = vld [vmem:[#allocation5 + $0xf8] ss:$36 sps:$4 sm:$0xff]  }
 0x337   : > { %2243 = vmatprep.subr.bf16.mxu0 %v10784_v35  ;;  %v10858_v35 = vld [vmem:[#allocation5 + $0x380] ss:$36 sps:$4 sm:$0xff]  }
 0x339   : > { %10155 = vmatpush3.bf16.msra.mxu1 %v10785_v52  ;;  %v10859_v52 = vld [vmem:[#allocation5 + $0x140] ss:$36 sps:$4 sm:$0xff]  }
 0x33a   : > { %2244 = vmatpush1.bf16.msra.mxu0 %v10782_v53  ;;  %10156 = vmatprep.subr.bf16.mxu1 %v12322_v46  ;;  %v10860_v53 = vld [vmem:[#allocation5 + $0x3c8] ss:$36 sps:$4 sm:$0xff]  }
 0x33b   : > { %2245 = vmatprep.subr.bf16.mxu0 %v10788_v54 }
 0x33d   : > { %10157 = vmatpush3.bf16.msra.mxu1 %v10789_v55 }
 0x33e   : > { %2246 = vmatpush1.bf16.msra.mxu0 %v10786_v56  ;;  %10158 = vmatprep.subr.bf16.mxu1 %v12322_v46 }
 0x33f   : > { %2247 = vmatprep.subr.bf16.mxu0 %v10792_v57 }
 0x341   : > { %10159 = vmatpush3.bf16.msra.mxu1 %v10793_v58  ;;  %v10863_v58 = vld [vmem:[#allocation5 + $0x1d0] ss:$36 sps:$4 sm:$0xff]  }
 0x342   : > { %2248 = vmatpush1.bf16.msra.mxu0 %v10790_v59  ;;  %10160 = vmatprep.subr.bf16.mxu1 %v12322_v46  ;;  %v10864_v59 = vld [vmem:[#allocation5 + $0x458] ss:$36 sps:$4 sm:$0xff]  }
 0x343   : > { %2249 = vmatprep.subr.bf16.mxu0 %v10796_v44  ;;  %v10865_v44 = vld [vmem:[#allocation5 + $0x218] ss:$36 sps:$4 sm:$0xff]  }
 0x345   : > { %10161 = vmatpush3.bf16.msra.mxu1 %v10797_v60 }
 0x346   : > { %2250 = vmatpush1.bf16.msra.mxu0 %v10794_v62  ;;  %10162 = vmatprep.subr.bf16.mxu1 %v12322_v46 }
 0x347   : > { %2251 = vmatprep.subr.bf16.mxu0 %v10800_v63 }
 0x349   : > { %10163 = vmatpush3.bf16.msra.mxu1 %v10801_v0 }
 0x34a   : > { %2252 = vmatpush1.bf16.msra.mxu0 %v10798_v1  ;;  %10198 = vmatprep.subr.bf16.mxu1 %v12322_v46 }
 0x34b   : > { %2253 = vmatprep.subr.bf16.mxu0 %v10804_v2 }
 0x34c   : > { %10165 = vmatmul.mubr.bf16.vlgmr.msra.gmra.mrb[8].mxu1 %v12881_v45 }
 0x34d   : > { %10200 = vmatprep.mubr.msk.bf16.mxu1 %vm12323_vm0, %v12322_v46 }
 0x34e   : > { %2254 = vmatpush1.bf16.msra.mxu0 %v10802_v3 }
 0x34f   : > { %2255 = vmatprep.subr.bf16.mxu0 %v10807_v4 }
 0x352   : > { %2256 = vmatpush1.bf16.msra.mxu0 %v10805_v5 }
 0x353   : > { %2257 = vmatprep.subr.bf16.mxu0 %v10810_v6 }
 0x356   : > { %2258 = vmatpush1.bf16.msra.mxu0 %v10808_v7 }
 0x357   : > { %2259 = vmatprep.subr.bf16.mxu0 %v10813_v8 }
 0x35a   : > { %2260 = vmatpush1.bf16.msra.mxu0 %v10811_v9 }
 0x35b   : > { %2261 = vmatprep.subr.bf16.mxu0 %v10816_v10 }
 0x35e   : > { %2262 = vmatpush1.bf16.msra.mxu0 %v10814_v12 }
 0x35f   : > { %2263 = vmatprep.subr.bf16.mxu0 %v10819_v13 }
 0x362   : > { %2264 = vmatpush1.bf16.msra.mxu0 %v10817_v14 }
 0x363   : > { %2265 = vmatprep.subr.bf16.mxu0 %v10822_v15 }
 0x366   : > { %2266 = vmatpush1.bf16.msra.mxu0 %v10820_v16 }
 0x367   : > { %2267 = vmatprep.subr.bf16.mxu0 %v10825_v17 }
 0x36a   : > { %2268 = vmatpush1.bf16.msra.mxu0 %v10823_v18 }
 0x36b   : > { %2280 = vmatprep.subr.bf16.mxu0 %v10828_v19 }
 0x36d   : > { %2270 = vmatmul.mubr.bf16.vlgmr.msra.gmra.mrb[8].mxu0 %v12883_v43 }
 0x36e   : > { %2281 = vmatpush1.bf16.msra.mxu0 %v10826_v20  ;;  %2312 = vmatprep.mubr.bf16.mxu0 %v12321_v11 }
 0x36f   : > { %2282 = vmatprep.subr.bf16.mxu0 %v10831_v21 }
 0x372   : > { %2283 = vmatpush1.bf16.msra.mxu0 %v10829_v22 }
 0x373   : > { %2284 = vmatprep.subr.bf16.mxu0 %v10834_v23 }
 0x376   : > { %2285 = vmatpush1.bf16.msra.mxu0 %v10832_v25 }
 0x377   : > { %2286 = vmatprep.subr.bf16.mxu0 %v10837_v29 }
 0x37a   : > { %2287 = vmatpush1.bf16.msra.mxu0 %v10835_v30 }
 0x37b   : > { %2288 = vmatprep.subr.bf16.mxu0 %v10840_v31 }
 0x37e   : > { %2289 = vmatpush1.bf16.msra.mxu0 %v10838_v32 }
 0x37f   : > { %2290 = vmatprep.subr.bf16.mxu0 %v10843_v33 }
 0x382   : > { %2291 = vmatpush1.bf16.msra.mxu0 %v10841_v34 }
 0x383   : > { %2292 = vmatprep.subr.bf16.mxu0 %v10846_v38 }
 0x386   : > { %2293 = vmatpush1.bf16.msra.mxu0 %v10844_v39 }
 0x387   : > { %2294 = vmatprep.subr.bf16.mxu0 %v10849_v40 }
 0x38a   : > { %2295 = vmatpush1.bf16.msra.mxu0 %v10847_v41 }
 0x38b   : > { %9930 = vmatprep.subr.bf16.mxu0 %v10850_v42 }
 0x38d   : > { %2313 = vmatmul.mubr.bf16.vlgmr.msra.gmra.mrb[8].mxu0 %v12881_v45  ;;  %v10861_v45 = vld [vmem:[#allocation5 + $0x188] ss:$36 sps:$4 sm:$0xff]  }
 0x38e   : > { %9931 = vmatpush3.bf16.msra.mxu0 %v10851_v47  ;;  %2441 = vmatprep.mubr.bf16.mxu0 %v12879_v61  ;;  %v10862_v61 = vld [vmem:[#allocation5 + $0x410] ss:$36 sps:$4 sm:$0xff]  }
 0x38f   : > { %9932 = vmatprep.subr.bf16.mxu0 %v10852_v36 }
 0x392   : > { %9933 = vmatpush3.bf16.msra.mxu0 %v10853_v48 }
 0x393   : > { %9934 = vmatprep.subr.bf16.mxu0 %v10854_v49  ;;  %v12945_v49 = vld [vmem:[#allocation22] sm:$0xff] }
 0x396   : > { %9935 = vmatpush3.bf16.msra.mxu0 %v10855_v37 }
 0x397   : > { %9936 = vmatprep.subr.bf16.mxu0 %v10856_v50  ;;  %v12947_v50 = vld [vmem:[#allocation22 + $0x8] sm:$0xff] }
 0x39a   : > { %9937 = vmatpush3.bf16.msra.mxu0 %v10857_v51 }
 0x39b   : > { %9938 = vmatprep.subr.bf16.mxu0 %v10858_v35 }
 0x39e   : > { %9939 = vmatpush3.bf16.msra.mxu0 %v10859_v52 }
 0x39f   : > { %v2228_v54 = vpop.f32.mrb[0].mxu1  ;;  %9940 = vmatprep.subr.bf16.mxu0 %v10860_v53 }
 0x3a0   : > { %v2230_v55 = vpop.f32.mrb[1].mxu1 }
 0x3a1   : > { %v2232_v56 = vpop.f32.mrb[2].mxu1 }
 0x3a2   : > { %9941 = vmatpush3.bf16.msra.mxu0 %v10861_v45  ;;  %v2234_v57 = vpop.f32.mrb[3].mxu1 }
 0x3a3   : > { %9942 = vmatprep.subr.bf16.mxu0 %v10862_v61 }
 0x3a6   : > { %9943 = vmatpush3.bf16.msra.mxu0 %v10863_v58 }
 0x3a7   : > { %9944 = vmatprep.subr.bf16.mxu0 %v10864_v59 }
 0x3aa   : > { %9945 = vmatpush3.bf16.msra.mxu0 %v10865_v44 }
 0x3ab   : > { %10168 = vmatprep.subr.bf16.mxu0 %v12322_v46 }
 0x3ad   : > { %2442 = vmatmul.mubr.bf16.vlgmr.msra.gmra.mrb[12].mxu0 %v12883_v43 }
 0x3ae   : > { %10170 = vmatprep.mubr.msk.bf16.mxu0 %vm12323_vm0, %v12322_v46 }
 0x3c0   : > { %v2142_v60 = vpop.f32.mrb[0].mxu0 }
 0x3c1   : > { %v2144_v62 = vpop.f32.mrb[1].mxu0 }
 0x3c2   : > { %v2146_v63 = vpop.f32.mrb[2].mxu0 }
 0x3c3   : > { %v12919_v0 = vpack.c.bf16 %v2146_v63, %v2142_v60  ;;  %v2148_v1 = vpop.f32.mrb[3].mxu0 }
 0x3c4   : > { %v12921_v2 = vpack.c.bf16 %v2148_v1, %v2144_v62 }
 0x3ff   : > { %v2400_v3 = vpop.f32.mrb[4].mxu1 }
 0x400   : > { %v2185_v4 = vpop.f32.mrb[4].mxu0  ;;  %v2402_v5 = vpop.f32.mrb[5].mxu1 }
 0x401   : > { %v2229_v6 = vadd.f32 %v2228_v54, %v2185_v4  ;;  %v2187_v7 = vpop.f32.mrb[5].mxu0  ;;  %v2404_v8 = vpop.f32.mrb[6].mxu1 }
 0x402   : > { %v2231_v9 = vadd.f32 %v2230_v55, %v2187_v7  ;;  %v12923_v10 = vpack.c.bf16 %v2404_v8, %v2400_v3  ;;  %v2189_v43 = vpop.f32.mrb[6].mxu0  ;;  %v2406_v12 = vpop.f32.mrb[7].mxu1 }
 0x403   : > { %v2233_v13 = vadd.f32 %v2232_v56, %v2189_v43  ;;  %v12925_v14 = vpack.c.bf16 %v2406_v12, %v2402_v5  ;;  %v2191_v15 = vpop.f32.mrb[7].mxu0 }
 0x404   : > { %v2235_v16 = vadd.f32 %v2234_v57, %v2191_v15 }
 0x405   : > { %v12927_v17 = vpack.c.bf16 %v2233_v13, %v2229_v6  ;;  %10199 = vmatpush3.bf16.msra.mxu1 %v12925_v14 }
 0x406   : > { %v2494_v18 = vpack.c.bf16 %v2235_v16, %v2231_v9  ;;  %10210 = vmatprep.subr.bf16.mxu1 %v12322_v46 }
 0x408   : > { %v2507_v19 = vsel %vm2502_vm1, %v2494_v18, 0 }
 0x409   : > { %10169 = vmatpush3.bf16.xpose.msra.mxu0 %v2507_v19 }
 0x40a   : > { %10174 = vmatprep.subr.bf16.mxu0 %v12322_v46 }
 0x410   : > { %10171 = vmatmul.mubr.msk.bf16.vlgmr.msra.gmra.mrb[16].mxu0 %vm2502_vm1, %v12919_v0 }
 0x411   : > { %10175 = vmatpush3.bf16.msra.mxu0 %v12923_v10  ;;  %10176 = vmatprep.mubr.msk.bf16.mxu0 %vm12323_vm0, %v12322_v46 }
 0x412   : > { %10180 = vmatprep.subr.bf16.mxu0 %v12322_v46 }
 0x41f   : > { %v2484_v20 = vpop.f32.mrb[8].mxu1 }
 0x420   : > { %v10166_v21 = vpop.f32.mrb[9].mxu1 }
 0x421   : > { %v2487_v22 = vpop.f32.mrb[10].mxu1 }
 0x422   : > { %v10167_v23 = vpop.f32.mrb[11].mxu1 }
 0x460   : > { %v2314_v25 = vpop.f32.mrb[8].mxu0 }
 0x461   : > { %v2316_v29 = vpop.f32.mrb[9].mxu0 }
 0x462   : > { %v2318_v30 = vpop.f32.mrb[10].mxu0 }
 0x463   : > { %v12939_v31 = vpack.c.bf16 %v2318_v30, %v2314_v25  ;;  %v2320_v32 = vpop.f32.mrb[11].mxu0 }
 0x464   : > { %v12941_v33 = vpack.c.bf16 %v2320_v32, %v2316_v29 }
 0x480   : > { %v9946_v34 = vpop.f32.mrb[12].mxu0 }
 0x481   : > { %v9947_v38 = vpop.f32.mrb[13].mxu0 }
 0x482   : > { %v9948_v39 = vadd.f32 %v9947_v38, %v9946_v34  ;;  %v9949_v40 = vpop.f32.mrb[14].mxu0 }
 0x483   : > { %v9950_v41 = vpop.f32.mrb[15].mxu0 }
 0x484   : > { %v2485_v42 = vadd.f32 %v9948_v39, %v2484_v20  ;;  %v9951_v47 = vadd.f32 %v9950_v41, %v9949_v40 }
 0x486   : > { %v2488_v36 = vadd.f32 %v9951_v47, %v2487_v22 }
 0x488   : > { %v12943_v48 = vpack.c.bf16 %v2488_v36, %v2485_v42 }
 0x4e3   : > { %v2543_v37 = vpop.f32.mrb[16].mxu0 }
 0x4e4   : > { %v2544_v51 = vadd.f32 %v2543_v37, %v12945_v49  ;;  %v10172_v35 = vpop.f32.mrb[17].mxu0 }
 0x4e5   : > { %v2546_v52 = vpop.f32.mrb[18].mxu0 }
 0x4e6   : > { %v2547_v53 = vadd.f32 %v2546_v52, %v12947_v50  ;;  %v10173_v45 = vpop.f32.mrb[19].mxu0  ;;  %v2551_v54 = vsel %vm2550_vm2, %v2544_v51, -inf }
 0x4e7   : > { %2552 = vmax.xlane.f32.xlu0 %v2551_v54 }
 0x4e8   : > { %v2554_v61 = vsel %vm2550_vm2, %v2547_v53, -inf }
 0x4e9   : > { %2555 = vmax.xlane.f32.xlu1 %v2554_v61 }
 0x574   : > { %v2553_v55 = vpop.xlane.xlu0 %2552 }
 0x575   : > { %v2557_v56 = vsub.f32 %v2544_v51, %v2553_v55  ;;  %v2746_v55 = vsel %vm2502_vm1, %v12939_v31, 0 }
 0x576   : > { %v2556_v57 = vpop.xlane.xlu1 %2555 }
 0x577   : > { %v2559_v58 = vmul.f32 1.442695, %v2557_v56  ;;  %v2558_v59 = vsub.f32 %v2547_v53, %v2556_v57 }
 0x579   : > { %11782 = vpow2.f32 %v2559_v58  ;;  %v2561_v44 = vmul.f32 1.442695, %v2558_v59  ;;  %v2984_v58 = vsel %vm2502_vm1, %v12941_v33, 0 }
 0x57b   : > { %11784 = vpow2.f32 %v2561_v44 }
 0x583   : > { %v11783_v60 = vpop.eup %11782 }
 0x584   : > { %v2563_v62 = vsel %vm2550_vm2, %v11783_v60, 0.0 }
 0x585   : > { %v11785_v63 = vpop.eup %11784  ;;  %2564 = vadd.xlane.f32.xlu0 %v2563_v62 }
 0x586   : > { %v2566_v1 = vsel %vm2550_vm2, %v11785_v63, 0.0 }
 0x587   : > { %2567 = vadd.xlane.f32.xlu1 %v2566_v1 }
 0x598   : > { %2619 = vrot.lane.b32.xlu1 %v12919_v0, %s12324_s18 }
 0x59b   : > { %2622 = vrot.lane.b32.xlu0 %v2494_v18, %s12324_s18 }
 0x612   : > { %v2565_v3 = vpop.xlane.xlu0 %2564 }
 0x613   : > { %11786 = vrcp.f32 %v2565_v3 }
 0x614   : > { %v2568_v4 = vpop.xlane.xlu1 %2567 }
 0x615   : > { %11788 = vrcp.f32 %v2568_v4 }
 0x616   : > { %v2623_v9 = vpop.permute.xlu0 %2622 }
 0x617   : > { %v2628_v12 = vsel %vm2502_vm1, %v2623_v9, 0 }
 0x618   : > { %v2620_v0 = vpop.permute.xlu1 %2619 }
 0x61d   : > { %v11787_v5 = vpop.eup %11786 }
 0x61e   : > { %v2571_v7 = vmul.f32 %v11787_v5, %v11783_v60 }
 0x61f   : > { %v11789_v6 = vpop.eup %11788 }
 0x620   : > { %v2572_v8 = vmul.f32 %v11789_v6, %v11785_v63 }
 0x622   : > { %v2573_v43 = vpack.c.bf16 %v2572_v8, %v2571_v7 }
 0x624   : > { %10177 = vmatmul.mubr.msk.bf16.vlgmr.msra.gmra.mrb[20].mxu0 %vm2550_vm2, %v2573_v43 }
 0x625   : > { %10181 = vmatpush3.bf16.xpose.msra.mxu0 %v2628_v12  ;;  %10182 = vmatprep.mubr.msk.bf16.mxu0 %vm12323_vm0, %v12322_v46 }
 0x626   : > { %10186 = vmatprep.subr.bf16.mxu0 %v12322_v46 }
 0x62c   : > { %10183 = vmatmul.mubr.msk.bf16.vlgmr.msra.gmra.mrb[24].mxu0 %vm2502_vm1, %v2620_v0 }
 0x62d   : > { %10188 = vmatprep.mubr.msk.bf16.mxu0 %vm12323_vm0, %v12322_v46 }
 0x6f7   : > { %v12966_v13 = vpop.f32.mrb[20].mxu0 }
 0x6f8   : > { %v10178_v15 = vpop.f32.mrb[21].mxu0 }
 0x6f9   : > { %v12968_v16 = vpop.f32.mrb[22].mxu0 }
 0x6fa   : > { %v10179_v18 = vpop.f32.mrb[23].mxu0 }
 0x6ff   : > { %v2664_v19 = vpop.f32.mrb[24].mxu0 }
 0x700   : > { %v2665_v20 = vadd.f32 %v2664_v19, %v12945_v49  ;;  %v10184_v21 = vpop.f32.mrb[25].mxu0 }
 0x701   : > { %v2667_v22 = vpop.f32.mrb[26].mxu0 }
 0x702   : > { %v2668_v23 = vadd.f32 %v2667_v22, %v12947_v50  ;;  %v10185_v25 = vpop.f32.mrb[27].mxu0  ;;  %v2671_v29 = vsel %vm2550_vm2, %v2665_v20, -inf }
 0x703   : > { %2672 = vmax.xlane.f32.xlu1 %v2671_v29 }
 0x704   : > { %v2674_v30 = vsel %vm2550_vm2, %v2668_v23, -inf }
 0x705   : > { %2675 = vmax.xlane.f32.xlu0 %v2674_v30 }
 0x790   : > { %v2673_v32 = vpop.xlane.xlu1 %2672 }
 0x791   : > { %v2677_v34 = vsub.f32 %v2665_v20, %v2673_v32 }
 0x792   : > { %v2676_v38 = vpop.xlane.xlu0 %2675 }
 0x793   : > { %v2679_v39 = vmul.f32 1.442695, %v2677_v34  ;;  %v2678_v40 = vsub.f32 %v2668_v23, %v2676_v38 }
 0x795   : > { %11790 = vpow2.f32 %v2679_v39  ;;  %v2681_v41 = vmul.f32 1.442695, %v2678_v40 }
 0x797   : > { %11792 = vpow2.f32 %v2681_v41 }
 0x79f   : > { %v11791_v42 = vpop.eup %11790 }
 0x7a0   : > { %v2683_v47 = vsel %vm2550_vm2, %v11791_v42, 0.0 }
 0x7a1   : > { %v11793_v36 = vpop.eup %11792  ;;  %2684 = vadd.xlane.f32.xlu0 %v2683_v47 }
 0x7a2   : > { %v2686_v37 = vsel %vm2550_vm2, %v11793_v36, 0.0 }
 0x7a3   : > { %2687 = vadd.xlane.f32.xlu1 %v2686_v37 }
 0x7b4   : > { %2860 = vrot.lane.b32.xlu1 %v12939_v31, %s12324_s18 }
 0x7b7   : > { %2695 = vrot.lane.b32.xlu0 %v12923_v10, %s12324_s18 }
 0x7b8   : > { %2857 = vrot.lane.b32.xlu1 %v12921_v2, %s12324_s18 }
 0x7bb   : > { %3095 = vrot.lane.b32.xlu0 %v12927_v17, %s12324_s18 }
 0x7bc   : > { %3098 = vrot.lane.b32.xlu1 %v12941_v33, %s12324_s18 }
 0x82e   : > { %v2685_v51 = vpop.xlane.xlu0 %2684 }
 0x82f   : > { %11794 = vrcp.f32 %v2685_v51 }
 0x830   : > { %v2688_v35 = vpop.xlane.xlu1 %2687 }
 0x831   : > { %11796 = vrcp.f32 %v2688_v35 }
 0x832   : > { %v2696_v52 = vpop.permute.xlu0 %2695 }
 0x833   : > { %10187 = vmatpush3.bf16.msra.mxu0 %v2696_v52 }
 0x834   : > { %10192 = vmatprep.subr.bf16.mxu0 %v12322_v46  ;;  %v2861_v56 = vpop.permute.xlu1 %2860 }
 0x835   : > { %v2866_v57 = vsel %vm2502_vm1, %v2861_v56, 0 }
 0x836   : > { %v3096_v44 = vpop.permute.xlu0 %3095 }
 0x838   : > { %v2858_v31 = vpop.permute.xlu1 %2857 }
 0x839   : > { %v11795_v53 = vpop.eup %11794 }
 0x83a   : > { %v2691_v10 = vmul.f32 %v11795_v53, %v11791_v42 }
 0x83b   : > { %v11797_v45 = vpop.eup %11796 }
 0x83c   : > { %v2692_v54 = vmul.f32 %v11797_v45, %v11793_v36  ;;  %v3099_v59 = vpop.permute.xlu1 %3098 }
 0x83e   : > { %v2693_v61 = vpack.c.bf16 %v2692_v54, %v2691_v10 }
 0x840   : > { %10189 = vmatmul.mubr.msk.bf16.vlgmr.msra.gmra.mrb[28].mxu0 %vm2550_vm2, %v2693_v61 }
 0x841   : > { %10193 = vmatpush3.bf16.xpose.msra.mxu0 %v2746_v55  ;;  %10194 = vmatprep.mubr.msk.bf16.mxu0 %vm12323_vm0, %v12322_v46 }
 0x842   : > { %10204 = vmatprep.subr.bf16.mxu0 %v12322_v46 }
 0x848   : > { %10195 = vmatmul.mubr.msk.bf16.vlgmr.msra.gmra.mrb[32].mxu0 %vm2502_vm1, %v12921_v2  ;;  %v3104_v2 = vsel %vm2502_vm1, %v3099_v59, 0 }
 0x849   : > { %10205 = vmatpush3.bf16.xpose.msra.mxu0 %v2866_v57  ;;  %10206 = vmatprep.mubr.msk.bf16.mxu0 %vm12323_vm0, %v12322_v46 }
 0x84a   : > { %10216 = vmatprep.subr.bf16.mxu0 %v12322_v46 }
 0x850   : > { %10207 = vmatmul.mubr.msk.bf16.vlgmr.msra.gmra.mrb[36].mxu0 %vm2502_vm1, %v2858_v31 }
 0x851   : > { %10217 = vmatpush3.bf16.xpose.msra.mxu0 %v2984_v58  ;;  %10218 = vmatprep.mubr.msk.bf16.mxu0 %vm12323_vm0, %v12322_v46 }
 0x852   : > { %10228 = vmatprep.subr.bf16.mxu0 %v12322_v46 }
 0x858   : > { %10219 = vmatmul.mubr.msk.bf16.vlgmr.msra.gmra.mrb[40].mxu0 %vm2502_vm1, %v12927_v17 }
 0x859   : > { %10229 = vmatpush3.bf16.xpose.msra.mxu0 %v3104_v2  ;;  %10230 = vmatprep.mubr.msk.bf16.mxu0 %vm12323_vm0, %v12322_v46 }
 0x860   : > { %10231 = vmatmul.mubr.msk.bf16.vlgmr.msra.gmra.mrb[44].mxu0 %vm2502_vm1, %v3096_v44 }
 0x913   : > { %v13011_v33 = vpop.f32.mrb[28].mxu0 }
 0x914   : > { %v10190_v60 = vpop.f32.mrb[29].mxu0 }
 0x915   : > { %v13013_v62 = vpop.f32.mrb[30].mxu0 }
 0x916   : > { %v10544_v63 = vpack.i.bf16 %v13013_v62, %v13011_v33  ;;  %v10191_v1 = vpop.f32.mrb[31].mxu0 }
 0x91b   : > { %v2782_v3 = vpop.f32.mrb[32].mxu0 }
 0x91c   : > { %v2783_v4 = vadd.f32 %v2782_v3, %v12945_v49  ;;  %v10196_v17 = vpop.f32.mrb[33].mxu0 }
 0x91d   : > { %v2785_v5 = vpop.f32.mrb[34].mxu0 }
 0x91e   : > { %v2786_v6 = vadd.f32 %v2785_v5, %v12947_v50  ;;  %v10197_v7 = vpop.f32.mrb[35].mxu0  ;;  %v2789_v8 = vsel %vm2550_vm2, %v2783_v4, -inf }
 0x91f   : > { %2790 = vmax.xlane.f32.xlu1 %v2789_v8 }
 0x920   : > { %v2792_v9 = vsel %vm2550_vm2, %v2786_v6, -inf }
 0x921   : > { %2793 = vmax.xlane.f32.xlu0 %v2792_v9 }
 0x923   : > { %v2902_v43 = vpop.f32.mrb[36].mxu0 }
 0x924   : > { %v2903_v12 = vadd.f32 %v2902_v43, %v12945_v49  ;;  %v10208_v0 = vpop.f32.mrb[37].mxu0 }
 0x925   : > { %v2905_v15 = vpop.f32.mrb[38].mxu0 }
 0x926   : > { %v2906_v18 = vadd.f32 %v2905_v15, %v12947_v50  ;;  %v10209_v19 = vpop.f32.mrb[39].mxu0  ;;  %v2909_v20 = vsel %vm2550_vm2, %v2903_v12, -inf }
 0x927   : > { %2910 = vmax.xlane.f32.xlu0 %v2909_v20 }
 0x928   : > { %v2912_v21 = vsel %vm2550_vm2, %v2906_v18, -inf }
 0x92b   : > { %2913 = vmax.xlane.f32.xlu0 %v2912_v21  ;;  %v3020_v22 = vpop.f32.mrb[40].mxu0 }
 0x92c   : > { %v3021_v23 = vadd.f32 %v3020_v22, %v12945_v49  ;;  %v10220_v25 = vpop.f32.mrb[41].mxu0 }
 0x92d   : > { %v3023_v29 = vpop.f32.mrb[42].mxu0 }
 0x92e   : > { %v3024_v30 = vadd.f32 %v3023_v29, %v12947_v50  ;;  %v10221_v32 = vpop.f32.mrb[43].mxu0  ;;  %v3027_v34 = vsel %vm2550_vm2, %v3021_v23, -inf }
 0x92f   : > { %3028 = vmax.xlane.f32.xlu1 %v3027_v34 }
 0x930   : > { %v3030_v38 = vsel %vm2550_vm2, %v3024_v30, -inf }
 0x931   : > { %3031 = vmax.xlane.f32.xlu0 %v3030_v38 }
 0x933   : > { %v3140_v39 = vpop.f32.mrb[44].mxu0 }
 0x934   : > { %v3141_v40 = vadd.f32 %v3140_v39, %v12945_v49  ;;  %v10232_v41 = vpop.f32.mrb[45].mxu0 }
 0x935   : > { %v3143_v42 = vpop.f32.mrb[46].mxu0 }
 0x936   : > { %v3144_v47 = vadd.f32 %v3143_v42, %v12947_v50  ;;  %v10233_v36 = vpop.f32.mrb[47].mxu0  ;;  %v3147_v37 = vsel %vm2550_vm2, %v3141_v40, -inf }
 0x937   : > { %3148 = vmax.xlane.f32.xlu1 %v3147_v37 }
 0x938   : > { %v3150_v51 = vsel %vm2550_vm2, %v3144_v47, -inf }
 0x939   : > { %3151 = vmax.xlane.f32.xlu0 %v3150_v51 }
 0x9ac   : > { %v2791_v35 = vpop.xlane.xlu1 %2790 }
 0x9ad   : > { %v2795_v52 = vsub.f32 %v2783_v4, %v2791_v35 }
 0x9ae   : > { %v2794_v53 = vpop.xlane.xlu0 %2793 }
 0x9af   : > { %v2797_v45 = vmul.f32 1.442695, %v2795_v52  ;;  %v2796_v10 = vsub.f32 %v2786_v6, %v2794_v53 }
 0x9b1   : > { %11798 = vpow2.f32 %v2797_v45  ;;  %v2799_v54 = vmul.f32 1.442695, %v2796_v10 }
 0x9b3   : > { %11800 = vpow2.f32 %v2799_v54 }
 0x9b4   : > { %v2911_v49 = vpop.xlane.xlu0 %2910 }
 0x9b5   : > { %v2915_v61 = vsub.f32 %v2903_v12, %v2911_v49 }
 0x9b7   : > { %v2917_v55 = vmul.f32 1.442695, %v2915_v61 }
 0x9b8   : > { %v2914_v56 = vpop.xlane.xlu0 %2913 }
 0x9b9   : > { %11802 = vpow2.f32 %v2917_v55  ;;  %v2916_v50 = vsub.f32 %v2906_v18, %v2914_v56 }
 0x9bb   : > { %v11799_v57 = vpop.eup %11798  ;;  %v2919_v31 = vmul.f32 1.442695, %v2916_v50 }
 0x9bc   : > { %v3029_v58 = vpop.xlane.xlu1 %3028  ;;  %v2801_v59 = vsel %vm2550_vm2, %v11799_v57, 0.0 }
 0x9bd   : > { %v11801_v2 = vpop.eup %11800  ;;  %11804 = vpow2.f32 %v2919_v31  ;;  %v3033_v44 = vsub.f32 %v3021_v23, %v3029_v58  ;;  %2802 = vadd.xlane.f32.xlu1 %v2801_v59 }
 0x9be   : > { %v3032_v60 = vpop.xlane.xlu0 %3031  ;;  %v2804_v1 = vsel %vm2550_vm2, %v11801_v2, 0.0 }
 0x9bf   : > { %v3035_v3 = vmul.f32 1.442695, %v3033_v44  ;;  %v3034_v4 = vsub.f32 %v3024_v30, %v3032_v60  ;;  %2805 = vadd.xlane.f32.xlu0 %v2804_v1  ;;  %v10866_v60 = vld [vmem:[#allocation7] ss:$12 sps:$4 sm:$0xff]   ;;  %v10868_v1 = vld [vmem:[#allocation7 + $0x4] ss:$12 sps:$4 sm:$0xff]  }
 0x9c0   : > { %3731 = vmatprep.subr.bf16.mxu0 %v10868_v1 }
 0x9c1   : > { %11806 = vpow2.f32 %v3035_v3  ;;  %v3037_v17 = vmul.f32 1.442695, %v3034_v4  ;;  %v10871_v3 = vld [vmem:[#allocation7 + $0x1c] ss:$12 sps:$4 sm:$0xff]   ;;  %3732 = vmatpush1.bf16.msra.mxu0 %v10866_v60  ;;  %v10869_v4 = vld [vmem:[#allocation7 + $0x18] ss:$12 sps:$4 sm:$0xff]  }
 0x9c2   : > { %3733 = vmatprep.subr.bf16.mxu0 %v10871_v3 }
 0x9c3   : > { %v11803_v5 = vpop.eup %11802  ;;  %11808 = vpow2.f32 %v3037_v17  ;;  %v10874_v17 = vld [vmem:[#allocation7 + $0x34] ss:$12 sps:$4 sm:$0xff]  }
 0x9c4   : > { %v3149_v6 = vpop.xlane.xlu1 %3148  ;;  %v2921_v7 = vsel %vm2550_vm2, %v11803_v5, 0.0 }
 0x9c5   : > { %v3153_v8 = vsub.f32 %v3141_v40, %v3149_v6  ;;  %2922 = vadd.xlane.f32.xlu1 %v2921_v7  ;;  %v10894_v6 = vld [vmem:[#allocation7 + $0x8] ss:$12 sps:$4 sm:$0xff]   ;;  %3734 = vmatpush1.bf16.msra.mxu0 %v10869_v4  ;;  %v10872_v7 = vld [vmem:[#allocation7 + $0x30] ss:$12 sps:$4 sm:$0xff]  }
 0x9c6   : > { %v3152_v9 = vpop.xlane.xlu0 %3151  ;;  %3735 = vmatprep.subr.bf16.mxu0 %v10874_v17 }
 0x9c7   : > { %v11805_v43 = vpop.eup %11804  ;;  %v3155_v12 = vmul.f32 1.442695, %v3153_v8  ;;  %v3154_v0 = vsub.f32 %v3144_v47, %v3152_v9  ;;  %v10898_v8 = vld [vmem:[#allocation7 + $0xe0] ss:$12 sps:$4 sm:$0xff]  }
 0x9c8   : > { %v2924_v15 = vsel %vm2550_vm2, %v11805_v43, 0.0  ;;  %v10877_v9 = vld [vmem:[#allocation7 + $0x4c] ss:$12 sps:$4 sm:$0xff]  }
 0x9c9   : > { %11810 = vpow2.f32 %v3155_v12  ;;  %v3157_v18 = vmul.f32 1.442695, %v3154_v0  ;;  %2925 = vadd.xlane.f32.xlu0 %v2924_v15  ;;  %v10903_v12 = vld [vmem:[#allocation7 + $0xf8] ss:$12 sps:$4 sm:$0xff]   ;;  %3736 = vmatpush1.bf16.msra.mxu0 %v10872_v7  ;;  %v10875_v0 = vld [vmem:[#allocation7 + $0x48] ss:$12 sps:$4 sm:$0xff]  }
 0x9ca   : > { %3737 = vmatprep.subr.bf16.mxu0 %v10877_v9  ;;  %v10880_v15 = vld [vmem:[#allocation7 + $0x64] ss:$12 sps:$4 sm:$0xff]  }
 0x9cb   : > { %v11807_v19 = vpop.eup %11806  ;;  %11812 = vpow2.f32 %v3157_v18  ;;  %v10904_v18 = vld [vmem:[#allocation7 + $0x38] ss:$12 sps:$4 sm:$0xff]  }
 0x9cc   : > { %v3039_v20 = vsel %vm2550_vm2, %v11807_v19, 0.0 }
 0x9cd   : > { %v11809_v21 = vpop.eup %11808  ;;  %3040 = vadd.xlane.f32.xlu1 %v3039_v20  ;;  %3738 = vmatpush1.bf16.msra.mxu0 %v10875_v0  ;;  %v10878_v20 = vld [vmem:[#allocation7 + $0x60] ss:$12 sps:$4 sm:$0xff]  }
 0x9ce   : > { %v3042_v22 = vsel %vm2550_vm2, %v11809_v21, 0.0  ;;  %3739 = vmatprep.subr.bf16.mxu0 %v10880_v15 }
 0x9cf   : > { %3043 = vadd.xlane.f32.xlu0 %v3042_v22  ;;  %v10909_v22 = vld [vmem:[#allocation7 + $0x50] ss:$12 sps:$4 sm:$0xff]  }
 0x9d1   : > { %3740 = vmatpush1.bf16.msra.mxu0 %v10878_v20 }
 0x9d3   : > { %v11811_v23 = vpop.eup %11810 }
 0x9d4   : > { %v3159_v25 = vsel %vm2550_vm2, %v11811_v23, 0.0 }
 0x9d5   : > { %v11813_v29 = vpop.eup %11812  ;;  %3160 = vadd.xlane.f32.xlu0 %v3159_v25  ;;  %v10881_v25 = vld [vmem:[#allocation7 + $0x78] ss:$12 sps:$4 sm:$0xff]  }
 0x9d6   : > { %v3162_v30 = vsel %vm2550_vm2, %v11813_v29, 0.0 }
 0x9d9   : > { %3163 = vadd.xlane.f32.xlu0 %v3162_v30  ;;  %v10914_v30 = vld [vmem:[#allocation7 + $0x68] ss:$12 sps:$4 sm:$0xff]  }
 0x9de   : > { %2933 = vrot.lane.b32.xlu1 %v12925_v14, %s12324_s18 }
 0x9ef   : > { %3171 = vrot.lane.b32.xlu0 %v12943_v48, %s12324_s18 }
 0xa4a   : > { %v2803_v32 = vpop.xlane.xlu1 %2802 }
 0xa4b   : > { %11814 = vrcp.f32 %v2803_v32  ;;  %v10918_v32 = vld [vmem:[#allocation7 + $0x140] ss:$12 sps:$4 sm:$0xff]  }
 0xa4c   : > { %v2806_v34 = vpop.xlane.xlu0 %2805 }
 0xa4d   : > { %11816 = vrcp.f32 %v2806_v34  ;;  %v10884_v34 = vld [vmem:[#allocation7 + $0x90] ss:$12 sps:$4 sm:$0xff]  }
 0xa52   : > { %v2923_v38 = vpop.xlane.xlu1 %2922 }
 0xa53   : > { %11818 = vrcp.f32 %v2923_v38  ;;  %v10889_v38 = vld [vmem:[#allocation7 + $0xac] ss:$12 sps:$4 sm:$0xff]  }
 0xa55   : > { %v11815_v39 = vpop.eup %11814 }
 0xa56   : > { %v2926_v40 = vpop.xlane.xlu0 %2925  ;;  %v2809_v42 = vmul.f32 %v11815_v39, %v11799_v57  ;;  %v10919_v39 = vld [vmem:[#allocation7 + $0x80] ss:$12 sps:$4 sm:$0xff]  }
 0xa57   : > { %v11817_v41 = vpop.eup %11816  ;;  %11820 = vrcp.f32 %v2926_v40  ;;  %v10887_v40 = vld [vmem:[#allocation7 + $0xa8] ss:$12 sps:$4 sm:$0xff]  }
 0xa58   : > { %v2810_v47 = vmul.f32 %v11817_v41, %v11801_v2  ;;  %v10892_v41 = vld [vmem:[#allocation7 + $0xc4] ss:$12 sps:$4 sm:$0xff]  }
 0xa5a   : > { %v3041_v36 = vpop.xlane.xlu1 %3040  ;;  %v2811_v37 = vpack.c.bf16 %v2810_v47, %v2809_v42  ;;  %v10890_v42 = vld [vmem:[#allocation7 + $0xc0] ss:$12 sps:$4 sm:$0xff]   ;;  %v10897_v47 = vld [vmem:[#allocation7 + $0xdc] ss:$12 sps:$4 sm:$0xff]  }
 0xa5b   : > { %11822 = vrcp.f32 %v3041_v36  ;;  %v10895_v36 = vld [vmem:[#allocation7 + $0xd8] ss:$12 sps:$4 sm:$0xff]  }
 0xa5c   : > { %10201 = vmatmul.mubr.msk.bf16.vlgmr.msra.gmra.mrb[12].mxu1 %vm2550_vm2, %v2811_v37  ;;  %v3044_v14 = vpop.xlane.xlu0 %3043  ;;  %v10902_v37 = vld [vmem:[#allocation7 + $0xf4] ss:$12 sps:$4 sm:$0xff]  }
 0xa5d   : > { %11824 = vrcp.f32 %v3044_v14  ;;  %10212 = vmatprep.mubr.msk.bf16.mxu1 %vm12323_vm0, %v12322_v46  ;;  %v11819_v35 = vpop.eup %11818  ;;  %v10900_v14 = vld [vmem:[#allocation7 + $0xf0] ss:$12 sps:$4 sm:$0xff]  }
 0xa5e   : > { %v2934_v51 = vpop.permute.xlu1 %2933  ;;  %v2929_v53 = vmul.f32 %v11819_v35, %v11803_v5  ;;  %v10893_v5 = vld [vmem:[#allocation7 + $0xc8] ss:$12 sps:$4 sm:$0xff]  }
 0xa5f   : > { %10211 = vmatpush3.bf16.msra.mxu1 %v2934_v51  ;;  %v10907_v51 = vld [vmem:[#allocation7 + $0x10c] ss:$12 sps:$4 sm:$0xff]   ;;  %v10905_v35 = vld [vmem:[#allocation7 + $0x108] ss:$12 sps:$4 sm:$0xff]  }
 0xa60   : > { %10222 = vmatprep.subr.bf16.mxu1 %v12322_v46 }
 0xa61   : > { %v11821_v52 = vpop.eup %11820 }
 0xa62   : > { %v2930_v45 = vmul.f32 %v11821_v52, %v11805_v43  ;;  %v3161_v10 = vpop.xlane.xlu0 %3160  ;;  %v10899_v43 = vld [vmem:[#allocation7 + $0x20] ss:$12 sps:$4 sm:$0xff]   ;;  %v10912_v52 = vld [vmem:[#allocation7 + $0x124] ss:$12 sps:$4 sm:$0xff]  }
 0xa63   : > { %11826 = vrcp.f32 %v3161_v10  ;;  %v10915_v10 = vld [vmem:[#allocation7 + $0x138] ss:$12 sps:$4 sm:$0xff]  }
 0xa64   : > { %v2931_v54 = vpack.c.bf16 %v2930_v45, %v2929_v53  ;;  %v10910_v53 = vld [vmem:[#allocation7 + $0x120] ss:$12 sps:$4 sm:$0xff]   ;;  %v10917_v45 = vld [vmem:[#allocation7 + $0x13c] ss:$12 sps:$4 sm:$0xff]  }
 0xa65   : > { %v11823_v49 = vpop.eup %11822 }
 0xa66   : > { %10213 = vmatmul.mubr.msk.bf16.vlgmr.msra.gmra.mrb[16].mxu1 %vm2550_vm2, %v2931_v54  ;;  %v3164_v61 = vpop.xlane.xlu0 %3163  ;;  %v3047_v50 = vmul.f32 %v11823_v49, %v11807_v19  ;;  %v10908_v19 = vld [vmem:[#allocation7 + $0x110] ss:$12 sps:$4 sm:$0xff]  }
 0xa67   : > { %v11825_v55 = vpop.eup %11824  ;;  %10223 = vmatpush3.bf16.msra.mxu1 %v12943_v48  ;;  %11828 = vrcp.f32 %v3164_v61  ;;  %10224 = vmatprep.mubr.msk.bf16.mxu1 %vm12323_vm0, %v12322_v46  ;;  %v10922_v61 = vld [vmem:[#allocation7 + $0x154] ss:$12 sps:$4 sm:$0xff]  }
 0xa68   : > { %v3048_v56 = vmul.f32 %v11825_v55, %v11809_v21  ;;  %10234 = vmatprep.subr.bf16.mxu1 %v12322_v46  ;;  %v10883_v21 = vld [vmem:[#allocation7 + $0x7c] ss:$12 sps:$4 sm:$0xff]   ;;  %v10923_v55 = vld [vmem:[#allocation7 + $0x158] ss:$12 sps:$4 sm:$0xff]  }
 0xa69   : > { %3741 = vmatprep.subr.bf16.mxu0 %v10883_v21 }
 0xa6a   : > { %v3049_v57 = vpack.c.bf16 %v3048_v56, %v3047_v50  ;;  %v3172_v31 = vpop.permute.xlu0 %3171  ;;  %3742 = vmatpush1.bf16.msra.mxu0 %v10881_v25  ;;  %v10920_v50 = vld [vmem:[#allocation7 + $0x150] ss:$12 sps:$4 sm:$0xff]  }
 0xa6d   : > { %v11827_v58 = vpop.eup %11826 }
 0xa6e   : > { %10225 = vmatmul.mubr.msk.bf16.vlgmr.msra.gmra.mrb[20].mxu1 %vm2550_vm2, %v3049_v57  ;;  %v3167_v2 = vmul.f32 %v11827_v58, %v11811_v23  ;;  %v10913_v23 = vld [vmem:[#allocation7 + $0x128] ss:$12 sps:$4 sm:$0xff]   ;;  %v10924_v57 = vld [vmem:[#allocation7 + $0x98] ss:$12 sps:$4 sm:$0xff]  }
 0xa6f   : > { %10235 = vmatpush3.bf16.msra.mxu1 %v3172_v31  ;;  %10236 = vmatprep.mubr.msk.bf16.mxu1 %vm12323_vm0, %v12322_v46  ;;  %v10927_v58 = vld [vmem:[#allocation7 + $0x16c] ss:$12 sps:$4 sm:$0xff]  }
 0xa70   : > { %9985 = vmatprep.subr.bf16.mxu1 %v10893_v5 }
 0xa71   : > { %v11829_v59 = vpop.eup %11828 }
 0xa72   : > { %v3168_v48 = vmul.f32 %v11829_v59, %v11813_v29  ;;  %v10886_v29 = vld [vmem:[#allocation7 + $0x94] ss:$12 sps:$4 sm:$0xff]   ;;  %v10928_v59 = vld [vmem:[#allocation7 + $0x170] ss:$12 sps:$4 sm:$0xff]  }
 0xa73   : > { %3743 = vmatprep.subr.bf16.mxu0 %v10886_v29 }
 0xa74   : > { %v3169_v44 = vpack.c.bf16 %v3168_v48, %v3167_v2  ;;  %3744 = vmatpush1.bf16.msra.mxu0 %v10884_v34  ;;  %v10925_v2 = vld [vmem:[#allocation7 + $0x168] ss:$12 sps:$4 sm:$0xff]   ;;  %v10929_v48 = vld [vmem:[#allocation7 + $0xb0] ss:$12 sps:$4 sm:$0xff]  }
 0xa75   : > { %3745 = vmatprep.subr.bf16.mxu0 %v10889_v38  ;;  %v10936_v38 = vld [vmem:[#allocation7 + $0x19c] ss:$12 sps:$4 sm:$0xff]  }
 0xa76   : > { %10237 = vmatmul.mubr.msk.bf16.vlgmr.msra.gmra.mrb[24].mxu1 %vm2550_vm2, %v3169_v44  ;;  %v10932_v44 = vld [vmem:[#allocation7 + $0x184] ss:$12 sps:$4 sm:$0xff]  }
 0xa77   : > { %9986 = vmatpush3.bf16.msra.mxu1 %v10894_v6 }
 0xa78   : > { %9987 = vmatprep.subr.bf16.mxu1 %v10898_v8  ;;  %3746 = vmatpush1.bf16.msra.mxu0 %v10887_v40  ;;  %v10937_v40 = vld [vmem:[#allocation7 + $0x1a0] ss:$12 sps:$4 sm:$0xff]  }
 0xa79   : > { %3747 = vmatprep.subr.bf16.mxu0 %v10892_v41  ;;  %v10940_v41 = vld [vmem:[#allocation7 + $0x1b4] ss:$12 sps:$4 sm:$0xff]  }
 0xa7b   : > { %9988 = vmatpush3.bf16.msra.mxu1 %v10899_v43 }
 0xa7c   : > { %9989 = vmatprep.subr.bf16.mxu1 %v10903_v12  ;;  %3748 = vmatpush1.bf16.msra.mxu0 %v10890_v42 }
 0xa7d   : > { %3749 = vmatprep.subr.bf16.mxu0 %v10897_v47  ;;  %v10944_v47 = vld [vmem:[#allocation7 + $0x1cc] ss:$12 sps:$4 sm:$0xff]  }
 0xa7f   : > { %9990 = vmatpush3.bf16.msra.mxu1 %v10904_v18 }
 0xa80   : > { %9991 = vmatprep.subr.bf16.mxu1 %v10908_v19  ;;  %3750 = vmatpush1.bf16.msra.mxu0 %v10895_v36 }
 0xa81   : > { %3751 = vmatprep.subr.bf16.mxu0 %v10902_v37 }
 0xa83   : > { %9992 = vmatpush3.bf16.msra.mxu1 %v10909_v22 }
 0xa84   : > { %9993 = vmatprep.subr.bf16.mxu1 %v10913_v23  ;;  %3752 = vmatpush1.bf16.msra.mxu0 %v10900_v14 }
 0xa85   : > { %3753 = vmatprep.subr.bf16.mxu0 %v10907_v51 }
 0xa87   : > { %9994 = vmatpush3.bf16.msra.mxu1 %v10914_v30  ;;  %v10930_v30 = vld [vmem:[#allocation7 + $0x180] ss:$12 sps:$4 sm:$0xff]  }
 0xa88   : > { %9995 = vmatprep.subr.bf16.mxu1 %v10918_v32  ;;  %3754 = vmatpush1.bf16.msra.mxu0 %v10905_v35  ;;  %v10933_v32 = vld [vmem:[#allocation7 + $0x188] ss:$12 sps:$4 sm:$0xff]  }
 0xa89   : > { %3755 = vmatprep.subr.bf16.mxu0 %v10912_v52  ;;  %v10942_v35 = vld [vmem:[#allocation7 + $0x1c8] ss:$12 sps:$4 sm:$0xff]   ;;  %v10945_v52 = vld [vmem:[#allocation7 + $0x1d0] ss:$12 sps:$4 sm:$0xff]  }
 0xa8b   : > { %9996 = vmatpush3.bf16.msra.mxu1 %v10919_v39  ;;  %v10934_v39 = vld [vmem:[#allocation7 + $0x198] ss:$12 sps:$4 sm:$0xff]  }
 0xa8c   : > { %3756 = vmatpush1.bf16.msra.mxu0 %v10910_v53  ;;  %9997 = vmatprep.subr.bf16.mxu1 %v10923_v55  ;;  %v10953_v55 = vld [vmem:[#allocation7 + $0x200] ss:$12 sps:$4 sm:$0xff]  }
 0xa8d   : > { %3757 = vmatprep.subr.bf16.mxu0 %v10917_v45  ;;  %v10948_v45 = vld [vmem:[#allocation7 + $0x1e4] ss:$12 sps:$4 sm:$0xff]  }
 0xa8f   : > { %9998 = vmatpush3.bf16.msra.mxu1 %v10924_v57  ;;  %v10957_v57 = vld [vmem:[#allocation7 + $0x218] ss:$12 sps:$4 sm:$0xff]  }
 0xa90   : > { %3758 = vmatpush1.bf16.msra.mxu0 %v10915_v10  ;;  %9999 = vmatprep.subr.bf16.mxu1 %v10928_v59  ;;  %v10946_v10 = vld [vmem:[#allocation7 + $0x1e0] ss:$12 sps:$4 sm:$0xff]   ;;  %v10961_v59 = vld [vmem:[#allocation7 + $0x230] ss:$12 sps:$4 sm:$0xff]  }
 0xa91   : > { %3759 = vmatprep.subr.bf16.mxu0 %v10922_v61  ;;  %v10950_v61 = vld [vmem:[#allocation7 + $0x1f8] ss:$12 sps:$4 sm:$0xff]  }
 0xa93   : > { %10000 = vmatpush3.bf16.msra.mxu1 %v10929_v48 }
 0xa94   : > { %3760 = vmatpush1.bf16.msra.mxu0 %v10920_v50  ;;  %10240 = vmatprep.subr.bf16.mxu1 %v12322_v46  ;;  %v10954_v50 = vld [vmem:[#allocation7 + $0x210] ss:$12 sps:$4 sm:$0xff]  }
 0xa95   : > { %3761 = vmatprep.subr.bf16.mxu0 %v10927_v58  ;;  %v10958_v58 = vld [vmem:[#allocation7 + $0x228] ss:$12 sps:$4 sm:$0xff]  }
 0xa98   : > { %3762 = vmatpush1.bf16.msra.mxu0 %v10925_v2 }
 0xa99   : > { %3774 = vmatprep.subr.bf16.mxu0 %v10932_v44 }
 0xb2f   : > { %v2849_v54 = vpop.f32.mrb[12].mxu1 }
 0xb30   : > { %v10202_v49 = vpop.f32.mrb[13].mxu1 }
 0xb31   : > { %v2852_v56 = vpop.f32.mrb[14].mxu1  ;;  %v10952_v49 = vld [vmem:[#allocation7 + $0x1fc] ss:$12 sps:$4 sm:$0xff]  }
 0xb32   : > { %v10203_v31 = vpop.f32.mrb[15].mxu1 }
 0xb33   : > { %v10960_v31 = vld [vmem:[#allocation7 + $0x22c] ss:$12 sps:$4 sm:$0xff]  }
 0xb39   : > { %v2973_v60 = vpop.f32.mrb[16].mxu1 }
 0xb3a   : > { %v10214_v1 = vpop.f32.mrb[17].mxu1 }
 0xb3b   : > { %v2976_v3 = vpop.f32.mrb[18].mxu1 }
 0xb3c   : > { %v10539_v4 = vpack.i.bf16 %v2976_v3, %v2973_v60  ;;  %v10215_v17 = vpop.f32.mrb[19].mxu1 }
 0xb3e   : > { %10540 = vrot.lane.b32.xlu1 %v10539_v4, %s12324_s18  ;;  %v3905_v4 = vld [vmem:[#allocation8] sm:$0x7] }
 0xb3f   : > { %v3910_v17 = vrot.slane %v3905_v4, %v12865_v28 }
 0xb41   : > { %v3087_v5 = vpop.f32.mrb[20].mxu1 }
 0xb42   : > { %10545 = vrot.lane.b32.xlu1 %v10544_v63, %s12324_s18  ;;  %v10226_v6 = vpop.f32.mrb[21].mxu1 }
 0xb43   : > { %v3090_v7 = vpop.f32.mrb[22].mxu1 }
 0xb44   : > { %v10227_v8 = vpop.f32.mrb[23].mxu1 }
 0xb49   : > { %v3211_v9 = vpop.f32.mrb[24].mxu1 }
 0xb4a   : > { %v10238_v43 = vpop.f32.mrb[25].mxu1 }
 0xb4b   : > { %v3214_v12 = vpop.f32.mrb[26].mxu1  ;;  %v3918_v43 = vrot.slane %v3905_v4, %v12862_v27 }
 0xb4c   : > { %v10549_v0 = vpack.i.bf16 %v3214_v12, %v3211_v9  ;;  %v10239_v15 = vpop.f32.mrb[27].mxu1 }
 0xb4d   : > { %v11835_v15 = vld [vmem:[%s12783_s13 + $0x8] sm:$0xff] }
 0xb4e   : > { %10550 = vrot.lane.b32.xlu1 %v10549_v0, %s12324_s18 }
 0xbb0   : > { %v10541_v18 = vpop.permute.xlu1 %10540 }
 0xbb1   : > { %v10543_v19 = vunpack.i.h.bf16 %v10541_v18  ;;  %v10542_v20 = vunpack.i.l.bf16 %v10541_v18 }
 0xbb3   : > { %v3244_v21 = vsel %vm2502_vm1, %v2849_v54, %v10542_v20  ;;  %v3245_v22 = vsel %vm2502_vm1, %v2852_v56, %v10543_v19  ;;  %v10949_v54 = vld [vmem:[#allocation7 + $0x1e8] ss:$12 sps:$4 sm:$0xff]  }
 0xbb4   : > { %v10546_v23 = vpop.permute.xlu1 %10545  ;;  %v3249_v33 = vpack.c.bf16 %v3245_v22, %v3244_v21  ;;  %v10956_v56 = vld [vmem:[#allocation7 + $0x214] ss:$12 sps:$4 sm:$0xff]  }
 0xbb5   : > { %v10548_v62 = vunpack.i.h.bf16 %v10546_v23  ;;  %v10547_v63 = vunpack.i.l.bf16 %v10546_v23  ;;  %v11836_v22 = vld [vmem:[%s12783_s13 + $0x10] sm:$0xff] }
 0xbb6   : > { %3763 = vmatprep.mubr.bf16.mxu0 %v3249_v33  ;;  %3849 = vmatprep.mubr.bf16.mxu1 %v3249_v33  ;;  %v11837_v33 = vld [vmem:[%s12783_s13 + $0x18] sm:$0xff] }
 0xbb7   : > { %v3243_v25 = vsel %vm2502_vm1, %v12968_v16, %v10548_v62  ;;  %v3242_v29 = vsel %vm2502_vm1, %v12966_v13, %v10547_v63  ;;  %v10938_v13 = vld [vmem:[#allocation7 + $0x1b0] ss:$12 sps:$4 sm:$0xff]   ;;  %v10941_v16 = vld [vmem:[#allocation7 + $0x1b8] ss:$12 sps:$4 sm:$0xff]  }
 0xbb8   : > { %v3248_v34 = vpack.c.bf16 %v3243_v25, %v3242_v29 }
 0xbba   : > { %3764 = vmatmul.mubr.bf16.vlgmr.msra.gmra.mrb[48].mxu0 %v3248_v34  ;;  %3850 = vmatmul.mubr.bf16.vlgmr.msra.gmra.mrb[28].mxu1 %v3248_v34 }
 0xbbb   : > { %3775 = vmatpush1.bf16.msra.mxu0 %v10930_v30  ;;  %10241 = vmatpush3.bf16.msra.mxu1 %v10933_v32  ;;  %v11838_v32 = vld [vmem:[%s12783_s13 + $0x20] sm:$0xff] }
 0xbbc   : > { %3776 = vmatprep.subr.bf16.mxu0 %v10936_v38  ;;  %10242 = vmatprep.subr.bf16.mxu1 %v12322_v46 }
 0xbbd   : > { %3806 = vmatprep.mubr.bf16.mxu0 %v12321_v11  ;;  %10256 = vmatprep.mubr.msk.bf16.mxu1 %vm12323_vm0, %v12322_v46 }
 0xbbf   : > { %3777 = vmatpush1.bf16.msra.mxu0 %v10934_v39  ;;  %10243 = vmatpush3.bf16.msra.mxu1 %v10937_v40  ;;  %v11839_v40 = vld [vmem:[%s12783_s13 + $0x28] sm:$0xff] }
 0xbc0   : > { %v10551_v42 = vpop.permute.xlu1 %10550  ;;  %3778 = vmatprep.subr.bf16.mxu0 %v10940_v41  ;;  %10244 = vmatprep.subr.bf16.mxu1 %v12322_v46 }
 0xbc1   : > { %v10553_v36 = vunpack.i.h.bf16 %v10551_v42  ;;  %v10552_v37 = vunpack.i.l.bf16 %v10551_v42 }
 0xbc3   : > { %v3247_v14 = vsel %vm2502_vm1, %v3090_v7, %v10553_v36  ;;  %v3246_v51 = vsel %vm2502_vm1, %v3087_v5, %v10552_v37  ;;  %3779 = vmatpush1.bf16.msra.mxu0 %v10938_v13  ;;  %10245 = vmatpush3.bf16.msra.mxu1 %v10941_v16  ;;  %v11834_v7 = vld [vmem:[%s12783_s13] sm:$0xff]  ;;  %s12210_s13 = sshll.u32 %s12325_s29, 4  ;;  %s12211_s13 = int_to_ptr.vmem [resolvable:$false] %s12210_s13 }
 0xbc4   : > { %v3250_v53 = vpack.c.bf16 %v3247_v14, %v3246_v51  ;;  %3780 = vmatprep.subr.bf16.mxu0 %v10944_v47  ;;  %10246 = vmatprep.subr.bf16.mxu1 %v12322_v46  ;;  %v10962_v14 = vld [vmem:[#allocation10] ss:$48 sps:$4 sm:$0xff]   ;;  %v10964_v51 = vld [vmem:[#allocation10 + $0x4] ss:$48 sps:$4 sm:$0xff]   ;;  %s12212_s20 = scalar_lea.vmem %s12211_s13, 1536  ;;  %p12213_p11 = scmp.lt.s32.totalorder %s13287_s25, %s12211_s13 }
 0xbc5   : > { %p12214_p0 = scmp.lt.s32.totalorder %s12212_s20, %s12206_s15 }
 0xbc7   : > { %3781 = vmatpush1.bf16.msra.mxu0 %v10942_v35  ;;  %10247 = vmatpush3.bf16.msra.mxu1 %v10945_v52  ;;  %v10965_v35 = vld [vmem:[#allocation10 + $0x8] ss:$48 sps:$4 sm:$0xff]   ;;  %v10967_v52 = vld [vmem:[#allocation10 + $0xc] ss:$48 sps:$4 sm:$0xff]   ;;  %p12215_p6 = por %p12214_p0, %p12213_p11 }
 0xbc8   : > { %3782 = vmatprep.subr.bf16.mxu0 %v10948_v45  ;;  %10248 = vmatprep.subr.bf16.mxu1 %v12322_v46  ;;  %v10973_v45 = vld [vmem:[#allocation10 + $0x6c] ss:$48 sps:$4 sm:$0xff]  }
 0xbc9   : > { %p12216_p7 = pnand %p12215_p6, %p12209_p10 }
 0xbcb   : > { %3783 = vmatpush1.bf16.msra.mxu0 %v10946_v10  ;;  %10249 = vmatpush3.bf16.msra.mxu1 %v10949_v54  ;;  %v10968_v10 = vld [vmem:[#allocation10 + $0x60] ss:$48 sps:$4 sm:$0xff]   ;;  %v10971_v54 = vld [vmem:[#allocation10 + $0x68] ss:$48 sps:$4 sm:$0xff]  }
 0xbcc   : > { %3784 = vmatprep.subr.bf16.mxu0 %v10952_v49  ;;  %10250 = vmatprep.subr.bf16.mxu1 %v12322_v46  ;;  %v10976_v49 = vld [vmem:[#allocation10 + $0xc4] ss:$48 sps:$4 sm:$0xff]  }
 0xbcf   : > { %3785 = vmatpush1.bf16.msra.mxu0 %v10950_v61  ;;  %10251 = vmatpush3.bf16.msra.mxu1 %v10953_v55  ;;  %v10979_v61 = vld [vmem:[#allocation10 + $0xcc] ss:$48 sps:$4 sm:$0xff]   ;;  %v10974_v55 = vld [vmem:[#allocation10 + $0xc0] ss:$48 sps:$4 sm:$0xff]  }
 0xbd0   : > { %3786 = vmatprep.subr.bf16.mxu0 %v10956_v56  ;;  %10252 = vmatprep.subr.bf16.mxu1 %v12322_v46  ;;  %v10977_v56 = vld [vmem:[#allocation10 + $0xc8] ss:$48 sps:$4 sm:$0xff]  }
 0xbd3   : > { %3787 = vmatpush1.bf16.msra.mxu0 %v10954_v50  ;;  %10253 = vmatpush3.bf16.msra.mxu1 %v10957_v57  ;;  %v10982_v50 = vld [vmem:[#allocation10 + $0x124] ss:$48 sps:$4 sm:$0xff]   ;;  %v10985_v57 = vld [vmem:[#allocation10 + $0x12c] ss:$48 sps:$4 sm:$0xff]  }
 0xbd4   : > { %3788 = vmatprep.subr.bf16.mxu0 %v10960_v31  ;;  %10254 = vmatprep.subr.bf16.mxu1 %v12322_v46  ;;  %v3914_v46 = vrot.slane %v3905_v4, %v12859_v26  ;;  %v10980_v31 = vld [vmem:[#allocation10 + $0x120] ss:$48 sps:$4 sm:$0xff]   ;;  %v10995_v4 = vld [vmem:[#allocation10 + $0x1e8] ss:$48 sps:$4 sm:$0xff]  }
 0xbd7   : > { %3789 = vmatpush1.bf16.msra.mxu0 %v10958_v58  ;;  %10255 = vmatpush3.bf16.msra.mxu1 %v10961_v59  ;;  %v10983_v58 = vld [vmem:[#allocation10 + $0x128] ss:$48 sps:$4 sm:$0xff]   ;;  %v10988_v59 = vld [vmem:[#allocation10 + $0x184] ss:$48 sps:$4 sm:$0xff]  }
 0xbd8   : > { %5811 = vmatprep.subr.bf16.mxu1 %v10964_v51  ;;  %5897 = vmatprep.subr.bf16.mxu0 %v10967_v52 }
 0xbda   : > { %3807 = vmatmul.mubr.bf16.vlgmr.msra.gmra.mrb[48].mxu0 %v3250_v53  ;;  %10257 = vmatmul.mubr.bf16.vlgmr.msra.gmra.mrb[32].mxu1 %v3250_v53  ;;  %v10970_v53 = vld [vmem:[#allocation10 + $0x64] ss:$48 sps:$4 sm:$0xff]  }
 0xbdb   : > { %5812 = vmatpush1.bf16.msra.mxu1 %v10962_v14  ;;  %5898 = vmatpush1.bf16.msra.mxu0 %v10965_v35 }
 0xbdc   : > { %5813 = vmatprep.subr.bf16.mxu1 %v10970_v53  ;;  %5899 = vmatprep.subr.bf16.mxu0 %v10973_v45 }
 0xbdf   : > { %5814 = vmatpush1.bf16.msra.mxu1 %v10968_v10  ;;  %5900 = vmatpush1.bf16.msra.mxu0 %v10971_v54  ;;  %v11024_v54 = vld [vmem:[#allocation10 + $0x3c4] ss:$48 sps:$4 sm:$0xff]  }
 0xbe0   : > { %5815 = vmatprep.subr.bf16.mxu1 %v10976_v49  ;;  %5901 = vmatprep.subr.bf16.mxu0 %v10979_v61  ;;  %v11027_v49 = vld [vmem:[#allocation10 + $0x3cc] ss:$48 sps:$4 sm:$0xff]   ;;  %v11022_v61 = vld [vmem:[#allocation10 + $0x3c0] ss:$48 sps:$4 sm:$0xff]  }
 0xbe3   : > { %5816 = vmatpush1.bf16.msra.mxu1 %v10974_v55  ;;  %5902 = vmatpush1.bf16.msra.mxu0 %v10977_v56  ;;  %v11025_v55 = vld [vmem:[#allocation10 + $0x3c8] ss:$48 sps:$4 sm:$0xff]   ;;  %v11030_v56 = vld [vmem:[#allocation10 + $0x424] ss:$48 sps:$4 sm:$0xff]  }
 0xbe4   : > { %5817 = vmatprep.subr.bf16.mxu1 %v10982_v50  ;;  %5903 = vmatprep.subr.bf16.mxu0 %v10985_v57  ;;  %v11033_v50 = vld [vmem:[#allocation10 + $0x42c] ss:$48 sps:$4 sm:$0xff]   ;;  %v11028_v57 = vld [vmem:[#allocation10 + $0x420] ss:$48 sps:$4 sm:$0xff]  }
 0xbe7   : > { %5818 = vmatpush1.bf16.msra.mxu1 %v10980_v31  ;;  %5904 = vmatpush1.bf16.msra.mxu0 %v10983_v58  ;;  %v11031_v31 = vld [vmem:[#allocation10 + $0x428] ss:$48 sps:$4 sm:$0xff]   ;;  %v11036_v58 = vld [vmem:[#allocation10 + $0x484] ss:$48 sps:$4 sm:$0xff]  }
 0xbe8   : > { %5819 = vmatprep.subr.bf16.mxu1 %v10988_v59  ;;  %v11034_v59 = vld [vmem:[#allocation10 + $0x480] ss:$48 sps:$4 sm:$0xff]  }
 0xc8d   : > { %v10001_v2 = vpop.f32.mrb[28].mxu1 }
 0xc8e   : > { %v10002_v48 = vpop.f32.mrb[29].mxu1 }
 0xc8f   : > { %v10003_v44 = vadd.f32 %v10002_v48, %v10001_v2  ;;  %v10004_v60 = vpop.f32.mrb[30].mxu1  ;;  %v10991_v2 = vld [vmem:[#allocation10 + $0x18c] ss:$48 sps:$4 sm:$0xff]   ;;  %v10986_v48 = vld [vmem:[#allocation10 + $0x180] ss:$48 sps:$4 sm:$0xff]  }
 0xc90   : > { %v10005_v1 = vpop.f32.mrb[31].mxu1  ;;  %5905 = vmatprep.subr.bf16.mxu0 %v10991_v2  ;;  %5820 = vmatpush1.bf16.msra.mxu1 %v10986_v48  ;;  %v11037_v2 = vld [vmem:[#allocation10 + $0x488] ss:$48 sps:$4 sm:$0xff]   ;;  %v11039_v48 = vld [vmem:[#allocation10 + $0x48c] ss:$48 sps:$4 sm:$0xff]  }
 0xc91   : > { %v10006_v3 = vadd.f32 %v10005_v1, %v10004_v60  ;;  %v10994_v60 = vld [vmem:[#allocation10 + $0x1e4] ss:$48 sps:$4 sm:$0xff]   ;;  %v10997_v1 = vld [vmem:[#allocation10 + $0x1ec] ss:$48 sps:$4 sm:$0xff]  }
 0xc92   : > { %5821 = vmatprep.subr.bf16.mxu1 %v10994_v60  ;;  %v11045_v60 = vld [vmem:[#allocation10 + $0x4ec] ss:$48 sps:$4 sm:$0xff]  }
 0xcad   : > { %v3808_v5 = vpop.f32.mrb[48].mxu0  ;;  %v3892_v6 = vpop.f32.mrb[32].mxu1 }
 0xcae   : > { %v3899_v8 = vadd.f32 %v11834_v7, %v3808_v5  ;;  %v3893_v9 = vadd.f32 %v10003_v44, %v3892_v6  ;;  %v3810_v12 = vpop.f32.mrb[49].mxu0  ;;  %v10258_v0 = vpop.f32.mrb[33].mxu1  ;;  %v10989_v44 = vld [vmem:[#allocation10 + $0x188] ss:$48 sps:$4 sm:$0xff]   ;;  %v11003_v5 = vld [vmem:[#allocation10 + $0x24c] ss:$48 sps:$4 sm:$0xff]  }
 0xcaf   : > { %v3900_v18 = vadd.f32 %v11835_v15, %v3810_v12  ;;  %v3812_v19 = vpop.f32.mrb[50].mxu0  ;;  %v3895_v20 = vpop.f32.mrb[34].mxu1  ;;  %5906 = vmatpush1.bf16.msra.mxu0 %v10989_v44  ;;  %v10998_v6 = vld [vmem:[#allocation10 + $0x240] ss:$48 sps:$4 sm:$0xff]   ;;  %v11006_v7 = vld [vmem:[#allocation10 + $0x2a4] ss:$48 sps:$4 sm:$0xff]  }
 0xcb0   : > { %v13088_v21 = vadd.f32 %v3910_v17, %v3899_v8  ;;  %v3901_v23 = vadd.f32 %v11836_v22, %v3893_v9  ;;  %v3902_v62 = vadd.f32 %v11837_v33, %v3812_v19  ;;  %v3896_v63 = vadd.f32 %v10006_v3, %v3895_v20  ;;  %v3814_v25 = vpop.f32.mrb[51].mxu0  ;;  %v10259_v29 = vpop.f32.mrb[35].mxu1  ;;  %v10992_v3 = vld [vmem:[#allocation10 + $0x1e0] ss:$48 sps:$4 sm:$0xff]   ;;  %5907 = vmatprep.subr.bf16.mxu0 %v10997_v1  ;;  %v11009_v8 = vld [vmem:[#allocation10 + $0x2ac] ss:$48 sps:$4 sm:$0xff]  }
 0xcb1   : > { %v13092_v30 = vadd.f32 %v3914_v46, %v3900_v18  ;;  %v3903_v34 = vadd.f32 %v11838_v32, %v3814_v25  ;;  %5822 = vmatpush1.bf16.msra.mxu1 %v10992_v3  ;;  %v11004_v9 = vld [vmem:[#allocation10 + $0x2a0] ss:$48 sps:$4 sm:$0xff]   ;;  %v11012_v12 = vld [vmem:[#allocation10 + $0x304] ss:$48 sps:$4 sm:$0xff]   ;;  %v11015_v0 = vld [vmem:[#allocation10 + $0x30c] ss:$48 sps:$4 sm:$0xff]  }
 0xcb2   : > { %v13095_v38 = vadd.f32 %v3918_v43, %v3901_v23  ;;  %v13097_v39 = vadd.f32 %v3910_v17, %v3902_v62  ;;  %v3904_v41 = vadd.f32 %v11839_v40, %v3896_v63  ;;  %v11000_v17 = vld [vmem:[#allocation10 + $0x244] ss:$48 sps:$4 sm:$0xff]   ;;  %v11010_v15 = vld [vmem:[#allocation10 + $0x300] ss:$48 sps:$4 sm:$0xff]   ;;  %v11013_v18 = vld [vmem:[#allocation10 + $0x308] ss:$48 sps:$4 sm:$0xff]  }
 0xcb3   : > { %v13100_v13 = vadd.f32 %v3914_v46, %v3903_v34  ;;  %v3930_v16 = vadd.f32 %v13092_v30, %v13088_v21  ;;  %5908 = vmatpush1.bf16.msra.mxu0 %v10995_v4  ;;  %5823 = vmatprep.subr.bf16.mxu1 %v11000_v17  ;;  %v11001_v46 = vld [vmem:[#allocation10 + $0x248] ss:$48 sps:$4 sm:$0xff]   ;;  %v11018_v19 = vld [vmem:[#allocation10 + $0x364] ss:$48 sps:$4 sm:$0xff]   ;;  %v11021_v20 = vld [vmem:[#allocation10 + $0x36c] ss:$48 sps:$4 sm:$0xff]  }
 0xcb4   : > { %v13104_v42 = vadd.f32 %v3918_v43, %v3904_v41  ;;  %5909 = vmatprep.subr.bf16.mxu0 %v11003_v5  ;;  %v11007_v43 = vld [vmem:[#allocation10 + $0x2a8] ss:$48 sps:$4 sm:$0xff]   ;;  %v11016_v22 = vld [vmem:[#allocation10 + $0x360] ss:$48 sps:$4 sm:$0xff]   ;;  %v11042_v44 = vld [vmem:[#allocation10 + $0x4e4] ss:$48 sps:$4 sm:$0xff]  }
 0xcb5   : > { %v3931_v47 = vadd.f32 %v3930_v16, %v13095_v38  ;;  %v3934_v36 = vadd.f32 %v13100_v13, %v13097_v39  ;;  %5824 = vmatpush1.bf16.msra.mxu1 %v10998_v6  ;;  %v11019_v23 = vld [vmem:[#allocation10 + $0x368] ss:$48 sps:$4 sm:$0xff]   ;;  %v11040_v1 = vld [vmem:[#allocation10 + $0x4e0] ss:$48 sps:$4 sm:$0xff]   ;;  %v11048_v4 = vld [vmem:[#allocation10 + $0x544] ss:$48 sps:$4 sm:$0xff]  }
 0xcb6   : > { %5825 = vmatprep.subr.bf16.mxu1 %v11006_v7  ;;  %v11043_v3 = vld [vmem:[#allocation10 + $0x4e8] ss:$48 sps:$4 sm:$0xff]   ;;  %v11051_v17 = vld [vmem:[#allocation10 + $0x54c] ss:$48 sps:$4 sm:$0xff]   ;;  %v11046_v5 = vld [vmem:[#allocation10 + $0x540] ss:$48 sps:$4 sm:$0xff]  }
 0xcb7   : > { %3932 = vadd.xlane.f32.xlu1 %v3931_v47  ;;  %v3935_v37 = vadd.f32 %v3934_v36, %v13104_v42  ;;  %5910 = vmatpush1.bf16.msra.mxu0 %v11001_v46  ;;  %v11049_v6 = vld [vmem:[#allocation10 + $0x548] ss:$48 sps:$4 sm:$0xff]   ;;  %v11054_v46 = vld [vmem:[#allocation10 + $0x5a4] ss:$48 sps:$4 sm:$0xff]   ;;  %v11057_v7 = vld [vmem:[#allocation10 + $0x5ac] ss:$48 sps:$4 sm:$0xff]  }
 0xcb8   : > { %5911 = vmatprep.subr.bf16.mxu0 %v11009_v8  ;;  %v11052_v8 = vld [vmem:[#allocation10 + $0x5a0] ss:$48 sps:$4 sm:$0xff]  }
 0xcb9   : > { %3936 = vadd.xlane.f32.xlu0 %v3935_v37  ;;  %5826 = vmatpush1.bf16.msra.mxu1 %v11004_v9  ;;  %v11055_v9 = vld [vmem:[#allocation10 + $0x5a8] ss:$48 sps:$4 sm:$0xff]  }
 0xcba   : > { %5827 = vmatprep.subr.bf16.mxu1 %v11012_v12  ;;  %v11063_v12 = vld [vmem:[#allocation10 + $0x60c] ss:$48 sps:$4 sm:$0xff]  }
 0xcbb   : > { %5912 = vmatpush1.bf16.msra.mxu0 %v11007_v43  ;;  %v11060_v43 = vld [vmem:[#allocation10 + $0x604] ss:$48 sps:$4 sm:$0xff]  }
 0xcbc   : > { %5913 = vmatprep.subr.bf16.mxu0 %v11015_v0 }
 0xcbd   : > { %5828 = vmatpush1.bf16.msra.mxu1 %v11010_v15 }
 0xcbe   : > { %5829 = vmatprep.subr.bf16.mxu1 %v11018_v19 }
 0xcbf   : > { %5914 = vmatpush1.bf16.msra.mxu0 %v11013_v18 }
 0xcc0   : > { %5915 = vmatprep.subr.bf16.mxu0 %v11021_v20 }
 0xcc1   : > { %5830 = vmatpush1.bf16.msra.mxu1 %v11016_v22 }
 0xcc2   : > { %5831 = vmatprep.subr.bf16.mxu1 %v11024_v54 }
 0xcc3   : > { %5916 = vmatpush1.bf16.msra.mxu0 %v11019_v23  ;;  %v13140_v23 = vld [vmem:[#allocation19] sm:$0x7] }
 0xcc4   : > { %5917 = vmatprep.subr.bf16.mxu0 %v11027_v49 }
 0xcc5   : > { %5832 = vmatpush1.bf16.msra.mxu1 %v11022_v61 }
 0xcc6   : > { %5833 = vmatprep.subr.bf16.mxu1 %v11030_v56  ;;  %v11061_v56 = vld [vmem:[#allocation10 + $0x608] ss:$48 sps:$4 sm:$0xff]  }
 0xcc7   : > { %5918 = vmatpush1.bf16.msra.mxu0 %v11025_v55 }
 0xcc8   : > { %5919 = vmatprep.subr.bf16.mxu0 %v11033_v50 }
 0xcc9   : > { %5834 = vmatpush1.bf16.msra.mxu1 %v11028_v57  ;;  %v11066_v57 = vld [vmem:[#allocation10 + $0x664] ss:$48 sps:$4 sm:$0xff]  }
 0xcca   : > { %5835 = vmatprep.subr.bf16.mxu1 %v11036_v58  ;;  %v11067_v58 = vld [vmem:[#allocation10 + $0x668] ss:$48 sps:$4 sm:$0xff]  }
 0xccb   : > { %5920 = vmatpush1.bf16.msra.mxu0 %v11031_v31  ;;  %v11069_v31 = vld [vmem:[#allocation10 + $0x66c] ss:$48 sps:$4 sm:$0xff]  }
 0xccc   : > { %5921 = vmatprep.subr.bf16.mxu0 %v11039_v48  ;;  %v11070_v48 = vld [vmem:[#allocation10 + $0x6c0] ss:$48 sps:$4 sm:$0xff]  }
 0xccd   : > { %5836 = vmatpush1.bf16.msra.mxu1 %v11034_v59  ;;  %v11072_v59 = vld [vmem:[#allocation10 + $0x6c4] ss:$48 sps:$4 sm:$0xff]  }
 0xcce   : > { %5837 = vmatprep.subr.bf16.mxu1 %v11042_v44  ;;  %v11073_v44 = vld [vmem:[#allocation10 + $0x6c8] ss:$48 sps:$4 sm:$0xff]  }
 0xccf   : > { %5922 = vmatpush1.bf16.msra.mxu0 %v11037_v2  ;;  %v11075_v2 = vld [vmem:[#allocation10 + $0x6cc] ss:$48 sps:$4 sm:$0xff]  }
 0xcd0   : > { %5923 = vmatprep.subr.bf16.mxu0 %v11045_v60  ;;  %v11078_v60 = vld [vmem:[#allocation10 + $0x724] ss:$48 sps:$4 sm:$0xff]  }
 0xcd1   : > { %5838 = vmatpush1.bf16.msra.mxu1 %v11040_v1  ;;  %v11081_v1 = vld [vmem:[#allocation10 + $0x72c] ss:$48 sps:$4 sm:$0xff]  }
 0xcd2   : > { %5839 = vmatprep.subr.bf16.mxu1 %v11048_v4  ;;  %v11079_v4 = vld [vmem:[#allocation10 + $0x728] ss:$48 sps:$4 sm:$0xff]  }
 0xcd3   : > { %5924 = vmatpush1.bf16.msra.mxu0 %v11043_v3  ;;  %v11076_v3 = vld [vmem:[#allocation10 + $0x720] ss:$48 sps:$4 sm:$0xff]  }
 0xcd4   : > { %5925 = vmatprep.subr.bf16.mxu0 %v11051_v17  ;;  %v11084_v17 = vld [vmem:[#allocation10 + $0x784] ss:$48 sps:$4 sm:$0xff]  }
 0xcd5   : > { %5840 = vmatpush1.bf16.msra.mxu1 %v11046_v5  ;;  %v11087_v5 = vld [vmem:[#allocation10 + $0x78c] ss:$48 sps:$4 sm:$0xff]  }
 0xcd6   : > { %5841 = vmatprep.subr.bf16.mxu1 %v11054_v46  ;;  %v11085_v46 = vld [vmem:[#allocation10 + $0x788] ss:$48 sps:$4 sm:$0xff]  }
 0xcd7   : > { %5926 = vmatpush1.bf16.msra.mxu0 %v11049_v6  ;;  %v11082_v6 = vld [vmem:[#allocation10 + $0x780] ss:$48 sps:$4 sm:$0xff]  }
 0xcd8   : > { %5927 = vmatprep.subr.bf16.mxu0 %v11057_v7  ;;  %v11090_v7 = vld [vmem:[#allocation10 + $0x7e4] ss:$48 sps:$4 sm:$0xff]  }
 0xcd9   : > { %5842 = vmatpush1.bf16.msra.mxu1 %v11052_v8  ;;  %v11093_v8 = vld [vmem:[#allocation10 + $0x7ec] ss:$48 sps:$4 sm:$0xff]  }
 0xcda   : > { %5854 = vmatprep.subr.bf16.mxu1 %v11060_v43  ;;  %v11091_v43 = vld [vmem:[#allocation10 + $0x7e8] ss:$48 sps:$4 sm:$0xff]  }
 0xcdb   : > { %5928 = vmatpush1.bf16.msra.mxu0 %v11055_v9  ;;  %v11088_v9 = vld [vmem:[#allocation10 + $0x7e0] ss:$48 sps:$4 sm:$0xff]  }
 0xcdc   : > { %5940 = vmatprep.subr.bf16.mxu0 %v11063_v12  ;;  %v11096_v12 = vld [vmem:[#allocation10 + $0x844] ss:$48 sps:$4 sm:$0xff]  }
 0xd44   : > { %v3933_v33 = vpop.xlane.xlu1 %3932 }
 0xd45   : > { %v3938_v62 = vmul.f32 0.0026041667, %v3933_v33  ;;  %v13142_v33 = vld [vmem:[#allocation20] sm:$0x7] }
 0xd46   : > { %v3937_v63 = vpop.xlane.xlu0 %3936 }
 0xd47   : > { %v13111_v25 = vsub.f32 %v13088_v21, %v3938_v62  ;;  %v13114_v29 = vsub.f32 %v13092_v30, %v3938_v62  ;;  %v3939_v32 = vmul.f32 0.0026041667, %v3937_v63  ;;  %v13117_v34 = vsub.f32 %v13095_v38, %v3938_v62 }
 0xd48   : > { %v3980_v62 = vrot.slane %v13140_v23, %v12859_v26  ;;  %v3976_v63 = vrot.slane %v13140_v23, %v12865_v28 }
 0xd49   : > { %v13120_v40 = vsub.f32 %v13097_v39, %v3939_v32  ;;  %v13123_v41 = vsub.f32 %v13100_v13, %v3939_v32  ;;  %v13126_v16 = vsub.f32 %v13104_v42, %v3939_v32  ;;  %v3946_v47 = vmul.f32 %v13111_v25, %v13111_v25 }
 0xd4a   : > { %v3947_v36 = vmul.f32 %v13114_v29, %v13114_v29  ;;  %v3948_v51 = vmul.f32 %v13117_v34, %v13117_v34 }
 0xd4b   : > { %v3949_v37 = vmul.f32 %v13120_v40, %v13120_v40  ;;  %v3950_v14 = vmul.f32 %v13123_v41, %v13123_v41  ;;  %v3951_v52 = vmul.f32 %v13126_v16, %v13126_v16 }
 0xd4c   : > { %v3952_v35 = vadd.f32 %v3947_v36, %v3946_v47 }
 0xd4d   : > { %v3956_v53 = vadd.f32 %v3950_v14, %v3949_v37 }
 0xd4e   : > { %v3953_v45 = vadd.f32 %v3952_v35, %v3948_v51  ;;  %v4002_v51 = vrot.slane %v13142_v33, %v12859_v26 }
 0xd4f   : > { %v3957_v10 = vadd.f32 %v3956_v53, %v3951_v52  ;;  %v3998_v52 = vrot.slane %v13142_v33, %v12865_v28 }
 0xd50   : > { %3954 = vadd.xlane.f32.xlu0 %v3953_v45 }
 0xd51   : > { %3958 = vadd.xlane.f32.xlu1 %v3957_v10 }
 0xddd   : > { %v3955_v0 = vpop.xlane.xlu0 %3954 }
 0xdde   : > { %v3960_v15 = vmul.f32 0.0026041667, %v3955_v0  ;;  %v3959_v18 = vpop.xlane.xlu1 %3958  ;;  %v11099_v0 = vld [vmem:[#allocation10 + $0x84c] ss:$48 sps:$4 sm:$0xff]  }
 0xddf   : > { %v3961_v19 = vmul.f32 0.0026041667, %v3959_v18 }
 0xde0   : > { %v3962_v20 = vadd.f32 1e-05, %v3960_v15 }
 0xde1   : > { %v3963_v22 = vadd.f32 1e-05, %v3961_v19  ;;  %v3984_v19 = vrot.slane %v13140_v23, %v12862_v27 }
 0xde2   : > { %11830 = vrsqrt.f32 %v3962_v20  ;;  %v11094_v20 = vld [vmem:[#allocation10 + $0x840] ss:$48 sps:$4 sm:$0xff]  }
 0xde3   : > { %11832 = vrsqrt.f32 %v3963_v22  ;;  %v11097_v22 = vld [vmem:[#allocation10 + $0x848] ss:$48 sps:$4 sm:$0xff]  }
 0xdec   : > { %v13148_v32 = vpop.eup %11830 }
 0xded   : > { %v13150_v47 = vpop.eup %11832  ;;  %v3967_v36 = vmul.f32 %v13148_v32, %v13114_v29  ;;  %v3966_v37 = vmul.f32 %v13148_v32, %v13111_v25  ;;  %v3968_v18 = vmul.f32 %v13148_v32, %v13117_v34  ;;  %v11103_v34 = vld [vmem:[#allocation10 + $0x8a8] ss:$48 sps:$4 sm:$0xff]   ;;  %v11108_v32 = vld [vmem:[#allocation10 + $0x14] ss:$48 sps:$4 sm:$0xff]  }
 0xdee   : > { %v3970_v14 = vmul.f32 %v13150_v47, %v13123_v41  ;;  %v3969_v35 = vmul.f32 %v13150_v47, %v13120_v40  ;;  %v11058_v41 = vld [vmem:[#allocation10 + $0x600] ss:$48 sps:$4 sm:$0xff]   ;;  %v3971_v15 = vmul.f32 %v13150_v47, %v13126_v16  ;;  %v11111_v47 = vld [vmem:[#allocation10 + $0x1c] ss:$48 sps:$4 sm:$0xff]  }
 0xdef   : > { %v3989_v53 = vmul.f32 %v3980_v62, %v3967_v36  ;;  %v3988_v45 = vmul.f32 %v3976_v63, %v3966_v37  ;;  %v11064_v40 = vld [vmem:[#allocation10 + $0x660] ss:$48 sps:$4 sm:$0xff]   ;;  %v3990_v37 = vmul.f32 %v3984_v19, %v3968_v18  ;;  %v11165_v18 = vld [vmem:[#allocation10 + $0x37c] ss:$48 sps:$4 sm:$0xff]  }
 0xdf0   : > { %v3992_v10 = vmul.f32 %v3980_v62, %v3970_v14  ;;  %v3991_v54 = vmul.f32 %v3976_v63, %v3969_v35  ;;  %v11102_v62 = vld [vmem:[#allocation10 + $0x8a4] ss:$48 sps:$4 sm:$0xff]   ;;  %v11105_v63 = vld [vmem:[#allocation10 + $0x8ac] ss:$48 sps:$4 sm:$0xff]   ;;  %v3993_v36 = vmul.f32 %v3984_v19, %v3971_v15  ;;  %v4006_v14 = vrot.slane %v13142_v33, %v12862_v27  ;;  %v11100_v16 = vld [vmem:[#allocation10 + $0x8a0] ss:$48 sps:$4 sm:$0xff]  }
 0xdf1   : > { %v4011_v29 = vadd.f32 %v4002_v51, %v3989_v53  ;;  %v4010_v61 = vadd.f32 %v3998_v52, %v3988_v45  ;;  %v11106_v35 = vld [vmem:[#allocation10 + $0x10] ss:$48 sps:$4 sm:$0xff]   ;;  %v11109_v53 = vld [vmem:[#allocation10 + $0x18] ss:$48 sps:$4 sm:$0xff]   ;;  %v11114_v45 = vld [vmem:[#allocation10 + $0x74] ss:$48 sps:$4 sm:$0xff]  }
 0xdf2   : > { %v4014_v49 = vadd.f32 %v4002_v51, %v3992_v10  ;;  %v4013_v25 = vadd.f32 %v3998_v52, %v3991_v54  ;;  %v4015_v23 = vadd.f32 %v4006_v14, %v3993_v36  ;;  %v4012_v51 = vadd.f32 %v4006_v14, %v3990_v37  ;;  %v11117_v33 = vld [vmem:[#allocation10 + $0x7c] ss:$48 sps:$4 sm:$0xff]   ;;  %v11112_v10 = vld [vmem:[#allocation10 + $0x70] ss:$48 sps:$4 sm:$0xff]   ;;  %v11115_v54 = vld [vmem:[#allocation10 + $0x78] ss:$48 sps:$4 sm:$0xff]  }
 0xdf3   : > { %v11162_v15 = vld [vmem:[#allocation10 + $0x374] ss:$48 sps:$4 sm:$0xff]   ;;  %v11160_v19 = vld [vmem:[#allocation10 + $0x370] ss:$48 sps:$4 sm:$0xff]   ;;  %v11169_v36 = vld [vmem:[#allocation10 + $0x3d8] ss:$48 sps:$4 sm:$0xff]  }
 0xdf4   : > { %v13164_v55 = vpack.c.bf16 %v4014_v49, %v4011_v29  ;;  %v13166_v50 = vpack.c.bf16 %v4013_v25, %v4010_v61  ;;  %v13182_v52 = vpack.c.bf16 %v4015_v23, %v4012_v51  ;;  %v11120_v29 = vld [vmem:[#allocation10 + $0xd4] ss:$48 sps:$4 sm:$0xff]   ;;  %v11123_v49 = vld [vmem:[#allocation10 + $0xdc] ss:$48 sps:$4 sm:$0xff]   ;;  %v11118_v61 = vld [vmem:[#allocation10 + $0xd0] ss:$48 sps:$4 sm:$0xff]  }
 0xdf5   : > { %v11121_v25 = vld [vmem:[#allocation10 + $0xd8] ss:$48 sps:$4 sm:$0xff]   ;;  %v11174_v37 = vld [vmem:[#allocation10 + $0x434] ss:$48 sps:$4 sm:$0xff]   ;;  %v11177_v14 = vld [vmem:[#allocation10 + $0x43c] ss:$48 sps:$4 sm:$0xff]  }
 0xdf6   : > { %5843 = vmatprep.mubr.bf16.mxu1 %v13164_v55  ;;  %5929 = vmatprep.mubr.bf16.mxu0 %v13164_v55  ;;  %v11180_v23 = vld [vmem:[#allocation10 + $0x494] ss:$48 sps:$4 sm:$0xff]   ;;  %v11181_v51 = vld [vmem:[#allocation10 + $0x498] ss:$48 sps:$4 sm:$0xff]  }
 0xdf7   : > { %5844 = vmatmul.mubr.bf16.vlgmr.msra.gmra.mrb[36].mxu1 %v13166_v50  ;;  %5930 = vmatmul.mubr.bf16.vlgmr.msra.gmra.mrb[52].mxu0 %v13166_v50 }
 0xdf8   : > { %5855 = vmatpush1.bf16.msra.mxu1 %v11058_v41  ;;  %5941 = vmatpush1.bf16.msra.mxu0 %v11061_v56  ;;  %v11126_v41 = vld [vmem:[#allocation10 + $0x134] ss:$48 sps:$4 sm:$0xff]   ;;  %v11129_v56 = vld [vmem:[#allocation10 + $0x13c] ss:$48 sps:$4 sm:$0xff]  }
 0xdf9   : > { %5856 = vmatprep.subr.bf16.mxu1 %v11066_v57  ;;  %5942 = vmatprep.subr.bf16.mxu0 %v11069_v31  ;;  %v11124_v57 = vld [vmem:[#allocation10 + $0x130] ss:$48 sps:$4 sm:$0xff]   ;;  %v11127_v31 = vld [vmem:[#allocation10 + $0x138] ss:$48 sps:$4 sm:$0xff]  }
 0xdfa   : > { %5886 = vmatprep.mubr.bf16.mxu1 %v12321_v11  ;;  %5972 = vmatprep.mubr.bf16.mxu0 %v12321_v11 }
 0xdfc   : > { %5857 = vmatpush1.bf16.msra.mxu1 %v11064_v40  ;;  %5943 = vmatpush1.bf16.msra.mxu0 %v11067_v58  ;;  %v11132_v40 = vld [vmem:[#allocation10 + $0x194] ss:$48 sps:$4 sm:$0xff]   ;;  %v11135_v58 = vld [vmem:[#allocation10 + $0x19c] ss:$48 sps:$4 sm:$0xff]  }
 0xdfd   : > { %5858 = vmatprep.subr.bf16.mxu1 %v11072_v59  ;;  %5944 = vmatprep.subr.bf16.mxu0 %v11075_v2  ;;  %v11130_v59 = vld [vmem:[#allocation10 + $0x190] ss:$48 sps:$4 sm:$0xff]   ;;  %v11133_v2 = vld [vmem:[#allocation10 + $0x198] ss:$48 sps:$4 sm:$0xff]  }
 0xe00   : > { %5859 = vmatpush1.bf16.msra.mxu1 %v11070_v48  ;;  %5945 = vmatpush1.bf16.msra.mxu0 %v11073_v44  ;;  %v11138_v48 = vld [vmem:[#allocation10 + $0x1f4] ss:$48 sps:$4 sm:$0xff]   ;;  %v11141_v44 = vld [vmem:[#allocation10 + $0x1fc] ss:$48 sps:$4 sm:$0xff]  }
 0xe01   : > { %5860 = vmatprep.subr.bf16.mxu1 %v11078_v60  ;;  %5946 = vmatprep.subr.bf16.mxu0 %v11081_v1  ;;  %v11136_v60 = vld [vmem:[#allocation10 + $0x1f0] ss:$48 sps:$4 sm:$0xff]   ;;  %v11139_v1 = vld [vmem:[#allocation10 + $0x1f8] ss:$48 sps:$4 sm:$0xff]  }
 0xe04   : > { %5861 = vmatpush1.bf16.msra.mxu1 %v11076_v3  ;;  %5947 = vmatpush1.bf16.msra.mxu0 %v11079_v4  ;;  %v11144_v3 = vld [vmem:[#allocation10 + $0x254] ss:$48 sps:$4 sm:$0xff]   ;;  %v11147_v4 = vld [vmem:[#allocation10 + $0x25c] ss:$48 sps:$4 sm:$0xff]  }
 0xe05   : > { %5862 = vmatprep.subr.bf16.mxu1 %v11084_v17  ;;  %5948 = vmatprep.subr.bf16.mxu0 %v11087_v5  ;;  %v11142_v17 = vld [vmem:[#allocation10 + $0x250] ss:$48 sps:$4 sm:$0xff]   ;;  %v11145_v5 = vld [vmem:[#allocation10 + $0x258] ss:$48 sps:$4 sm:$0xff]  }
 0xe08   : > { %5863 = vmatpush1.bf16.msra.mxu1 %v11082_v6  ;;  %5949 = vmatpush1.bf16.msra.mxu0 %v11085_v46  ;;  %v11150_v6 = vld [vmem:[#allocation10 + $0x2b4] ss:$48 sps:$4 sm:$0xff]   ;;  %v11153_v46 = vld [vmem:[#allocation10 + $0x2bc] ss:$48 sps:$4 sm:$0xff]  }
 0xe09   : > { %5864 = vmatprep.subr.bf16.mxu1 %v11090_v7  ;;  %5950 = vmatprep.subr.bf16.mxu0 %v11093_v8  ;;  %v11148_v7 = vld [vmem:[#allocation10 + $0x2b0] ss:$48 sps:$4 sm:$0xff]   ;;  %v11151_v8 = vld [vmem:[#allocation10 + $0x2b8] ss:$48 sps:$4 sm:$0xff]  }
 0xe0c   : > { %5865 = vmatpush1.bf16.msra.mxu1 %v11088_v9  ;;  %5951 = vmatpush1.bf16.msra.mxu0 %v11091_v43  ;;  %v11156_v9 = vld [vmem:[#allocation10 + $0x314] ss:$48 sps:$4 sm:$0xff]   ;;  %v11159_v43 = vld [vmem:[#allocation10 + $0x31c] ss:$48 sps:$4 sm:$0xff]  }
 0xe0d   : > { %5866 = vmatprep.subr.bf16.mxu1 %v11096_v12  ;;  %5952 = vmatprep.subr.bf16.mxu0 %v11099_v0  ;;  %v11154_v12 = vld [vmem:[#allocation10 + $0x310] ss:$48 sps:$4 sm:$0xff]   ;;  %v11157_v0 = vld [vmem:[#allocation10 + $0x318] ss:$48 sps:$4 sm:$0xff]  }
 0xe10   : > { %5867 = vmatpush1.bf16.msra.mxu1 %v11094_v20  ;;  %5953 = vmatpush1.bf16.msra.mxu0 %v11097_v22  ;;  %v11163_v20 = vld [vmem:[#allocation10 + $0x378] ss:$48 sps:$4 sm:$0xff]   ;;  %v11168_v22 = vld [vmem:[#allocation10 + $0x3d4] ss:$48 sps:$4 sm:$0xff]  }
 0xe11   : > { %5868 = vmatprep.subr.bf16.mxu1 %v11102_v62  ;;  %5954 = vmatprep.subr.bf16.mxu0 %v11105_v63  ;;  %v11171_v62 = vld [vmem:[#allocation10 + $0x3dc] ss:$48 sps:$4 sm:$0xff]   ;;  %v11166_v63 = vld [vmem:[#allocation10 + $0x3d0] ss:$48 sps:$4 sm:$0xff]  }
 0xe14   : > { %5869 = vmatpush1.bf16.msra.mxu1 %v11100_v16  ;;  %5955 = vmatpush1.bf16.msra.mxu0 %v11103_v34  ;;  %v11172_v16 = vld [vmem:[#allocation10 + $0x430] ss:$48 sps:$4 sm:$0xff]   ;;  %v11175_v34 = vld [vmem:[#allocation10 + $0x438] ss:$48 sps:$4 sm:$0xff]  }
 0xe15   : > { %5983 = vmatprep.subr.bf16.mxu1 %v11108_v32  ;;  %6069 = vmatprep.subr.bf16.mxu0 %v11111_v47  ;;  %v11183_v32 = vld [vmem:[#allocation10 + $0x49c] ss:$48 sps:$4 sm:$0xff]   ;;  %v11178_v47 = vld [vmem:[#allocation10 + $0x490] ss:$48 sps:$4 sm:$0xff]  }
 0xe17   : > { %5887 = vmatmul.mubr.bf16.vlgmr.msra.gmra.mrb[36].mxu1 %v13182_v52  ;;  %5973 = vmatmul.mubr.bf16.vlgmr.msra.gmra.mrb[52].mxu0 %v13182_v52 }
 0xe18   : > { %5984 = vmatpush1.bf16.msra.mxu1 %v11106_v35  ;;  %6015 = vmatprep.mubr.bf16.mxu1 %v13164_v55  ;;  %v11186_v35 = vld [vmem:[#allocation10 + $0x4f4] ss:$48 sps:$4 sm:$0xff]  }
 0xe19   : > { %6070 = vmatpush1.bf16.msra.mxu0 %v11109_v53  ;;  %6101 = vmatprep.mubr.bf16.mxu0 %v13164_v55  ;;  %v11189_v53 = vld [vmem:[#allocation10 + $0x4fc] ss:$48 sps:$4 sm:$0xff]  }
 0xe1a   : > { %5985 = vmatprep.subr.bf16.mxu1 %v11114_v45  ;;  %6071 = vmatprep.subr.bf16.mxu0 %v11117_v33  ;;  %v11184_v45 = vld [vmem:[#allocation10 + $0x4f0] ss:$48 sps:$4 sm:$0xff]   ;;  %v11187_v33 = vld [vmem:[#allocation10 + $0x4f8] ss:$48 sps:$4 sm:$0xff]  }
 0xe1c   : > { %5986 = vmatpush1.bf16.msra.mxu1 %v11112_v10  ;;  %v11192_v10 = vld [vmem:[#allocation10 + $0x554] ss:$48 sps:$4 sm:$0xff]  }
 0xe1d   : > { %6072 = vmatpush1.bf16.msra.mxu0 %v11115_v54  ;;  %5987 = vmatprep.subr.bf16.mxu1 %v11120_v29  ;;  %v11195_v54 = vld [vmem:[#allocation10 + $0x55c] ss:$48 sps:$4 sm:$0xff]   ;;  %v11190_v29 = vld [vmem:[#allocation10 + $0x550] ss:$48 sps:$4 sm:$0xff]  }
 0xe1e   : > { %6073 = vmatprep.subr.bf16.mxu0 %v11123_v49  ;;  %v11193_v49 = vld [vmem:[#allocation10 + $0x558] ss:$48 sps:$4 sm:$0xff]  }
 0xe20   : > { %5988 = vmatpush1.bf16.msra.mxu1 %v11118_v61  ;;  %v11198_v61 = vld [vmem:[#allocation10 + $0x5b4] ss:$48 sps:$4 sm:$0xff]  }
 0xe21   : > { %6074 = vmatpush1.bf16.msra.mxu0 %v11121_v25  ;;  %5989 = vmatprep.subr.bf16.mxu1 %v11126_v41  ;;  %v11201_v25 = vld [vmem:[#allocation10 + $0x5bc] ss:$48 sps:$4 sm:$0xff]   ;;  %v11196_v41 = vld [vmem:[#allocation10 + $0x5b0] ss:$48 sps:$4 sm:$0xff]  }
 0xe22   : > { %6075 = vmatprep.subr.bf16.mxu0 %v11129_v56  ;;  %v11199_v56 = vld [vmem:[#allocation10 + $0x5b8] ss:$48 sps:$4 sm:$0xff]  }
 0xe24   : > { %5990 = vmatpush1.bf16.msra.mxu1 %v11124_v57  ;;  %v11204_v57 = vld [vmem:[#allocation10 + $0x614] ss:$48 sps:$4 sm:$0xff]  }
 0xe25   : > { %6076 = vmatpush1.bf16.msra.mxu0 %v11127_v31  ;;  %5991 = vmatprep.subr.bf16.mxu1 %v11132_v40  ;;  %v11207_v31 = vld [vmem:[#allocation10 + $0x61c] ss:$48 sps:$4 sm:$0xff]   ;;  %v11202_v40 = vld [vmem:[#allocation10 + $0x610] ss:$48 sps:$4 sm:$0xff]  }
 0xe26   : > { %6077 = vmatprep.subr.bf16.mxu0 %v11135_v58  ;;  %v11205_v58 = vld [vmem:[#allocation10 + $0x618] ss:$48 sps:$4 sm:$0xff]  }
 0xe28   : > { %5992 = vmatpush1.bf16.msra.mxu1 %v11130_v59  ;;  %v11210_v59 = vld [vmem:[#allocation10 + $0x674] ss:$48 sps:$4 sm:$0xff]  }
 0xe29   : > { %6078 = vmatpush1.bf16.msra.mxu0 %v11133_v2  ;;  %5993 = vmatprep.subr.bf16.mxu1 %v11138_v48  ;;  %v11213_v2 = vld [vmem:[#allocation10 + $0x67c] ss:$48 sps:$4 sm:$0xff]   ;;  %v11208_v48 = vld [vmem:[#allocation10 + $0x670] ss:$48 sps:$4 sm:$0xff]  }
 0xe2a   : > { %6079 = vmatprep.subr.bf16.mxu0 %v11141_v44  ;;  %v11211_v44 = vld [vmem:[#allocation10 + $0x678] ss:$48 sps:$4 sm:$0xff]  }
 0xe2c   : > { %5994 = vmatpush1.bf16.msra.mxu1 %v11136_v60  ;;  %v11216_v60 = vld [vmem:[#allocation10 + $0x6d4] ss:$48 sps:$4 sm:$0xff]  }
 0xe2d   : > { %6080 = vmatpush1.bf16.msra.mxu0 %v11139_v1  ;;  %5995 = vmatprep.subr.bf16.mxu1 %v11144_v3  ;;  %v11219_v1 = vld [vmem:[#allocation10 + $0x6dc] ss:$48 sps:$4 sm:$0xff]   ;;  %v11214_v3 = vld [vmem:[#allocation10 + $0x6d0] ss:$48 sps:$4 sm:$0xff]  }
 0xe2e   : > { %6081 = vmatprep.subr.bf16.mxu0 %v11147_v4  ;;  %v11217_v4 = vld [vmem:[#allocation10 + $0x6d8] ss:$48 sps:$4 sm:$0xff]  }
 0xe30   : > { %5996 = vmatpush1.bf16.msra.mxu1 %v11142_v17  ;;  %v11222_v17 = vld [vmem:[#allocation10 + $0x734] ss:$48 sps:$4 sm:$0xff]  }
 0xe31   : > { %6082 = vmatpush1.bf16.msra.mxu0 %v11145_v5  ;;  %5997 = vmatprep.subr.bf16.mxu1 %v11150_v6  ;;  %v11225_v5 = vld [vmem:[#allocation10 + $0x73c] ss:$48 sps:$4 sm:$0xff]   ;;  %v11220_v6 = vld [vmem:[#allocation10 + $0x730] ss:$48 sps:$4 sm:$0xff]  }
 0xe32   : > { %6083 = vmatprep.subr.bf16.mxu0 %v11153_v46  ;;  %v11223_v46 = vld [vmem:[#allocation10 + $0x738] ss:$48 sps:$4 sm:$0xff]  }
 0xe34   : > { %5998 = vmatpush1.bf16.msra.mxu1 %v11148_v7  ;;  %v11228_v7 = vld [vmem:[#allocation10 + $0x794] ss:$48 sps:$4 sm:$0xff]  }
 0xe35   : > { %6084 = vmatpush1.bf16.msra.mxu0 %v11151_v8  ;;  %5999 = vmatprep.subr.bf16.mxu1 %v11156_v9  ;;  %v11231_v8 = vld [vmem:[#allocation10 + $0x79c] ss:$48 sps:$4 sm:$0xff]   ;;  %v11226_v9 = vld [vmem:[#allocation10 + $0x790] ss:$48 sps:$4 sm:$0xff]  }
 0xe36   : > { %6085 = vmatprep.subr.bf16.mxu0 %v11159_v43  ;;  %v11229_v43 = vld [vmem:[#allocation10 + $0x798] ss:$48 sps:$4 sm:$0xff]  }
 0xe38   : > { %6000 = vmatpush1.bf16.msra.mxu1 %v11154_v12  ;;  %v11234_v12 = vld [vmem:[#allocation10 + $0x7f4] ss:$48 sps:$4 sm:$0xff]  }
 0xe39   : > { %6086 = vmatpush1.bf16.msra.mxu0 %v11157_v0  ;;  %6001 = vmatprep.subr.bf16.mxu1 %v11162_v15  ;;  %v11237_v0 = vld [vmem:[#allocation10 + $0x7fc] ss:$48 sps:$4 sm:$0xff]   ;;  %v11232_v15 = vld [vmem:[#allocation10 + $0x7f0] ss:$48 sps:$4 sm:$0xff]  }
 0xe3a   : > { %6087 = vmatprep.subr.bf16.mxu0 %v11165_v18  ;;  %v11235_v18 = vld [vmem:[#allocation10 + $0x7f8] ss:$48 sps:$4 sm:$0xff]  }
 0xe3c   : > { %6002 = vmatpush1.bf16.msra.mxu1 %v11160_v19  ;;  %v11240_v19 = vld [vmem:[#allocation10 + $0x854] ss:$48 sps:$4 sm:$0xff]  }
 0xe3d   : > { %6088 = vmatpush1.bf16.msra.mxu0 %v11163_v20  ;;  %6003 = vmatprep.subr.bf16.mxu1 %v11168_v22  ;;  %v11243_v20 = vld [vmem:[#allocation10 + $0x85c] ss:$48 sps:$4 sm:$0xff]   ;;  %v11238_v22 = vld [vmem:[#allocation10 + $0x850] ss:$48 sps:$4 sm:$0xff]  }
 0xe3e   : > { %6089 = vmatprep.subr.bf16.mxu0 %v11171_v62  ;;  %v11241_v62 = vld [vmem:[#allocation10 + $0x858] ss:$48 sps:$4 sm:$0xff]  }
 0xe40   : > { %6004 = vmatpush1.bf16.msra.mxu1 %v11166_v63  ;;  %v11246_v63 = vld [vmem:[#allocation10 + $0x8b4] ss:$48 sps:$4 sm:$0xff]  }
 0xe41   : > { %6090 = vmatpush1.bf16.msra.mxu0 %v11169_v36  ;;  %6005 = vmatprep.subr.bf16.mxu1 %v11174_v37  ;;  %v11249_v36 = vld [vmem:[#allocation10 + $0x8bc] ss:$48 sps:$4 sm:$0xff]   ;;  %v11244_v37 = vld [vmem:[#allocation10 + $0x8b0] ss:$48 sps:$4 sm:$0xff]  }
 0xe42   : > { %6091 = vmatprep.subr.bf16.mxu0 %v11177_v14  ;;  %v11247_v14 = vld [vmem:[#allocation10 + $0x8b8] ss:$48 sps:$4 sm:$0xff]  }
 0xe44   : > { %6006 = vmatpush1.bf16.msra.mxu1 %v11172_v16  ;;  %v11252_v16 = vld [vmem:[#allocation10 + $0x24] ss:$48 sps:$4 sm:$0xff]  }
 0xe45   : > { %6092 = vmatpush1.bf16.msra.mxu0 %v11175_v34  ;;  %6007 = vmatprep.subr.bf16.mxu1 %v11180_v23  ;;  %v11255_v34 = vld [vmem:[#allocation10 + $0x2c] ss:$48 sps:$4 sm:$0xff]   ;;  %v11250_v23 = vld [vmem:[#allocation10 + $0x20] ss:$48 sps:$4 sm:$0xff]  }
 0xe46   : > { %6093 = vmatprep.subr.bf16.mxu0 %v11183_v32  ;;  %v11253_v32 = vld [vmem:[#allocation10 + $0x28] ss:$48 sps:$4 sm:$0xff]  }
 0xe48   : > { %6008 = vmatpush1.bf16.msra.mxu1 %v11178_v47  ;;  %v11258_v47 = vld [vmem:[#allocation10 + $0x84] ss:$48 sps:$4 sm:$0xff]  }
 0xe49   : > { %6094 = vmatpush1.bf16.msra.mxu0 %v11181_v51  ;;  %6009 = vmatprep.subr.bf16.mxu1 %v11186_v35  ;;  %v11261_v51 = vld [vmem:[#allocation10 + $0x8c] ss:$48 sps:$4 sm:$0xff]   ;;  %v11256_v35 = vld [vmem:[#allocation10 + $0x80] ss:$48 sps:$4 sm:$0xff]  }
 0xe4a   : > { %6095 = vmatprep.subr.bf16.mxu0 %v11189_v53  ;;  %v11259_v53 = vld [vmem:[#allocation10 + $0x88] ss:$48 sps:$4 sm:$0xff]  }
 0xe4c   : > { %6010 = vmatpush1.bf16.msra.mxu1 %v11184_v45  ;;  %v11264_v45 = vld [vmem:[#allocation10 + $0xe4] ss:$48 sps:$4 sm:$0xff]  }
 0xe4d   : > { %6096 = vmatpush1.bf16.msra.mxu0 %v11187_v33  ;;  %6011 = vmatprep.subr.bf16.mxu1 %v11192_v10  ;;  %v11267_v33 = vld [vmem:[#allocation10 + $0xec] ss:$48 sps:$4 sm:$0xff]   ;;  %v11262_v10 = vld [vmem:[#allocation10 + $0xe0] ss:$48 sps:$4 sm:$0xff]  }
 0xe4e   : > { %6097 = vmatprep.subr.bf16.mxu0 %v11195_v54  ;;  %v11265_v54 = vld [vmem:[#allocation10 + $0xe8] ss:$48 sps:$4 sm:$0xff]  }
 0xe50   : > { %6012 = vmatpush1.bf16.msra.mxu1 %v11190_v29  ;;  %v11270_v29 = vld [vmem:[#allocation10 + $0x144] ss:$48 sps:$4 sm:$0xff]  }
 0xe51   : > { %6098 = vmatpush1.bf16.msra.mxu0 %v11193_v49  ;;  %6013 = vmatprep.subr.bf16.mxu1 %v11198_v61  ;;  %v11273_v49 = vld [vmem:[#allocation10 + $0x14c] ss:$48 sps:$4 sm:$0xff]   ;;  %v11268_v61 = vld [vmem:[#allocation10 + $0x140] ss:$48 sps:$4 sm:$0xff]  }
 0xe52   : > { %6099 = vmatprep.subr.bf16.mxu0 %v11201_v25  ;;  %v11271_v25 = vld [vmem:[#allocation10 + $0x148] ss:$48 sps:$4 sm:$0xff]  }
 0xe54   : > { %6014 = vmatpush1.bf16.msra.mxu1 %v11196_v41  ;;  %v11276_v41 = vld [vmem:[#allocation10 + $0x1a4] ss:$48 sps:$4 sm:$0xff]  }
 0xe55   : > { %6100 = vmatpush1.bf16.msra.mxu0 %v11199_v56  ;;  %6026 = vmatprep.subr.bf16.mxu1 %v11204_v57  ;;  %v11279_v56 = vld [vmem:[#allocation10 + $0x1ac] ss:$48 sps:$4 sm:$0xff]   ;;  %v11277_v57 = vld [vmem:[#allocation10 + $0x1a8] ss:$48 sps:$4 sm:$0xff]  }
 0xe56   : > { %6112 = vmatprep.subr.bf16.mxu0 %v11207_v31  ;;  %v11282_v31 = vld [vmem:[#allocation10 + $0x204] ss:$48 sps:$4 sm:$0xff]  }
 0xe57   : > { %6016 = vmatmul.mubr.bf16.vlgmr.msra.gmra.mrb[40].mxu1 %v13166_v50 }
 0xe58   : > { %6102 = vmatmul.mubr.bf16.vlgmr.msra.gmra.mrb[56].mxu0 %v13166_v50  ;;  %6027 = vmatpush1.bf16.msra.mxu1 %v11202_v40  ;;  %v11285_v40 = vld [vmem:[#allocation10 + $0x20c] ss:$48 sps:$4 sm:$0xff]  }
 0xe59   : > { %6113 = vmatpush1.bf16.msra.mxu0 %v11205_v58  ;;  %6028 = vmatprep.subr.bf16.mxu1 %v11210_v59  ;;  %v11280_v58 = vld [vmem:[#allocation10 + $0x200] ss:$48 sps:$4 sm:$0xff]   ;;  %v11283_v59 = vld [vmem:[#allocation10 + $0x208] ss:$48 sps:$4 sm:$0xff]  }
 0xe5a   : > { %6114 = vmatprep.subr.bf16.mxu0 %v11213_v2  ;;  %6058 = vmatprep.mubr.bf16.mxu1 %v12321_v11  ;;  %v11288_v2 = vld [vmem:[#allocation10 + $0x264] ss:$48 sps:$4 sm:$0xff]  }
 0xe5b   : > { %6144 = vmatprep.mubr.bf16.mxu0 %v12321_v11 }
 0xe5c   : > { %6029 = vmatpush1.bf16.msra.mxu1 %v11208_v48  ;;  %v11291_v48 = vld [vmem:[#allocation10 + $0x26c] ss:$48 sps:$4 sm:$0xff]  }
 0xe5d   : > { %6115 = vmatpush1.bf16.msra.mxu0 %v11211_v44  ;;  %6030 = vmatprep.subr.bf16.mxu1 %v11216_v60  ;;  %v11286_v44 = vld [vmem:[#allocation10 + $0x260] ss:$48 sps:$4 sm:$0xff]   ;;  %v11289_v60 = vld [vmem:[#allocation10 + $0x268] ss:$48 sps:$4 sm:$0xff]  }
 0xe5e   : > { %6116 = vmatprep.subr.bf16.mxu0 %v11219_v1  ;;  %v11294_v1 = vld [vmem:[#allocation10 + $0x2c4] ss:$48 sps:$4 sm:$0xff]  }
 0xe60   : > { %6031 = vmatpush1.bf16.msra.mxu1 %v11214_v3  ;;  %v11297_v3 = vld [vmem:[#allocation10 + $0x2cc] ss:$48 sps:$4 sm:$0xff]  }
 0xe61   : > { %6117 = vmatpush1.bf16.msra.mxu0 %v11217_v4  ;;  %6032 = vmatprep.subr.bf16.mxu1 %v11222_v17  ;;  %v11292_v4 = vld [vmem:[#allocation10 + $0x2c0] ss:$48 sps:$4 sm:$0xff]   ;;  %v11295_v17 = vld [vmem:[#allocation10 + $0x2c8] ss:$48 sps:$4 sm:$0xff]  }
 0xe62   : > { %6118 = vmatprep.subr.bf16.mxu0 %v11225_v5  ;;  %v11300_v5 = vld [vmem:[#allocation10 + $0x324] ss:$48 sps:$4 sm:$0xff]  }
 0xe64   : > { %6033 = vmatpush1.bf16.msra.mxu1 %v11220_v6  ;;  %v11303_v6 = vld [vmem:[#allocation10 + $0x32c] ss:$48 sps:$4 sm:$0xff]  }
 0xe65   : > { %6119 = vmatpush1.bf16.msra.mxu0 %v11223_v46  ;;  %6034 = vmatprep.subr.bf16.mxu1 %v11228_v7  ;;  %v11298_v46 = vld [vmem:[#allocation10 + $0x320] ss:$48 sps:$4 sm:$0xff]   ;;  %v11301_v7 = vld [vmem:[#allocation10 + $0x328] ss:$48 sps:$4 sm:$0xff]  }
 0xe66   : > { %6120 = vmatprep.subr.bf16.mxu0 %v11231_v8  ;;  %v11306_v8 = vld [vmem:[#allocation10 + $0x384] ss:$48 sps:$4 sm:$0xff]  }
 0xe68   : > { %6035 = vmatpush1.bf16.msra.mxu1 %v11226_v9  ;;  %v11309_v9 = vld [vmem:[#allocation10 + $0x38c] ss:$48 sps:$4 sm:$0xff]  }
 0xe69   : > { %6121 = vmatpush1.bf16.msra.mxu0 %v11229_v43  ;;  %6036 = vmatprep.subr.bf16.mxu1 %v11234_v12  ;;  %v11304_v43 = vld [vmem:[#allocation10 + $0x380] ss:$48 sps:$4 sm:$0xff]   ;;  %v11307_v12 = vld [vmem:[#allocation10 + $0x388] ss:$48 sps:$4 sm:$0xff]  }
 0xe6a   : > { %6122 = vmatprep.subr.bf16.mxu0 %v11237_v0  ;;  %v11312_v0 = vld [vmem:[#allocation10 + $0x3e4] ss:$48 sps:$4 sm:$0xff]  }
 0xe6c   : > { %6037 = vmatpush1.bf16.msra.mxu1 %v11232_v15  ;;  %v11315_v15 = vld [vmem:[#allocation10 + $0x3ec] ss:$48 sps:$4 sm:$0xff]  }
 0xe6d   : > { %6123 = vmatpush1.bf16.msra.mxu0 %v11235_v18  ;;  %6038 = vmatprep.subr.bf16.mxu1 %v11240_v19  ;;  %v11310_v18 = vld [vmem:[#allocation10 + $0x3e0] ss:$48 sps:$4 sm:$0xff]   ;;  %v11313_v19 = vld [vmem:[#allocation10 + $0x3e8] ss:$48 sps:$4 sm:$0xff]  }
 0xe6e   : > { %6124 = vmatprep.subr.bf16.mxu0 %v11243_v20  ;;  %v11318_v20 = vld [vmem:[#allocation10 + $0x444] ss:$48 sps:$4 sm:$0xff]  }
 0xe70   : > { %6039 = vmatpush1.bf16.msra.mxu1 %v11238_v22  ;;  %v11321_v22 = vld [vmem:[#allocation10 + $0x44c] ss:$48 sps:$4 sm:$0xff]  }
 0xe71   : > { %6125 = vmatpush1.bf16.msra.mxu0 %v11241_v62  ;;  %6040 = vmatprep.subr.bf16.mxu1 %v11246_v63  ;;  %v11316_v62 = vld [vmem:[#allocation10 + $0x440] ss:$48 sps:$4 sm:$0xff]   ;;  %v11319_v63 = vld [vmem:[#allocation10 + $0x448] ss:$48 sps:$4 sm:$0xff]  }
 0xe72   : > { %6126 = vmatprep.subr.bf16.mxu0 %v11249_v36  ;;  %v11324_v36 = vld [vmem:[#allocation10 + $0x4a4] ss:$48 sps:$4 sm:$0xff]  }
 0xe74   : > { %6041 = vmatpush1.bf16.msra.mxu1 %v11244_v37  ;;  %v11327_v37 = vld [vmem:[#allocation10 + $0x4ac] ss:$48 sps:$4 sm:$0xff]  }
 0xe75   : > { %6127 = vmatpush1.bf16.msra.mxu0 %v11247_v14  ;;  %6155 = vmatprep.subr.bf16.mxu1 %v11252_v16  ;;  %v11322_v14 = vld [vmem:[#allocation10 + $0x4a0] ss:$48 sps:$4 sm:$0xff]   ;;  %v11325_v16 = vld [vmem:[#allocation10 + $0x4a8] ss:$48 sps:$4 sm:$0xff]  }
 0xe76   : > { %6241 = vmatprep.subr.bf16.mxu0 %v11255_v34  ;;  %v11330_v34 = vld [vmem:[#allocation10 + $0x504] ss:$48 sps:$4 sm:$0xff]  }
 0xe77   : > { %6059 = vmatmul.mubr.bf16.vlgmr.msra.gmra.mrb[40].mxu1 %v13182_v52 }
 0xe78   : > { %6145 = vmatmul.mubr.bf16.vlgmr.msra.gmra.mrb[56].mxu0 %v13182_v52  ;;  %6156 = vmatpush1.bf16.msra.mxu1 %v11250_v23  ;;  %v11333_v23 = vld [vmem:[#allocation10 + $0x50c] ss:$48 sps:$4 sm:$0xff]  }
 0xe79   : > { %6187 = vmatprep.mubr.bf16.mxu1 %v13164_v55  ;;  %6242 = vmatpush1.bf16.msra.mxu0 %v11253_v32  ;;  %v11328_v32 = vld [vmem:[#allocation10 + $0x500] ss:$48 sps:$4 sm:$0xff]  }
 0xe7a   : > { %6273 = vmatprep.mubr.bf16.mxu0 %v13164_v55  ;;  %6157 = vmatprep.subr.bf16.mxu1 %v11258_v47  ;;  %v11274_v55 = vld [vmem:[#allocation10 + $0x1a0] ss:$48 sps:$4 sm:$0xff]   ;;  %v11331_v47 = vld [vmem:[#allocation10 + $0x508] ss:$48 sps:$4 sm:$0xff]  }
 0xe7b   : > { %6243 = vmatprep.subr.bf16.mxu0 %v11261_v51  ;;  %v11336_v51 = vld [vmem:[#allocation10 + $0x564] ss:$48 sps:$4 sm:$0xff]  }
 0xe7c   : > { %6158 = vmatpush1.bf16.msra.mxu1 %v11256_v35  ;;  %v11339_v35 = vld [vmem:[#allocation10 + $0x56c] ss:$48 sps:$4 sm:$0xff]  }
 0xe7d   : > { %6244 = vmatpush1.bf16.msra.mxu0 %v11259_v53  ;;  %6159 = vmatprep.subr.bf16.mxu1 %v11264_v45  ;;  %v11334_v53 = vld [vmem:[#allocation10 + $0x560] ss:$48 sps:$4 sm:$0xff]   ;;  %v11337_v45 = vld [vmem:[#allocation10 + $0x568] ss:$48 sps:$4 sm:$0xff]  }
 0xe7e   : > { %6245 = vmatprep.subr.bf16.mxu0 %v11267_v33  ;;  %v11342_v33 = vld [vmem:[#allocation10 + $0x5c4] ss:$48 sps:$4 sm:$0xff]  }
 0xe80   : > { %6160 = vmatpush1.bf16.msra.mxu1 %v11262_v10  ;;  %v11345_v10 = vld [vmem:[#allocation10 + $0x5cc] ss:$48 sps:$4 sm:$0xff]  }
 0xe81   : > { %6246 = vmatpush1.bf16.msra.mxu0 %v11265_v54  ;;  %6161 = vmatprep.subr.bf16.mxu1 %v11270_v29  ;;  %v11340_v54 = vld [vmem:[#allocation10 + $0x5c0] ss:$48 sps:$4 sm:$0xff]   ;;  %v11343_v29 = vld [vmem:[#allocation10 + $0x5c8] ss:$48 sps:$4 sm:$0xff]  }
 0xe82   : > { %6247 = vmatprep.subr.bf16.mxu0 %v11273_v49  ;;  %v11348_v49 = vld [vmem:[#allocation10 + $0x624] ss:$48 sps:$4 sm:$0xff]  }
 0xe84   : > { %6162 = vmatpush1.bf16.msra.mxu1 %v11268_v61  ;;  %v11351_v61 = vld [vmem:[#allocation10 + $0x62c] ss:$48 sps:$4 sm:$0xff]  }
 0xe85   : > { %6248 = vmatpush1.bf16.msra.mxu0 %v11271_v25  ;;  %6163 = vmatprep.subr.bf16.mxu1 %v11276_v41  ;;  %v11346_v25 = vld [vmem:[#allocation10 + $0x620] ss:$48 sps:$4 sm:$0xff]   ;;  %v11349_v41 = vld [vmem:[#allocation10 + $0x628] ss:$48 sps:$4 sm:$0xff]  }
 0xe86   : > { %6249 = vmatprep.subr.bf16.mxu0 %v11279_v56  ;;  %v11354_v56 = vld [vmem:[#allocation10 + $0x684] ss:$48 sps:$4 sm:$0xff]  }
 0xe88   : > { %6164 = vmatpush1.bf16.msra.mxu1 %v11274_v55  ;;  %v11357_v55 = vld [vmem:[#allocation10 + $0x68c] ss:$48 sps:$4 sm:$0xff]  }
 0xe89   : > { %6250 = vmatpush1.bf16.msra.mxu0 %v11277_v57  ;;  %6165 = vmatprep.subr.bf16.mxu1 %v11282_v31  ;;  %v11352_v57 = vld [vmem:[#allocation10 + $0x680] ss:$48 sps:$4 sm:$0xff]   ;;  %v11355_v31 = vld [vmem:[#allocation10 + $0x688] ss:$48 sps:$4 sm:$0xff]  }
 0xe8a   : > { %6251 = vmatprep.subr.bf16.mxu0 %v11285_v40  ;;  %v11360_v40 = vld [vmem:[#allocation10 + $0x6e4] ss:$48 sps:$4 sm:$0xff]  }
 0xe8c   : > { %6166 = vmatpush1.bf16.msra.mxu1 %v11280_v58  ;;  %v11363_v58 = vld [vmem:[#allocation10 + $0x6ec] ss:$48 sps:$4 sm:$0xff]  }
 0xe8d   : > { %6252 = vmatpush1.bf16.msra.mxu0 %v11283_v59  ;;  %6167 = vmatprep.subr.bf16.mxu1 %v11288_v2  ;;  %v11358_v59 = vld [vmem:[#allocation10 + $0x6e0] ss:$48 sps:$4 sm:$0xff]   ;;  %v11361_v2 = vld [vmem:[#allocation10 + $0x6e8] ss:$48 sps:$4 sm:$0xff]  }
 0xe8e   : > { %6253 = vmatprep.subr.bf16.mxu0 %v11291_v48  ;;  %v11366_v48 = vld [vmem:[#allocation10 + $0x744] ss:$48 sps:$4 sm:$0xff]  }
 0xe90   : > { %6168 = vmatpush1.bf16.msra.mxu1 %v11286_v44  ;;  %v11364_v44 = vld [vmem:[#allocation10 + $0x740] ss:$48 sps:$4 sm:$0xff]  }
 0xe91   : > { %6254 = vmatpush1.bf16.msra.mxu0 %v11289_v60  ;;  %6169 = vmatprep.subr.bf16.mxu1 %v11294_v1  ;;  %v11367_v60 = vld [vmem:[#allocation10 + $0x748] ss:$48 sps:$4 sm:$0xff]   ;;  %v11372_v1 = vld [vmem:[#allocation10 + $0x7a4] ss:$48 sps:$4 sm:$0xff]  }
 0xe92   : > { %6255 = vmatprep.subr.bf16.mxu0 %v11297_v3  ;;  %v11375_v3 = vld [vmem:[#allocation10 + $0x7ac] ss:$48 sps:$4 sm:$0xff]  }
 0xe94   : > { %6170 = vmatpush1.bf16.msra.mxu1 %v11292_v4  ;;  %v11370_v4 = vld [vmem:[#allocation10 + $0x7a0] ss:$48 sps:$4 sm:$0xff]  }
 0xe95   : > { %6256 = vmatpush1.bf16.msra.mxu0 %v11295_v17  ;;  %6171 = vmatprep.subr.bf16.mxu1 %v11300_v5  ;;  %v11378_v17 = vld [vmem:[#allocation10 + $0x804] ss:$48 sps:$4 sm:$0xff]   ;;  %v11381_v5 = vld [vmem:[#allocation10 + $0x80c] ss:$48 sps:$4 sm:$0xff]  }
 0xe96   : > { %6257 = vmatprep.subr.bf16.mxu0 %v11303_v6  ;;  %v11376_v6 = vld [vmem:[#allocation10 + $0x800] ss:$48 sps:$4 sm:$0xff]  }
 0xe98   : > { %6172 = vmatpush1.bf16.msra.mxu1 %v11298_v46  ;;  %v11379_v46 = vld [vmem:[#allocation10 + $0x808] ss:$48 sps:$4 sm:$0xff]  }
 0xe99   : > { %6258 = vmatpush1.bf16.msra.mxu0 %v11301_v7  ;;  %6173 = vmatprep.subr.bf16.mxu1 %v11306_v8  ;;  %v11384_v7 = vld [vmem:[#allocation10 + $0x864] ss:$48 sps:$4 sm:$0xff]   ;;  %v11387_v8 = vld [vmem:[#allocation10 + $0x86c] ss:$48 sps:$4 sm:$0xff]  }
 0xe9a   : > { %6259 = vmatprep.subr.bf16.mxu0 %v11309_v9  ;;  %v11382_v9 = vld [vmem:[#allocation10 + $0x860] ss:$48 sps:$4 sm:$0xff]  }
 0xe9c   : > { %6174 = vmatpush1.bf16.msra.mxu1 %v11304_v43  ;;  %v11385_v43 = vld [vmem:[#allocation10 + $0x868] ss:$48 sps:$4 sm:$0xff]  }
 0xe9d   : > { %6260 = vmatpush1.bf16.msra.mxu0 %v11307_v12  ;;  %6175 = vmatprep.subr.bf16.mxu1 %v11312_v0  ;;  %v11390_v12 = vld [vmem:[#allocation10 + $0x8c4] ss:$48 sps:$4 sm:$0xff]   ;;  %v11393_v0 = vld [vmem:[#allocation10 + $0x8cc] ss:$48 sps:$4 sm:$0xff]  }
 0xe9e   : > { %6261 = vmatprep.subr.bf16.mxu0 %v11315_v15  ;;  %v11388_v15 = vld [vmem:[#allocation10 + $0x8c0] ss:$48 sps:$4 sm:$0xff]  }
 0xea0   : > { %6176 = vmatpush1.bf16.msra.mxu1 %v11310_v18  ;;  %v11391_v18 = vld [vmem:[#allocation10 + $0x8c8] ss:$48 sps:$4 sm:$0xff]  }
 0xea1   : > { %6262 = vmatpush1.bf16.msra.mxu0 %v11313_v19  ;;  %6177 = vmatprep.subr.bf16.mxu1 %v11318_v20  ;;  %v11396_v19 = vld [vmem:[#allocation13 + $0x4] ss:$12 sps:$4 sm:$0xff]   ;;  %v11397_v20 = vld [vmem:[#allocation13 + $0xc8] ss:$12 sps:$4 sm:$0xff]  }
 0xea2   : > { %6263 = vmatprep.subr.bf16.mxu0 %v11321_v22  ;;  %v11394_v22 = vld [vmem:[#allocation13] ss:$12 sps:$4 sm:$0xff]  }
 0xea4   : > { %6178 = vmatpush1.bf16.msra.mxu1 %v11316_v62  ;;  %v11398_v62 = vld [vmem:[#allocation13 + $0x8] ss:$12 sps:$4 sm:$0xff]  }
 0xea5   : > { %6264 = vmatpush1.bf16.msra.mxu0 %v11319_v63  ;;  %6179 = vmatprep.subr.bf16.mxu1 %v11324_v36  ;;  %v11401_v63 = vld [vmem:[#allocation13 + $0x1c] ss:$12 sps:$4 sm:$0xff]   ;;  %v11402_v36 = vld [vmem:[#allocation13 + $0xe0] ss:$12 sps:$4 sm:$0xff]  }
 0xea6   : > { %6265 = vmatprep.subr.bf16.mxu0 %v11327_v37  ;;  %v11399_v37 = vld [vmem:[#allocation13 + $0x18] ss:$12 sps:$4 sm:$0xff]  }
 0xea8   : > { %6180 = vmatpush1.bf16.msra.mxu1 %v11322_v14  ;;  %v11403_v14 = vld [vmem:[#allocation13 + $0x20] ss:$12 sps:$4 sm:$0xff]  }
 0xea9   : > { %6266 = vmatpush1.bf16.msra.mxu0 %v11325_v16  ;;  %6181 = vmatprep.subr.bf16.mxu1 %v11330_v34  ;;  %v11406_v16 = vld [vmem:[#allocation13 + $0x34] ss:$12 sps:$4 sm:$0xff]   ;;  %v11407_v34 = vld [vmem:[#allocation13 + $0xf8] ss:$12 sps:$4 sm:$0xff]  }
 0xeaa   : > { %6267 = vmatprep.subr.bf16.mxu0 %v11333_v23  ;;  %v11404_v23 = vld [vmem:[#allocation13 + $0x30] ss:$12 sps:$4 sm:$0xff]  }
 0xeac   : > { %6182 = vmatpush1.bf16.msra.mxu1 %v11328_v32  ;;  %v11408_v32 = vld [vmem:[#allocation13 + $0x38] ss:$12 sps:$4 sm:$0xff]  }
 0xead   : > { %6268 = vmatpush1.bf16.msra.mxu0 %v11331_v47  ;;  %6183 = vmatprep.subr.bf16.mxu1 %v11336_v51  ;;  %v11411_v47 = vld [vmem:[#allocation13 + $0x4c] ss:$12 sps:$4 sm:$0xff]   ;;  %v11412_v51 = vld [vmem:[#allocation13 + $0x110] ss:$12 sps:$4 sm:$0xff]  }
 0xeae   : > { %6269 = vmatprep.subr.bf16.mxu0 %v11339_v35  ;;  %v11409_v35 = vld [vmem:[#allocation13 + $0x48] ss:$12 sps:$4 sm:$0xff]  }
 0xeb0   : > { %6184 = vmatpush1.bf16.msra.mxu1 %v11334_v53  ;;  %v11416_v53 = vld [vmem:[#allocation13 + $0x64] ss:$12 sps:$4 sm:$0xff]  }
 0xeb1   : > { %6270 = vmatpush1.bf16.msra.mxu0 %v11337_v45  ;;  %6185 = vmatprep.subr.bf16.mxu1 %v11342_v33  ;;  %v11417_v45 = vld [vmem:[#allocation13 + $0x128] ss:$12 sps:$4 sm:$0xff]   ;;  %v11414_v33 = vld [vmem:[#allocation13 + $0x60] ss:$12 sps:$4 sm:$0xff]  }
 0xeb2   : > { %6271 = vmatprep.subr.bf16.mxu0 %v11345_v10  ;;  %v13202_v10 = vld [vmem:[#allocation11] sm:$0xff] }
 0xeb4   : > { %6186 = vmatpush1.bf16.msra.mxu1 %v11340_v54  ;;  %v4325_v54 = vsub.s32 3, %v12856_v24 }
 0xeb5   : > { %6272 = vmatpush1.bf16.msra.mxu0 %v11343_v29  ;;  %6198 = vmatprep.subr.bf16.mxu1 %v11348_v49  ;;  %v11418_v29 = vld [vmem:[#allocation13 + $0x68] ss:$12 sps:$4 sm:$0xff]  }
 0xeb6   : > { %6284 = vmatprep.subr.bf16.mxu0 %v11351_v61  ;;  %v11421_v49 = vld [vmem:[#allocation13 + $0x7c] ss:$12 sps:$4 sm:$0xff]   ;;  %v11422_v61 = vld [vmem:[#allocation13 + $0x140] ss:$12 sps:$4 sm:$0xff]  }
 0xeb7   : > { %6188 = vmatmul.mubr.bf16.vlgmr.msra.gmra.mrb[44].mxu1 %v13166_v50 }
 0xeb8   : > { %6274 = vmatmul.mubr.bf16.vlgmr.msra.gmra.mrb[60].mxu0 %v13166_v50  ;;  %6199 = vmatpush1.bf16.msra.mxu1 %v11346_v25  ;;  %v11369_v50 = vld [vmem:[#allocation10 + $0x74c] ss:$48 sps:$4 sm:$0xff]   ;;  %v4314_v25 = vrot.slane %v13202_v10, %v12865_v28 }
 0xeb9   : > { %6285 = vmatpush1.bf16.msra.mxu0 %v11349_v41  ;;  %6200 = vmatprep.subr.bf16.mxu1 %v11354_v56  ;;  %v4322_v41 = vrot.slane %v13202_v10, %v12862_v27  ;;  %v4318_v56 = vrot.slane %v13202_v10, %v12859_v26 }
 0xeba   : > { %6286 = vmatprep.subr.bf16.mxu0 %v11357_v55  ;;  %6230 = vmatprep.mubr.bf16.mxu1 %v12321_v11  ;;  %v4326_v55 = vrot.slane %v13202_v10, %v4325_v54 }
 0xebb   : > { %6316 = vmatprep.mubr.bf16.mxu0 %v12321_v11  ;;  %v11373_v11 = vld [vmem:[#allocation10 + $0x7a8] ss:$48 sps:$4 sm:$0xff]  }
 0xebc   : > { %6201 = vmatpush1.bf16.msra.mxu1 %v11352_v57  ;;  %v11419_v57 = vld [vmem:[#allocation13 + $0x78] ss:$12 sps:$4 sm:$0xff]  }
 0xebd   : > { %6287 = vmatpush1.bf16.msra.mxu0 %v11355_v31  ;;  %6202 = vmatprep.subr.bf16.mxu1 %v11360_v40  ;;  %v11423_v31 = vld [vmem:[#allocation13 + $0x80] ss:$12 sps:$4 sm:$0xff]  }
 0xebe   : > { %6288 = vmatprep.subr.bf16.mxu0 %v11363_v58  ;;  %v11426_v40 = vld [vmem:[#allocation13 + $0x94] ss:$12 sps:$4 sm:$0xff]  }
 0xec0   : > { %6203 = vmatpush1.bf16.msra.mxu1 %v11358_v59 }
 0xec1   : > { %6289 = vmatpush1.bf16.msra.mxu0 %v11361_v2  ;;  %6204 = vmatprep.subr.bf16.mxu1 %v11366_v48  ;;  %v11427_v2 = vld [vmem:[#allocation13 + $0x158] ss:$12 sps:$4 sm:$0xff]  }
 0xec2   : > { %6290 = vmatprep.subr.bf16.mxu0 %v11369_v50 }
 0xec4   : > { %6205 = vmatpush1.bf16.msra.mxu1 %v11364_v44 }
 0xec5   : > { %6291 = vmatpush1.bf16.msra.mxu0 %v11367_v60  ;;  %6206 = vmatprep.subr.bf16.mxu1 %v11372_v1 }
 0xec6   : > { %6292 = vmatprep.subr.bf16.mxu0 %v11375_v3 }
 0xec8   : > { %6207 = vmatpush1.bf16.msra.mxu1 %v11370_v4 }
 0xec9   : > { %6293 = vmatpush1.bf16.msra.mxu0 %v11373_v11  ;;  %6208 = vmatprep.subr.bf16.mxu1 %v11378_v17  ;;  %v11424_v17 = vld [vmem:[#allocation13 + $0x90] ss:$12 sps:$4 sm:$0xff]  }
 0xeca   : > { %6294 = vmatprep.subr.bf16.mxu0 %v11381_v5 }
 0xecc   : > { %6209 = vmatpush1.bf16.msra.mxu1 %v11376_v6 }
 0xecd   : > { %6295 = vmatpush1.bf16.msra.mxu0 %v11379_v46  ;;  %6210 = vmatprep.subr.bf16.mxu1 %v11384_v7 }
 0xece   : > { %6296 = vmatprep.subr.bf16.mxu0 %v11387_v8  ;;  %v11428_v8 = vld [vmem:[#allocation13 + $0x98] ss:$12 sps:$4 sm:$0xff]  }
 0xed0   : > { %6211 = vmatpush1.bf16.msra.mxu1 %v11382_v9  ;;  %v11431_v9 = vld [vmem:[#allocation13 + $0xac] ss:$12 sps:$4 sm:$0xff]  }
 0xed1   : > { %6297 = vmatpush1.bf16.msra.mxu0 %v11385_v43  ;;  %6212 = vmatprep.subr.bf16.mxu1 %v11390_v12 }
 0xed2   : > { %6298 = vmatprep.subr.bf16.mxu0 %v11393_v0  ;;  %v11432_v0 = vld [vmem:[#allocation13 + $0x170] ss:$12 sps:$4 sm:$0xff]  }
 0xed4   : > { %6213 = vmatpush1.bf16.msra.mxu1 %v11388_v15 }
 0xed5   : > { %6299 = vmatpush1.bf16.msra.mxu0 %v11391_v18  ;;  %8300 = vmatprep.subr.bf16.mxu1 %v11396_v19 }
 0xed6   : > { %10016 = vmatprep.subr.bf16.mxu0 %v11397_v20 }
 0xed7   : > { %6231 = vmatmul.mubr.bf16.vlgmr.msra.gmra.mrb[44].mxu1 %v13182_v52 }
 0xed8   : > { %6317 = vmatmul.mubr.bf16.vlgmr.msra.gmra.mrb[60].mxu0 %v13182_v52  ;;  %8301 = vmatpush1.bf16.msra.mxu1 %v11394_v22  ;;  %v11413_v52 = vld [vmem:[#allocation13 + $0x50] ss:$12 sps:$4 sm:$0xff]  }
 0xed9   : > { %10017 = vmatpush3.bf16.msra.mxu0 %v11398_v62  ;;  %8302 = vmatprep.subr.bf16.mxu1 %v11401_v63 }
 0xeda   : > { %10018 = vmatprep.subr.bf16.mxu0 %v11402_v36 }
 0xedc   : > { %8303 = vmatpush1.bf16.msra.mxu1 %v11399_v37  ;;  %v11429_v37 = vld [vmem:[#allocation13 + $0xa8] ss:$12 sps:$4 sm:$0xff]  }
 0xedd   : > { %10019 = vmatpush3.bf16.msra.mxu0 %v11403_v14  ;;  %8304 = vmatprep.subr.bf16.mxu1 %v11406_v16 }
 0xede   : > { %10020 = vmatprep.subr.bf16.mxu0 %v11407_v34  ;;  %v11433_v34 = vld [vmem:[#allocation13 + $0xb0] ss:$12 sps:$4 sm:$0xff]  }
 0xee0   : > { %8305 = vmatpush1.bf16.msra.mxu1 %v11404_v23 }
 0xee1   : > { %10021 = vmatpush3.bf16.msra.mxu0 %v11408_v32  ;;  %8306 = vmatprep.subr.bf16.mxu1 %v11411_v47  ;;  %v11436_v47 = vld [vmem:[#allocation13 + $0xc4] ss:$12 sps:$4 sm:$0xff]  }
 0xee2   : > { %10022 = vmatprep.subr.bf16.mxu0 %v11412_v51  ;;  %v11437_v51 = vld [vmem:[#allocation13 + $0x248] ss:$12 sps:$4 sm:$0xff]  }
 0xee4   : > { %8307 = vmatpush1.bf16.msra.mxu1 %v11409_v35  ;;  %v11434_v35 = vld [vmem:[#allocation13 + $0xc0] ss:$12 sps:$4 sm:$0xff]  }
 0xee5   : > { %10023 = vmatpush3.bf16.msra.mxu0 %v11413_v52  ;;  %8308 = vmatprep.subr.bf16.mxu1 %v11416_v53  ;;  %v11438_v52 = vld [vmem:[#allocation13 + $0x188] ss:$12 sps:$4 sm:$0xff]  }
 0xee6   : > { %10024 = vmatprep.subr.bf16.mxu0 %v11417_v45  ;;  %v11441_v53 = vld [vmem:[#allocation13 + $0xdc] ss:$12 sps:$4 sm:$0xff]   ;;  %v11442_v45 = vld [vmem:[#allocation13 + $0x260] ss:$12 sps:$4 sm:$0xff]  }
 0xee8   : > { %8309 = vmatpush1.bf16.msra.mxu1 %v11414_v33  ;;  %v11439_v33 = vld [vmem:[#allocation13 + $0xd8] ss:$12 sps:$4 sm:$0xff]  }
 0xee9   : > { %10025 = vmatpush3.bf16.msra.mxu0 %v11418_v29  ;;  %8310 = vmatprep.subr.bf16.mxu1 %v11421_v49  ;;  %v11443_v29 = vld [vmem:[#allocation13 + $0x1a0] ss:$12 sps:$4 sm:$0xff]  }
 0xeea   : > { %v5888_v58 = vpop.f32.mrb[36].mxu1  ;;  %v5974_v59 = vpop.f32.mrb[52].mxu0  ;;  %10026 = vmatprep.subr.bf16.mxu0 %v11422_v61  ;;  %v11446_v49 = vld [vmem:[#allocation13 + $0xf4] ss:$12 sps:$4 sm:$0xff]   ;;  %v11447_v61 = vld [vmem:[#allocation13 + $0x278] ss:$12 sps:$4 sm:$0xff]  }
 0xeeb   : > { %v10264_v48 = vadd.f32 %v5888_v58, %v4314_v25  ;;  %v10268_v50 = vadd.f32 %v5974_v59, %v4322_v41  ;;  %v5890_v44 = vpop.f32.mrb[37].mxu1  ;;  %v5976_v60 = vpop.f32.mrb[53].mxu0  ;;  %v11457_v58 = vld [vmem:[#allocation13 + $0x2a8] ss:$12 sps:$4 sm:$0xff]   ;;  %v11454_v59 = vld [vmem:[#allocation13 + $0x120] ss:$12 sps:$4 sm:$0xff]  }
 0xeec   : > { %v10265_v1 = vadd.f32 %v5890_v44, %v4318_v56  ;;  %v10269_v3 = vadd.f32 %v5976_v60, %v4326_v55  ;;  %v5892_v4 = vpop.f32.mrb[38].mxu1  ;;  %v5978_v11 = vpop.f32.mrb[54].mxu0  ;;  %8311 = vmatpush1.bf16.msra.mxu1 %v11419_v57  ;;  %v11449_v57 = vld [vmem:[#allocation13 + $0x108] ss:$12 sps:$4 sm:$0xff]   ;;  %v11459_v44 = vld [vmem:[#allocation13 + $0x138] ss:$12 sps:$4 sm:$0xff]  }
 0xeed   : > { %v10266_v5 = vadd.f32 %v5892_v4, %v4314_v25  ;;  %v10270_v6 = vadd.f32 %v5978_v11, %v4322_v41  ;;  %10027 = vmatpush3.bf16.msra.mxu0 %v11423_v31  ;;  %v5894_v46 = vpop.f32.mrb[39].mxu1  ;;  %v5980_v7 = vpop.f32.mrb[55].mxu0  ;;  %8312 = vmatprep.subr.bf16.mxu1 %v11426_v40  ;;  %v6327_v15 = vmax.f32 %v10264_v48, 0.0  ;;  %v6329_v18 = vmax.f32 %v10268_v50, 0.0  ;;  %v11444_v25 = vld [vmem:[#allocation13 + $0xf0] ss:$12 sps:$4 sm:$0xff]  }
 0xeee   : > { %v10267_v43 = vadd.f32 %v5894_v46, %v4318_v56  ;;  %v10271_v12 = vadd.f32 %v5980_v7, %v4326_v55  ;;  %10028 = vmatprep.subr.bf16.mxu0 %v11427_v2  ;;  %v6328_v22 = vmax.f32 %v10265_v1, 0.0  ;;  %v6330_v62 = vmax.f32 %v10269_v3, 0.0  ;;  %v11448_v41 = vld [vmem:[#allocation13 + $0x1b8] ss:$12 sps:$4 sm:$0xff]   ;;  %v11452_v55 = vld [vmem:[#allocation13 + $0x290] ss:$12 sps:$4 sm:$0xff]  }
 0xeef   : > { %v6339_v19 = vmax.f32 %v10266_v5, 0.0  ;;  %v6341_v20 = vmax.f32 %v10270_v6, 0.0  ;;  %v11451_v56 = vld [vmem:[#allocation13 + $0x10c] ss:$12 sps:$4 sm:$0xff]   ;;  %v11453_v31 = vld [vmem:[#allocation13 + $0x1d0] ss:$12 sps:$4 sm:$0xff]  }
 0xef0   : > { %v6340_v63 = vmax.f32 %v10267_v43, 0.0  ;;  %v6342_v36 = vmax.f32 %v10271_v12, 0.0  ;;  %8313 = vmatpush1.bf16.msra.mxu1 %v11424_v17  ;;  %v11456_v40 = vld [vmem:[#allocation13 + $0x124] ss:$12 sps:$4 sm:$0xff]   ;;  %v11458_v2 = vld [vmem:[#allocation13 + $0x1e8] ss:$12 sps:$4 sm:$0xff]  }
 0xef1   : > { %v13214_v14 = vpack.c.bf16 %v6339_v19, %v6327_v15  ;;  %v13216_v16 = vpack.c.bf16 %v6341_v20, %v6329_v18  ;;  %10029 = vmatpush3.bf16.msra.mxu0 %v11428_v8  ;;  %8314 = vmatprep.subr.bf16.mxu1 %v11431_v9  ;;  %v11461_v48 = vld [vmem:[#allocation13 + $0x13c] ss:$12 sps:$4 sm:$0xff]   ;;  %v11462_v50 = vld [vmem:[#allocation13 + $0x2c0] ss:$12 sps:$4 sm:$0xff]   ;;  %v11467_v3 = vld [vmem:[#allocation13 + $0x2d8] ss:$12 sps:$4 sm:$0xff]  }
 0xef2   : > { %v6352_v23 = vpack.c.bf16 %v6340_v63, %v6328_v22  ;;  %v13218_v32 = vpack.c.bf16 %v6342_v36, %v6330_v62  ;;  %10030 = vmatprep.subr.bf16.mxu0 %v11432_v0  ;;  %v11463_v60 = vld [vmem:[#allocation13 + $0x200] ss:$12 sps:$4 sm:$0xff]   ;;  %v11464_v4 = vld [vmem:[#allocation13 + $0x150] ss:$12 sps:$4 sm:$0xff]   ;;  %v11468_v11 = vld [vmem:[#allocation13 + $0x218] ss:$12 sps:$4 sm:$0xff]  }
 0xef3   : > { %v11466_v1 = vld [vmem:[#allocation13 + $0x154] ss:$12 sps:$4 sm:$0xff]   ;;  %v11471_v17 = vld [vmem:[#allocation13 + $0x16c] ss:$12 sps:$4 sm:$0xff]   ;;  %v11472_v5 = vld [vmem:[#allocation13 + $0x2f0] ss:$12 sps:$4 sm:$0xff]  }
 0xef4   : > { %8315 = vmatpush1.bf16.msra.mxu1 %v11429_v37  ;;  %8332 = vmatprep.mubr.bf16.mxu1 %v6352_v23  ;;  %v11469_v6 = vld [vmem:[#allocation13 + $0x168] ss:$12 sps:$4 sm:$0xff]   ;;  %v11473_v46 = vld [vmem:[#allocation13 + $0x230] ss:$12 sps:$4 sm:$0xff]   ;;  %v11474_v9 = vld [vmem:[#allocation13 + $0x180] ss:$12 sps:$4 sm:$0xff]  }
 0xef5   : > { %10031 = vmatpush3.bf16.msra.mxu0 %v11433_v34  ;;  %8590 = vmatprep.mubr.bf16.mxu0 %v6352_v23  ;;  %v11476_v7 = vld [vmem:[#allocation13 + $0x184] ss:$12 sps:$4 sm:$0xff]   ;;  %v11498_v8 = vld [vmem:[#allocation13 + $0x3c8] ss:$12 sps:$4 sm:$0xff]   ;;  %v11503_v0 = vld [vmem:[#allocation13 + $0x3e0] ss:$12 sps:$4 sm:$0xff]  }
 0xef6   : > { %8316 = vmatprep.subr.bf16.mxu1 %v11436_v47  ;;  %10038 = vmatprep.subr.bf16.mxu0 %v11437_v51  ;;  %v11479_v43 = vld [vmem:[#allocation13 + $0x19c] ss:$12 sps:$4 sm:$0xff]   ;;  %v11477_v15 = vld [vmem:[#allocation13 + $0x198] ss:$12 sps:$4 sm:$0xff]   ;;  %v11482_v18 = vld [vmem:[#allocation13 + $0x1b4] ss:$12 sps:$4 sm:$0xff]  }
 0xef7   : > { %v11499_v12 = vld [vmem:[#allocation13 + $0x308] ss:$12 sps:$4 sm:$0xff]   ;;  %v11504_v19 = vld [vmem:[#allocation13 + $0x320] ss:$12 sps:$4 sm:$0xff]   ;;  %v11508_v20 = vld [vmem:[#allocation13 + $0x3f8] ss:$12 sps:$4 sm:$0xff]  }
 0xef8   : > { %8591 = vmatmul.mubr.bf16.vlgmr.msra.gmra.mrb[64].mxu0 %v13214_v14  ;;  %8317 = vmatpush1.bf16.msra.mxu1 %v11434_v35  ;;  %v11480_v22 = vld [vmem:[#allocation13 + $0x1b0] ss:$12 sps:$4 sm:$0xff]   ;;  %v11485_v62 = vld [vmem:[#allocation13 + $0x1cc] ss:$12 sps:$4 sm:$0xff]   ;;  %v11483_v37 = vld [vmem:[#allocation13 + $0x1c8] ss:$12 sps:$4 sm:$0xff]  }
 0xef9   : > { %10039 = vmatpush3.bf16.msra.mxu0 %v11438_v52  ;;  %8631 = vmatprep.mubr.bf16.mxu0 %v13218_v32  ;;  %v11509_v63 = vld [vmem:[#allocation13 + $0x338] ss:$12 sps:$4 sm:$0xff]   ;;  %v11513_v36 = vld [vmem:[#allocation13 + $0x410] ss:$12 sps:$4 sm:$0xff]   ;;  %v11518_v23 = vld [vmem:[#allocation13 + $0x428] ss:$12 sps:$4 sm:$0xff]  }
 0xefa   : > { %8318 = vmatprep.subr.bf16.mxu1 %v11441_v53  ;;  %10040 = vmatprep.subr.bf16.mxu0 %v11442_v45  ;;  %v11514_v34 = vld [vmem:[#allocation13 + $0x350] ss:$12 sps:$4 sm:$0xff]   ;;  %v11519_v51 = vld [vmem:[#allocation13 + $0x368] ss:$12 sps:$4 sm:$0xff]   ;;  %v11523_v35 = vld [vmem:[#allocation13 + $0x440] ss:$12 sps:$4 sm:$0xff]  }
 0xefb   : > { %v11491_v47 = vld [vmem:[#allocation13 + $0x1fc] ss:$12 sps:$4 sm:$0xff]   ;;  %v11489_v52 = vld [vmem:[#allocation13 + $0x1f8] ss:$12 sps:$4 sm:$0xff]   ;;  %v11494_v53 = vld [vmem:[#allocation13 + $0x214] ss:$12 sps:$4 sm:$0xff]  }
 0xefc   : > { %8319 = vmatpush1.bf16.msra.mxu1 %v11439_v33  ;;  %v11524_v45 = vld [vmem:[#allocation13 + $0x380] ss:$12 sps:$4 sm:$0xff]   ;;  %v11528_v33 = vld [vmem:[#allocation13 + $0x458] ss:$12 sps:$4 sm:$0xff]  }
 0xefd   : > { %10041 = vmatpush3.bf16.msra.mxu0 %v11443_v29  ;;  %8320 = vmatprep.subr.bf16.mxu1 %v11446_v49  ;;  %v11492_v29 = vld [vmem:[#allocation13 + $0x210] ss:$12 sps:$4 sm:$0xff]   ;;  %v11497_v49 = vld [vmem:[#allocation13 + $0x22c] ss:$12 sps:$4 sm:$0xff]  }
 0xefe   : > { %10042 = vmatprep.subr.bf16.mxu0 %v11447_v61  ;;  %v11529_v61 = vld [vmem:[#allocation13 + $0x398] ss:$12 sps:$4 sm:$0xff]  }
 0xf00   : > { %8321 = vmatpush1.bf16.msra.mxu1 %v11444_v25  ;;  %v11533_v25 = vld [vmem:[#allocation13 + $0x470] ss:$12 sps:$4 sm:$0xff]  }
 0xf01   : > { %10043 = vmatpush3.bf16.msra.mxu0 %v11448_v41  ;;  %8322 = vmatprep.subr.bf16.mxu1 %v11451_v56  ;;  %v11495_v41 = vld [vmem:[#allocation13 + $0x228] ss:$12 sps:$4 sm:$0xff]   ;;  %v11502_v56 = vld [vmem:[#allocation13 + $0x244] ss:$12 sps:$4 sm:$0xff]  }
 0xf02   : > { %10044 = vmatprep.subr.bf16.mxu0 %v11452_v55  ;;  %v11534_v55 = vld [vmem:[#allocation13 + $0x3b0] ss:$12 sps:$4 sm:$0xff]  }
 0xf04   : > { %8323 = vmatpush1.bf16.msra.mxu1 %v11449_v57  ;;  %v11538_v57 = vld [vmem:[#allocation13 + $0x548] ss:$12 sps:$4 sm:$0xff]  }
 0xf05   : > { %10045 = vmatpush3.bf16.msra.mxu0 %v11453_v31  ;;  %8324 = vmatprep.subr.bf16.mxu1 %v11456_v40  ;;  %v11500_v31 = vld [vmem:[#allocation13 + $0x240] ss:$12 sps:$4 sm:$0xff]   ;;  %v11507_v40 = vld [vmem:[#allocation13 + $0x25c] ss:$12 sps:$4 sm:$0xff]  }
 0xf06   : > { %10046 = vmatprep.subr.bf16.mxu0 %v11457_v58  ;;  %v11505_v58 = vld [vmem:[#allocation13 + $0x258] ss:$12 sps:$4 sm:$0xff]  }
 0xf08   : > { %8325 = vmatpush1.bf16.msra.mxu1 %v11454_v59  ;;  %v11512_v59 = vld [vmem:[#allocation13 + $0x274] ss:$12 sps:$4 sm:$0xff]  }
 0xf09   : > { %10047 = vmatpush3.bf16.msra.mxu0 %v11458_v2  ;;  %8326 = vmatprep.subr.bf16.mxu1 %v11461_v48  ;;  %v11510_v2 = vld [vmem:[#allocation13 + $0x270] ss:$12 sps:$4 sm:$0xff]   ;;  %v11517_v48 = vld [vmem:[#allocation13 + $0x28c] ss:$12 sps:$4 sm:$0xff]  }
 0xf0a   : > { %10048 = vmatprep.subr.bf16.mxu0 %v11462_v50  ;;  %v11515_v50 = vld [vmem:[#allocation13 + $0x288] ss:$12 sps:$4 sm:$0xff]  }
 0xf0c   : > { %8327 = vmatpush1.bf16.msra.mxu1 %v11459_v44  ;;  %v11522_v44 = vld [vmem:[#allocation13 + $0x2a4] ss:$12 sps:$4 sm:$0xff]  }
 0xf0d   : > { %10049 = vmatpush3.bf16.msra.mxu0 %v11463_v60  ;;  %8328 = vmatprep.subr.bf16.mxu1 %v11466_v1  ;;  %v4329_v60 = vsub.s32 4, %v12856_v24  ;;  %v11520_v1 = vld [vmem:[#allocation13 + $0x2a0] ss:$12 sps:$4 sm:$0xff]  }
 0xf0e   : > { %10050 = vmatprep.subr.bf16.mxu0 %v11467_v3  ;;  %v4337_v3 = vsub.s32 6, %v12856_v24 }
 0xf10   : > { %8329 = vmatpush1.bf16.msra.mxu1 %v11464_v4  ;;  %v4333_v4 = vsub.s32 5, %v12856_v24 }
 0xf11   : > { %10051 = vmatpush3.bf16.msra.mxu0 %v11468_v11  ;;  %8330 = vmatprep.subr.bf16.mxu1 %v11471_v17  ;;  %v4341_v11 = vsub.s32 7, %v12856_v24  ;;  %v11527_v17 = vld [vmem:[#allocation13 + $0x2bc] ss:$12 sps:$4 sm:$0xff]  }
 0xf12   : > { %10052 = vmatprep.subr.bf16.mxu0 %v11472_v5  ;;  %v4330_v5 = vrot.slane %v13202_v10, %v4329_v60  ;;  %v11549_v60 = vld [vmem:[#allocation13 + $0x4b8] ss:$12 sps:$4 sm:$0xff]  }
 0xf14   : > { %8331 = vmatpush1.bf16.msra.mxu1 %v11469_v6  ;;  %v4338_v6 = vrot.slane %v13202_v10, %v4337_v3  ;;  %v11550_v3 = vld [vmem:[#allocation13 + $0x330] ss:$12 sps:$4 sm:$0xff]  }
 0xf15   : > { %10053 = vmatpush3.bf16.msra.mxu0 %v11473_v46  ;;  %8343 = vmatprep.subr.bf16.mxu1 %v11476_v7  ;;  %v4334_v46 = vrot.slane %v13202_v10, %v4333_v4  ;;  %v11525_v7 = vld [vmem:[#allocation13 + $0x2b8] ss:$12 sps:$4 sm:$0xff]  }
 0xf16   : > { %10060 = vmatprep.subr.bf16.mxu0 %v11498_v8  ;;  %v4342_v8 = vrot.slane %v13202_v10, %v4341_v11  ;;  %v11557_v4 = vld [vmem:[#allocation13 + $0x34c] ss:$12 sps:$4 sm:$0xff]   ;;  %v11554_v11 = vld [vmem:[#allocation13 + $0x4d0] ss:$12 sps:$4 sm:$0xff]  }
 0xf17   : > { %8333 = vmatmul.mubr.bf16.vlgmr.msra.gmra.mrb[48].mxu1 %v13214_v14  ;;  %v11488_v14 = vld [vmem:[#allocation13 + $0x1e4] ss:$12 sps:$4 sm:$0xff]  }
 0xf18   : > { %8632 = vmatmul.mubr.bf16.vlgmr.msra.gmra.mrb[68].mxu0 %v13216_v16  ;;  %8344 = vmatpush1.bf16.msra.mxu1 %v11474_v9  ;;  %v11532_v9 = vld [vmem:[#allocation13 + $0x2d4] ss:$12 sps:$4 sm:$0xff]  }
 0xf19   : > { %8375 = vmatprep.mubr.bf16.mxu1 %v13218_v32  ;;  %8345 = vmatprep.subr.bf16.mxu1 %v11479_v43  ;;  %v11486_v32 = vld [vmem:[#allocation13 + $0x1e0] ss:$12 sps:$4 sm:$0xff]  }
 0xf1a   : > { %10061 = vmatpush3.bf16.msra.mxu0 %v11499_v12 }
 0xf1b   : > { %10062 = vmatprep.subr.bf16.mxu0 %v11503_v0 }
 0xf1c   : > { %8346 = vmatpush1.bf16.msra.mxu1 %v11477_v15 }
 0xf1d   : > { %8347 = vmatprep.subr.bf16.mxu1 %v11482_v18 }
 0xf1e   : > { %10063 = vmatpush3.bf16.msra.mxu0 %v11504_v19 }
 0xf1f   : > { %10064 = vmatprep.subr.bf16.mxu0 %v11508_v20 }
 0xf20   : > { %8348 = vmatpush1.bf16.msra.mxu1 %v11480_v22 }
 0xf21   : > { %8349 = vmatprep.subr.bf16.mxu1 %v11485_v62  ;;  %v11530_v62 = vld [vmem:[#allocation13 + $0x2d0] ss:$12 sps:$4 sm:$0xff]  }
 0xf22   : > { %10065 = vmatpush3.bf16.msra.mxu0 %v11509_v63 }
 0xf23   : > { %10066 = vmatprep.subr.bf16.mxu0 %v11513_v36 }
 0xf24   : > { %8350 = vmatpush1.bf16.msra.mxu1 %v11483_v37 }
 0xf25   : > { %8351 = vmatprep.subr.bf16.mxu1 %v11488_v14 }
 0xf26   : > { %10067 = vmatpush3.bf16.msra.mxu0 %v11514_v34  ;;  %v11537_v34 = vld [vmem:[#allocation13 + $0x2ec] ss:$12 sps:$4 sm:$0xff]  }
 0xf27   : > { %10068 = vmatprep.subr.bf16.mxu0 %v11518_v23 }
 0xf28   : > { %8352 = vmatpush1.bf16.msra.mxu1 %v11486_v32 }
 0xf29   : > { %8353 = vmatprep.subr.bf16.mxu1 %v11491_v47 }
 0xf2a   : > { %10069 = vmatpush3.bf16.msra.mxu0 %v11519_v51 }
 0xf2b   : > { %10070 = vmatprep.subr.bf16.mxu0 %v11523_v35 }
 0xf2c   : > { %8354 = vmatpush1.bf16.msra.mxu1 %v11489_v52 }
 0xf2d   : > { %8355 = vmatprep.subr.bf16.mxu1 %v11494_v53 }
 0xf2e   : > { %10071 = vmatpush3.bf16.msra.mxu0 %v11524_v45 }
 0xf2f   : > { %10072 = vmatprep.subr.bf16.mxu0 %v11528_v33 }
 0xf30   : > { %8356 = vmatpush1.bf16.msra.mxu1 %v11492_v29  ;;  %v11535_v29 = vld [vmem:[#allocation13 + $0x2e8] ss:$12 sps:$4 sm:$0xff]  }
 0xf31   : > { %8357 = vmatprep.subr.bf16.mxu1 %v11497_v49 }
 0xf32   : > { %10073 = vmatpush3.bf16.msra.mxu0 %v11529_v61 }
 0xf33   : > { %10074 = vmatprep.subr.bf16.mxu0 %v11533_v25 }
 0xf34   : > { %8358 = vmatpush1.bf16.msra.mxu1 %v11495_v41  ;;  %v11542_v41 = vld [vmem:[#allocation13 + $0x304] ss:$12 sps:$4 sm:$0xff]  }
 0xf35   : > { %8359 = vmatprep.subr.bf16.mxu1 %v11502_v56 }
 0xf36   : > { %10075 = vmatpush3.bf16.msra.mxu0 %v11534_v55 }
 0xf37   : > { %10082 = vmatprep.subr.bf16.mxu0 %v11538_v57  ;;  %v11539_v57 = vld [vmem:[#allocation13 + $0x488] ss:$12 sps:$4 sm:$0xff]  }
 0xf38   : > { %8360 = vmatpush1.bf16.msra.mxu1 %v11500_v31 }
 0xf39   : > { %8361 = vmatprep.subr.bf16.mxu1 %v11507_v40  ;;  %v11543_v40 = vld [vmem:[#allocation13 + $0x560] ss:$12 sps:$4 sm:$0xff]  }
 0xf3c   : > { %8362 = vmatpush1.bf16.msra.mxu1 %v11505_v58  ;;  %v11540_v58 = vld [vmem:[#allocation13 + $0x300] ss:$12 sps:$4 sm:$0xff]  }
 0xf3d   : > { %8363 = vmatprep.subr.bf16.mxu1 %v11512_v59  ;;  %v11547_v59 = vld [vmem:[#allocation13 + $0x31c] ss:$12 sps:$4 sm:$0xff]  }
 0xf40   : > { %8364 = vmatpush1.bf16.msra.mxu1 %v11510_v2  ;;  %v11544_v2 = vld [vmem:[#allocation13 + $0x4a0] ss:$12 sps:$4 sm:$0xff]  }
 0xf41   : > { %8365 = vmatprep.subr.bf16.mxu1 %v11517_v48  ;;  %v11548_v48 = vld [vmem:[#allocation13 + $0x578] ss:$12 sps:$4 sm:$0xff]  }
 0xf44   : > { %8366 = vmatpush1.bf16.msra.mxu1 %v11515_v50  ;;  %v11545_v50 = vld [vmem:[#allocation13 + $0x318] ss:$12 sps:$4 sm:$0xff]  }
 0xf45   : > { %8367 = vmatprep.subr.bf16.mxu1 %v11522_v44  ;;  %v11552_v44 = vld [vmem:[#allocation13 + $0x334] ss:$12 sps:$4 sm:$0xff]  }
 0xf48   : > { %8368 = vmatpush1.bf16.msra.mxu1 %v11520_v1  ;;  %v11553_v1 = vld [vmem:[#allocation13 + $0x590] ss:$12 sps:$4 sm:$0xff]  }
 0xf49   : > { %8369 = vmatprep.subr.bf16.mxu1 %v11527_v17  ;;  %v11558_v17 = vld [vmem:[#allocation13 + $0x5a8] ss:$12 sps:$4 sm:$0xff]  }
 0xf4a   : > { %v6060_v43 = vpop.f32.mrb[40].mxu1 }
 0xf4b   : > { %v10272_v12 = vadd.f32 %v6060_v43, %v4330_v5  ;;  %v6146_v0 = vpop.f32.mrb[56].mxu0  ;;  %v6062_v15 = vpop.f32.mrb[41].mxu1  ;;  %v11568_v43 = vld [vmem:[#allocation13 + $0x5d8] ss:$12 sps:$4 sm:$0xff]  }
 0xf4c   : > { %v10276_v18 = vadd.f32 %v6146_v0, %v4338_v6  ;;  %v10273_v19 = vadd.f32 %v6062_v15, %v4334_v46  ;;  %v6148_v20 = vpop.f32.mrb[57].mxu0  ;;  %v6064_v22 = vpop.f32.mrb[42].mxu1  ;;  %8370 = vmatpush1.bf16.msra.mxu1 %v11525_v7  ;;  %v11560_v7 = vld [vmem:[#allocation13 + $0x360] ss:$12 sps:$4 sm:$0xff]   ;;  %v11569_v15 = vld [vmem:[#allocation13 + $0x518] ss:$12 sps:$4 sm:$0xff]  }
 0xf4d   : > { %v10277_v63 = vadd.f32 %v6148_v20, %v4342_v8  ;;  %v10274_v36 = vadd.f32 %v6064_v22, %v4330_v5  ;;  %v6150_v37 = vpop.f32.mrb[58].mxu0  ;;  %v6066_v14 = vpop.f32.mrb[43].mxu1  ;;  %8371 = vmatprep.subr.bf16.mxu1 %v11532_v9  ;;  %v6331_v47 = vmax.f32 %v10272_v12, 0.0  ;;  %v11562_v5 = vld [vmem:[#allocation13 + $0x364] ss:$12 sps:$4 sm:$0xff]  }
 0xf4e   : > { %v10278_v23 = vadd.f32 %v6150_v37, %v4338_v6  ;;  %v10275_v10 = vadd.f32 %v6066_v14, %v4334_v46  ;;  %v6152_v32 = vpop.f32.mrb[59].mxu0  ;;  %v6333_v52 = vmax.f32 %v10276_v18, 0.0  ;;  %v6332_v53 = vmax.f32 %v10273_v19, 0.0  ;;  %v11559_v6 = vld [vmem:[#allocation13 + $0x4e8] ss:$12 sps:$4 sm:$0xff]  }
 0xf4f   : > { %v6343_v51 = vmax.f32 %v10274_v36, 0.0  ;;  %v10279_v35 = vadd.f32 %v6152_v32, %v4342_v8  ;;  %v6334_v49 = vmax.f32 %v10277_v63, 0.0  ;;  %v11563_v46 = vld [vmem:[#allocation13 + $0x5c0] ss:$12 sps:$4 sm:$0xff]   ;;  %v11567_v8 = vld [vmem:[#allocation13 + $0x37c] ss:$12 sps:$4 sm:$0xff]  }
 0xf50   : > { %v6345_v45 = vmax.f32 %v10278_v23, 0.0  ;;  %v6344_v33 = vmax.f32 %v10275_v10, 0.0  ;;  %8372 = vmatpush1.bf16.msra.mxu1 %v11530_v62  ;;  %v11564_v9 = vld [vmem:[#allocation13 + $0x500] ss:$12 sps:$4 sm:$0xff]   ;;  %v11565_v12 = vld [vmem:[#allocation13 + $0x378] ss:$12 sps:$4 sm:$0xff]  }
 0xf51   : > { %v13233_v61 = vpack.c.bf16 %v6343_v51, %v6331_v47  ;;  %v6346_v25 = vmax.f32 %v10279_v35, 0.0  ;;  %8373 = vmatprep.subr.bf16.mxu1 %v11537_v34  ;;  %v11572_v0 = vld [vmem:[#allocation13 + $0x394] ss:$12 sps:$4 sm:$0xff]   ;;  %v11573_v18 = vld [vmem:[#allocation13 + $0x5f0] ss:$12 sps:$4 sm:$0xff]  }
 0xf52   : > { %v13235_v56 = vpack.c.bf16 %v6345_v45, %v6333_v52  ;;  %v6356_v55 = vpack.c.bf16 %v6344_v33, %v6332_v53  ;;  %v11570_v19 = vld [vmem:[#allocation13 + $0x390] ss:$12 sps:$4 sm:$0xff]   ;;  %v11577_v20 = vld [vmem:[#allocation13 + $0x3ac] ss:$12 sps:$4 sm:$0xff]   ;;  %v11602_v62 = vld [vmem:[#allocation13 + $0x6c8] ss:$12 sps:$4 sm:$0xff]  }
 0xf53   : > { %v13237_v31 = vpack.c.bf16 %v6346_v25, %v6334_v49  ;;  %v11574_v22 = vld [vmem:[#allocation13 + $0x530] ss:$12 sps:$4 sm:$0xff]   ;;  %v11575_v63 = vld [vmem:[#allocation13 + $0x3a8] ss:$12 sps:$4 sm:$0xff]   ;;  %v11607_v14 = vld [vmem:[#allocation13 + $0x6e0] ss:$12 sps:$4 sm:$0xff]  }
 0xf54   : > { %8374 = vmatpush1.bf16.msra.mxu1 %v11535_v29  ;;  %8672 = vmatprep.mubr.bf16.mxu0 %v6356_v55  ;;  %v11580_v36 = vld [vmem:[#allocation13 + $0x3c4] ss:$12 sps:$4 sm:$0xff]   ;;  %v11603_v37 = vld [vmem:[#allocation13 + $0x608] ss:$12 sps:$4 sm:$0xff]   ;;  %v11578_v34 = vld [vmem:[#allocation13 + $0x3c0] ss:$12 sps:$4 sm:$0xff]  }
 0xf55   : > { %8673 = vmatmul.mubr.bf16.vlgmr.msra.gmra.mrb[72].mxu0 %v13233_v61  ;;  %8386 = vmatprep.subr.bf16.mxu1 %v11542_v41  ;;  %v11583_v23 = vld [vmem:[#allocation13 + $0x3dc] ss:$12 sps:$4 sm:$0xff]   ;;  %v11608_v10 = vld [vmem:[#allocation13 + $0x620] ss:$12 sps:$4 sm:$0xff]   ;;  %v11612_v32 = vld [vmem:[#allocation13 + $0x6f8] ss:$12 sps:$4 sm:$0xff]  }
 0xf56   : > { %10083 = vmatpush3.bf16.msra.mxu0 %v11539_v57  ;;  %8713 = vmatprep.mubr.bf16.mxu0 %v13237_v31  ;;  %v11581_v47 = vld [vmem:[#allocation13 + $0x3d8] ss:$12 sps:$4 sm:$0xff]   ;;  %v11586_v51 = vld [vmem:[#allocation13 + $0x3f4] ss:$12 sps:$4 sm:$0xff]   ;;  %v11617_v52 = vld [vmem:[#allocation13 + $0x710] ss:$12 sps:$4 sm:$0xff]  }
 0xf57   : > { %8376 = vmatmul.mubr.bf16.vlgmr.msra.gmra.mrb[48].mxu1 %v13216_v16  ;;  %10084 = vmatprep.subr.bf16.mxu0 %v11543_v40  ;;  %v11555_v16 = vld [vmem:[#allocation13 + $0x348] ss:$12 sps:$4 sm:$0xff]   ;;  %v11613_v35 = vld [vmem:[#allocation13 + $0x638] ss:$12 sps:$4 sm:$0xff]   ;;  %v11584_v53 = vld [vmem:[#allocation13 + $0x3f0] ss:$12 sps:$4 sm:$0xff]  }
 0xf58   : > { %8387 = vmatpush1.bf16.msra.mxu1 %v11540_v58  ;;  %8418 = vmatprep.mubr.bf16.mxu1 %v6356_v55  ;;  %v11589_v45 = vld [vmem:[#allocation13 + $0x40c] ss:$12 sps:$4 sm:$0xff]   ;;  %v11618_v33 = vld [vmem:[#allocation13 + $0x650] ss:$12 sps:$4 sm:$0xff]   ;;  %v11622_v29 = vld [vmem:[#allocation13 + $0x728] ss:$12 sps:$4 sm:$0xff]  }
 0xf59   : > { %8388 = vmatprep.subr.bf16.mxu1 %v11547_v59  ;;  %v11587_v49 = vld [vmem:[#allocation13 + $0x408] ss:$12 sps:$4 sm:$0xff]   ;;  %v11592_v25 = vld [vmem:[#allocation13 + $0x424] ss:$12 sps:$4 sm:$0xff]   ;;  %v11627_v55 = vld [vmem:[#allocation13 + $0x740] ss:$12 sps:$4 sm:$0xff]  }
 0xf5a   : > { %10085 = vmatpush3.bf16.msra.mxu0 %v11544_v2  ;;  %v11623_v41 = vld [vmem:[#allocation13 + $0x668] ss:$12 sps:$4 sm:$0xff]   ;;  %v11590_v57 = vld [vmem:[#allocation13 + $0x420] ss:$12 sps:$4 sm:$0xff]   ;;  %v11632_v59 = vld [vmem:[#allocation13 + $0x758] ss:$12 sps:$4 sm:$0xff]  }
 0xf5b   : > { %10086 = vmatprep.subr.bf16.mxu0 %v11548_v48  ;;  %v11595_v40 = vld [vmem:[#allocation13 + $0x43c] ss:$12 sps:$4 sm:$0xff]   ;;  %v11628_v58 = vld [vmem:[#allocation13 + $0x680] ss:$12 sps:$4 sm:$0xff]   ;;  %v11593_v2 = vld [vmem:[#allocation13 + $0x438] ss:$12 sps:$4 sm:$0xff]  }
 0xf5c   : > { %8389 = vmatpush1.bf16.msra.mxu1 %v11545_v50  ;;  %v11598_v48 = vld [vmem:[#allocation13 + $0x454] ss:$12 sps:$4 sm:$0xff]   ;;  %v11633_v50 = vld [vmem:[#allocation13 + $0x698] ss:$12 sps:$4 sm:$0xff]  }
 0xf5d   : > { %8390 = vmatprep.subr.bf16.mxu1 %v11552_v44  ;;  %v11637_v44 = vld [vmem:[#allocation13 + $0x770] ss:$12 sps:$4 sm:$0xff]  }
 0xf5e   : > { %10087 = vmatpush3.bf16.msra.mxu0 %v11549_v60  ;;  %v11596_v60 = vld [vmem:[#allocation13 + $0x450] ss:$12 sps:$4 sm:$0xff]  }
 0xf5f   : > { %10088 = vmatprep.subr.bf16.mxu0 %v11553_v1  ;;  %v11601_v1 = vld [vmem:[#allocation13 + $0x46c] ss:$12 sps:$4 sm:$0xff]  }
 0xf60   : > { %8391 = vmatpush1.bf16.msra.mxu1 %v11550_v3  ;;  %v11638_v3 = vld [vmem:[#allocation13 + $0x6b0] ss:$12 sps:$4 sm:$0xff]  }
 0xf61   : > { %8392 = vmatprep.subr.bf16.mxu1 %v11557_v4  ;;  %v11642_v4 = vld [vmem:[#allocation13 + $0x848] ss:$12 sps:$4 sm:$0xff]  }
 0xf62   : > { %10089 = vmatpush3.bf16.msra.mxu0 %v11554_v11  ;;  %v11599_v11 = vld [vmem:[#allocation13 + $0x468] ss:$12 sps:$4 sm:$0xff]  }
 0xf63   : > { %10090 = vmatprep.subr.bf16.mxu0 %v11558_v17  ;;  %v11606_v17 = vld [vmem:[#allocation13 + $0x484] ss:$12 sps:$4 sm:$0xff]  }
 0xf64   : > { %8393 = vmatpush1.bf16.msra.mxu1 %v11555_v16  ;;  %v11604_v16 = vld [vmem:[#allocation13 + $0x480] ss:$12 sps:$4 sm:$0xff]  }
 0xf65   : > { %8394 = vmatprep.subr.bf16.mxu1 %v11562_v5  ;;  %v11611_v5 = vld [vmem:[#allocation13 + $0x49c] ss:$12 sps:$4 sm:$0xff]  }
 0xf66   : > { %10091 = vmatpush3.bf16.msra.mxu0 %v11559_v6  ;;  %v11609_v6 = vld [vmem:[#allocation13 + $0x498] ss:$12 sps:$4 sm:$0xff]  }
 0xf67   : > { %10092 = vmatprep.subr.bf16.mxu0 %v11563_v46  ;;  %v11616_v46 = vld [vmem:[#allocation13 + $0x4b4] ss:$12 sps:$4 sm:$0xff]  }
 0xf68   : > { %8395 = vmatpush1.bf16.msra.mxu1 %v11560_v7  ;;  %v11614_v7 = vld [vmem:[#allocation13 + $0x4b0] ss:$12 sps:$4 sm:$0xff]  }
 0xf69   : > { %8396 = vmatprep.subr.bf16.mxu1 %v11567_v8  ;;  %v11621_v8 = vld [vmem:[#allocation13 + $0x4cc] ss:$12 sps:$4 sm:$0xff]  }
 0xf6a   : > { %10093 = vmatpush3.bf16.msra.mxu0 %v11564_v9  ;;  %v11619_v9 = vld [vmem:[#allocation13 + $0x4c8] ss:$12 sps:$4 sm:$0xff]  }
 0xf6b   : > { %10094 = vmatprep.subr.bf16.mxu0 %v11568_v43  ;;  %v11626_v43 = vld [vmem:[#allocation13 + $0x4e4] ss:$12 sps:$4 sm:$0xff]  }
 0xf6c   : > { %8397 = vmatpush1.bf16.msra.mxu1 %v11565_v12  ;;  %v11624_v12 = vld [vmem:[#allocation13 + $0x4e0] ss:$12 sps:$4 sm:$0xff]  }
 0xf6d   : > { %8398 = vmatprep.subr.bf16.mxu1 %v11572_v0  ;;  %v4308_v0 = vld [vmem:[#allocation11 + $0x8] sm:$0xf] }
 0xf6e   : > { %10095 = vmatpush3.bf16.msra.mxu0 %v11569_v15  ;;  %v11631_v15 = vld [vmem:[#allocation13 + $0x4fc] ss:$12 sps:$4 sm:$0xff]  }
 0xf6f   : > { %10096 = vmatprep.subr.bf16.mxu0 %v11573_v18  ;;  %v4350_v18 = vrot.slane %v4308_v0, %v12859_v26 }
 0xf70   : > { %8399 = vmatpush1.bf16.msra.mxu1 %v11570_v19  ;;  %v11629_v19 = vld [vmem:[#allocation13 + $0x4f8] ss:$12 sps:$4 sm:$0xff]  }
 0xf71   : > { %8400 = vmatprep.subr.bf16.mxu1 %v11577_v20  ;;  %v4358_v20 = vrot.slane %v4308_v0, %v4325_v54 }
 0xf72   : > { %10097 = vmatpush3.bf16.msra.mxu0 %v11574_v22  ;;  %v11636_v22 = vld [vmem:[#allocation13 + $0x514] ss:$12 sps:$4 sm:$0xff]  }
 0xf73   : > { %10104 = vmatprep.subr.bf16.mxu0 %v11602_v62 }
 0xf74   : > { %8401 = vmatpush1.bf16.msra.mxu1 %v11575_v63 }
 0xf75   : > { %8714 = vmatmul.mubr.bf16.vlgmr.msra.gmra.mrb[76].mxu0 %v13235_v56  ;;  %8402 = vmatprep.subr.bf16.mxu1 %v11580_v36 }
 0xf76   : > { %10105 = vmatpush3.bf16.msra.mxu0 %v11603_v37 }
 0xf77   : > { %10106 = vmatprep.subr.bf16.mxu0 %v11607_v14 }
 0xf78   : > { %8403 = vmatpush1.bf16.msra.mxu1 %v11578_v34 }
 0xf79   : > { %8404 = vmatprep.subr.bf16.mxu1 %v11583_v23 }
 0xf7a   : > { %10107 = vmatpush3.bf16.msra.mxu0 %v11608_v10 }
 0xf7b   : > { %10108 = vmatprep.subr.bf16.mxu0 %v11612_v32  ;;  %v11634_v32 = vld [vmem:[#allocation13 + $0x510] ss:$12 sps:$4 sm:$0xff]  }
 0xf7c   : > { %8405 = vmatpush1.bf16.msra.mxu1 %v11581_v47 }
 0xf7d   : > { %8406 = vmatprep.subr.bf16.mxu1 %v11586_v51 }
 0xf7e   : > { %10109 = vmatpush3.bf16.msra.mxu0 %v11613_v35 }
 0xf7f   : > { %10110 = vmatprep.subr.bf16.mxu0 %v11617_v52 }
 0xf80   : > { %8407 = vmatpush1.bf16.msra.mxu1 %v11584_v53  ;;  %v11641_v53 = vld [vmem:[#allocation13 + $0x52c] ss:$12 sps:$4 sm:$0xff]  }
 0xf81   : > { %8408 = vmatprep.subr.bf16.mxu1 %v11589_v45 }
 0xf82   : > { %10111 = vmatpush3.bf16.msra.mxu0 %v11618_v33 }
 0xf83   : > { %10112 = vmatprep.subr.bf16.mxu0 %v11622_v29 }
 0xf84   : > { %8409 = vmatpush1.bf16.msra.mxu1 %v11587_v49 }
 0xf85   : > { %8410 = vmatprep.subr.bf16.mxu1 %v11592_v25 }
 0xf86   : > { %10113 = vmatpush3.bf16.msra.mxu0 %v11623_v41 }
 0xf87   : > { %10114 = vmatprep.subr.bf16.mxu0 %v11627_v55 }
 0xf88   : > { %8411 = vmatpush1.bf16.msra.mxu1 %v11590_v57 }
 0xf89   : > { %8412 = vmatprep.subr.bf16.mxu1 %v11595_v40  ;;  %v11639_v40 = vld [vmem:[#allocation13 + $0x528] ss:$12 sps:$4 sm:$0xff]  }
 0xf8a   : > { %10115 = vmatpush3.bf16.msra.mxu0 %v11628_v58 }
 0xf8b   : > { %10116 = vmatprep.subr.bf16.mxu0 %v11632_v59 }
 0xf8c   : > { %8413 = vmatpush1.bf16.msra.mxu1 %v11593_v2 }
 0xf8d   : > { %8414 = vmatprep.subr.bf16.mxu1 %v11598_v48  ;;  %v11646_v48 = vld [vmem:[#allocation13 + $0x544] ss:$12 sps:$4 sm:$0xff]  }
 0xf8e   : > { %10117 = vmatpush3.bf16.msra.mxu0 %v11633_v50 }
 0xf8f   : > { %10118 = vmatprep.subr.bf16.mxu0 %v11637_v44 }
 0xf90   : > { %8415 = vmatpush1.bf16.msra.mxu1 %v11596_v60  ;;  %v11643_v60 = vld [vmem:[#allocation13 + $0x788] ss:$12 sps:$4 sm:$0xff]  }
 0xf91   : > { %8416 = vmatprep.subr.bf16.mxu1 %v11601_v1 }
 0xf92   : > { %10119 = vmatpush3.bf16.msra.mxu0 %v11638_v3  ;;  %v11647_v3 = vld [vmem:[#allocation13 + $0x860] ss:$12 sps:$4 sm:$0xff]  }
 0xf93   : > { %10126 = vmatprep.subr.bf16.mxu0 %v11642_v4  ;;  %v11644_v4 = vld [vmem:[#allocation13 + $0x540] ss:$12 sps:$4 sm:$0xff]  }
 0xf94   : > { %8417 = vmatpush1.bf16.msra.mxu1 %v11599_v11  ;;  %v11651_v11 = vld [vmem:[#allocation13 + $0x55c] ss:$12 sps:$4 sm:$0xff]  }
 0xf95   : > { %8429 = vmatprep.subr.bf16.mxu1 %v11606_v17  ;;  %v11648_v17 = vld [vmem:[#allocation13 + $0x7a0] ss:$12 sps:$4 sm:$0xff]  }
 0xf97   : > { %8419 = vmatmul.mubr.bf16.vlgmr.msra.gmra.mrb[48].mxu1 %v13233_v61  ;;  %v4346_v61 = vrot.slane %v4308_v0, %v12865_v28 }
 0xf98   : > { %8430 = vmatpush1.bf16.msra.mxu1 %v11604_v16  ;;  %8461 = vmatprep.mubr.bf16.mxu1 %v13237_v31  ;;  %v4354_v31 = vrot.slane %v4308_v0, %v12862_v27  ;;  %v11652_v16 = vld [vmem:[#allocation13 + $0x878] ss:$12 sps:$4 sm:$0xff]   ;;  %v11659_v0 = vld [vmem:[#allocation13 + $0x588] ss:$12 sps:$4 sm:$0xff]  }
 0xf99   : > { %8431 = vmatprep.subr.bf16.mxu1 %v11611_v5  ;;  %v11649_v5 = vld [vmem:[#allocation13 + $0x558] ss:$12 sps:$4 sm:$0xff]  }
 0xf9c   : > { %8432 = vmatpush1.bf16.msra.mxu1 %v11609_v6  ;;  %v11656_v6 = vld [vmem:[#allocation13 + $0x574] ss:$12 sps:$4 sm:$0xff]  }
 0xf9d   : > { %8433 = vmatprep.subr.bf16.mxu1 %v11616_v46  ;;  %v11653_v46 = vld [vmem:[#allocation13 + $0x7b8] ss:$12 sps:$4 sm:$0xff]  }
 0xfa0   : > { %8434 = vmatpush1.bf16.msra.mxu1 %v11614_v7  ;;  %v11657_v7 = vld [vmem:[#allocation13 + $0x890] ss:$12 sps:$4 sm:$0xff]  }
 0xfa1   : > { %8435 = vmatprep.subr.bf16.mxu1 %v11621_v8  ;;  %v11654_v8 = vld [vmem:[#allocation13 + $0x570] ss:$12 sps:$4 sm:$0xff]  }
 0xfa4   : > { %8436 = vmatpush1.bf16.msra.mxu1 %v11619_v9  ;;  %v11661_v9 = vld [vmem:[#allocation13 + $0x58c] ss:$12 sps:$4 sm:$0xff]  }
 0xfa5   : > { %8437 = vmatprep.subr.bf16.mxu1 %v11626_v43  ;;  %v11658_v43 = vld [vmem:[#allocation13 + $0x7d0] ss:$12 sps:$4 sm:$0xff]  }
 0xfa8   : > { %8438 = vmatpush1.bf16.msra.mxu1 %v11624_v12  ;;  %v11662_v12 = vld [vmem:[#allocation13 + $0x8a8] ss:$12 sps:$4 sm:$0xff]  }
 0xfa9   : > { %8439 = vmatprep.subr.bf16.mxu1 %v11631_v15  ;;  %v11666_v15 = vld [vmem:[#allocation13 + $0x5a4] ss:$12 sps:$4 sm:$0xff]  }
 0xfaa   : > { %v6232_v62 = vpop.f32.mrb[44].mxu1 }
 0xfab   : > { %v10280_v63 = vadd.f32 %v6232_v62, %v4346_v61  ;;  %v6318_v36 = vpop.f32.mrb[60].mxu0  ;;  %v6234_v37 = vpop.f32.mrb[45].mxu1  ;;  %v11669_v62 = vld [vmem:[#allocation13 + $0x5b8] ss:$12 sps:$4 sm:$0xff]  }
 0xfac   : > { %v10284_v14 = vadd.f32 %v6318_v36, %v4354_v31  ;;  %v10281_v34 = vadd.f32 %v6234_v37, %v4350_v18  ;;  %v6320_v23 = vpop.f32.mrb[61].mxu0  ;;  %v6236_v10 = vpop.f32.mrb[46].mxu1  ;;  %8440 = vmatpush1.bf16.msra.mxu1 %v11629_v19  ;;  %v11671_v19 = vld [vmem:[#allocation13 + $0x5bc] ss:$12 sps:$4 sm:$0xff]   ;;  %v11673_v36 = vld [vmem:[#allocation13 + $0x818] ss:$12 sps:$4 sm:$0xff]  }
 0xfad   : > { %v10285_v47 = vadd.f32 %v6320_v23, %v4358_v20  ;;  %v10282_v51 = vadd.f32 %v6236_v10, %v4346_v61  ;;  %v6322_v35 = vpop.f32.mrb[62].mxu0  ;;  %v6238_v52 = vpop.f32.mrb[47].mxu1  ;;  %8441 = vmatprep.subr.bf16.mxu1 %v11636_v22  ;;  %v6335_v33 = vmax.f32 %v10280_v63, 0.0  ;;  %v11663_v61 = vld [vmem:[#allocation13 + $0x7e8] ss:$12 sps:$4 sm:$0xff]  }
 0xfae   : > { %v10286_v24 = vadd.f32 %v6322_v35, %v4354_v31  ;;  %v10283_v54 = vadd.f32 %v6238_v52, %v4350_v18  ;;  %v6324_v45 = vpop.f32.mrb[63].mxu0  ;;  %v6337_v25 = vmax.f32 %v10284_v14, 0.0  ;;  %v6336_v41 = vmax.f32 %v10281_v34, 0.0  ;;  %v11667_v31 = vld [vmem:[#allocation13 + $0x8c0] ss:$12 sps:$4 sm:$0xff]  }
 0xfaf   : > { %v6347_v29 = vmax.f32 %v10282_v51, 0.0  ;;  %v10287_v49 = vadd.f32 %v6324_v45, %v4358_v20  ;;  %v6338_v58 = vmax.f32 %v10285_v47, 0.0  ;;  %v11664_v18 = vld [vmem:[#allocation13 + $0x5a0] ss:$12 sps:$4 sm:$0xff]   ;;  %v11672_v22 = vld [vmem:[#allocation13 + $0x8d8] ss:$12 sps:$4 sm:$0xff]  }
 0xfb0   : > { %v6349_v55 = vmax.f32 %v10286_v24, 0.0  ;;  %v6348_v57 = vmax.f32 %v10283_v54, 0.0  ;;  %8442 = vmatpush1.bf16.msra.mxu1 %v11634_v32  ;;  %v11668_v20 = vld [vmem:[#allocation13 + $0x800] ss:$12 sps:$4 sm:$0xff]   ;;  %v11677_v14 = vld [vmem:[#allocation13 + $0x8f0] ss:$12 sps:$4 sm:$0xff]  }
 0xfb1   : > { %v13250_v59 = vpack.c.bf16 %v6347_v29, %v6335_v33  ;;  %v6350_v2 = vmax.f32 %v10287_v49, 0.0  ;;  %8443 = vmatprep.subr.bf16.mxu1 %v11641_v53  ;;  %v11676_v63 = vld [vmem:[#allocation13 + $0x5d4] ss:$12 sps:$4 sm:$0xff]   ;;  %v11674_v23 = vld [vmem:[#allocation13 + $0x5d0] ss:$12 sps:$4 sm:$0xff]  }
 0xfb2   : > { %v13252_v50 = vpack.c.bf16 %v6349_v55, %v6337_v25  ;;  %v13254_v44 = vpack.c.bf16 %v6348_v57, %v6336_v41  ;;  %v11681_v47 = vld [vmem:[#allocation13 + $0x5ec] ss:$12 sps:$4 sm:$0xff]   ;;  %v11678_v35 = vld [vmem:[#allocation13 + $0x830] ss:$12 sps:$4 sm:$0xff]   ;;  %v11679_v53 = vld [vmem:[#allocation13 + $0x5e8] ss:$12 sps:$4 sm:$0xff]  }
 0xfb3   : > { %v13256_v1 = vpack.c.bf16 %v6350_v2, %v6338_v58  ;;  %v11684_v24 = vld [vmem:[#allocation13 + $0x604] ss:$12 sps:$4 sm:$0xff]   ;;  %v11682_v54 = vld [vmem:[#allocation13 + $0x600] ss:$12 sps:$4 sm:$0xff]   ;;  %v11687_v45 = vld [vmem:[#allocation13 + $0x61c] ss:$12 sps:$4 sm:$0xff]  }
 0xfb4   : > { %8444 = vmatpush1.bf16.msra.mxu1 %v11639_v40  ;;  %8754 = vmatprep.mubr.bf16.mxu0 %v13254_v44  ;;  %v11685_v33 = vld [vmem:[#allocation13 + $0x618] ss:$12 sps:$4 sm:$0xff]   ;;  %v11690_v29 = vld [vmem:[#allocation13 + $0x634] ss:$12 sps:$4 sm:$0xff]   ;;  %v11688_v49 = vld [vmem:[#allocation13 + $0x630] ss:$12 sps:$4 sm:$0xff]  }
 0xfb5   : > { %8755 = vmatmul.mubr.bf16.vlgmr.msra.gmra.mrb[80].mxu0 %v13250_v59  ;;  %8445 = vmatprep.subr.bf16.mxu1 %v11646_v48  ;;  %v11693_v25 = vld [vmem:[#allocation13 + $0x64c] ss:$12 sps:$4 sm:$0xff]   ;;  %v11691_v41 = vld [vmem:[#allocation13 + $0x648] ss:$12 sps:$4 sm:$0xff]   ;;  %v11696_v55 = vld [vmem:[#allocation13 + $0x664] ss:$12 sps:$4 sm:$0xff]  }
 0xfb6   : > { %10127 = vmatpush3.bf16.msra.mxu0 %v11643_v60  ;;  %8795 = vmatprep.mubr.bf16.mxu0 %v13256_v1  ;;  %v11694_v57 = vld [vmem:[#allocation13 + $0x660] ss:$12 sps:$4 sm:$0xff]   ;;  %v11699_v40 = vld [vmem:[#allocation13 + $0x67c] ss:$12 sps:$4 sm:$0xff]  }
 0xfb7   : > { %10128 = vmatprep.subr.bf16.mxu0 %v11647_v3  ;;  %v13264_v58 = vld [vmem:[#allocation14] sm:$0x7]  ;;  %v11700_v3 = vld [vmem:[#allocation13 + $0x690] ss:$12 sps:$4 sm:$0xff]  }
 0xfb8   : > { %8446 = vmatpush1.bf16.msra.mxu1 %v11644_v4  ;;  %v6760_v2 = vrot.slane %v13264_v58, %v12862_v27  ;;  %v11702_v48 = vld [vmem:[#allocation13 + $0x694] ss:$12 sps:$4 sm:$0xff]   ;;  %v11708_v27 = vld [vmem:[#allocation13 + $0x6c4] ss:$12 sps:$4 sm:$0xff]  }
 0xfb9   : > { %8447 = vmatprep.subr.bf16.mxu1 %v11651_v11 }
 0xfba   : > { %10129 = vmatpush3.bf16.msra.mxu0 %v11648_v17 }
 0xfbb   : > { %10130 = vmatprep.subr.bf16.mxu0 %v11652_v16  ;;  %v11705_v16 = vld [vmem:[#allocation13 + $0x6ac] ss:$12 sps:$4 sm:$0xff]  }
 0xfbc   : > { %8448 = vmatpush1.bf16.msra.mxu1 %v11649_v5 }
 0xfbd   : > { %8449 = vmatprep.subr.bf16.mxu1 %v11656_v6 }
 0xfbe   : > { %10131 = vmatpush3.bf16.msra.mxu0 %v11653_v46 }
 0xfbf   : > { %10132 = vmatprep.subr.bf16.mxu0 %v11657_v7 }
 0xfc0   : > { %8450 = vmatpush1.bf16.msra.mxu1 %v11654_v8  ;;  %v11703_v8 = vld [vmem:[#allocation13 + $0x6a8] ss:$12 sps:$4 sm:$0xff]  }
 0xfc1   : > { %8451 = vmatprep.subr.bf16.mxu1 %v11661_v9 }
 0xfc2   : > { %10133 = vmatpush3.bf16.msra.mxu0 %v11658_v43  ;;  %v11706_v43 = vld [vmem:[#allocation13 + $0x6c0] ss:$12 sps:$4 sm:$0xff]  }
 0xfc3   : > { %10134 = vmatprep.subr.bf16.mxu0 %v11662_v12  ;;  %v11711_v12 = vld [vmem:[#allocation13 + $0x6dc] ss:$12 sps:$4 sm:$0xff]  }
 0xfc4   : > { %8452 = vmatpush1.bf16.msra.mxu1 %v11659_v0  ;;  %v11709_v0 = vld [vmem:[#allocation13 + $0x6d8] ss:$12 sps:$4 sm:$0xff]  }
 0xfc5   : > { %8453 = vmatprep.subr.bf16.mxu1 %v11666_v15  ;;  %v11714_v15 = vld [vmem:[#allocation13 + $0x6f4] ss:$12 sps:$4 sm:$0xff]  }
 0xfc6   : > { %10135 = vmatpush3.bf16.msra.mxu0 %v11663_v61  ;;  %v11712_v61 = vld [vmem:[#allocation13 + $0x6f0] ss:$12 sps:$4 sm:$0xff]  }
 0xfc7   : > { %10136 = vmatprep.subr.bf16.mxu0 %v11667_v31  ;;  %v11717_v31 = vld [vmem:[#allocation13 + $0x70c] ss:$12 sps:$4 sm:$0xff]  }
 0xfc8   : > { %8454 = vmatpush1.bf16.msra.mxu1 %v11664_v18  ;;  %v11715_v18 = vld [vmem:[#allocation13 + $0x708] ss:$12 sps:$4 sm:$0xff]  }
 0xfc9   : > { %8455 = vmatprep.subr.bf16.mxu1 %v11671_v19  ;;  %v11720_v19 = vld [vmem:[#allocation13 + $0x724] ss:$12 sps:$4 sm:$0xff]  }
 0xfca   : > { %10137 = vmatpush3.bf16.msra.mxu0 %v11668_v20  ;;  %v11718_v20 = vld [vmem:[#allocation13 + $0x720] ss:$12 sps:$4 sm:$0xff]  }
 0xfcb   : > { %v10032_v37 = vpop.f32.mrb[64].mxu0  ;;  %10138 = vmatprep.subr.bf16.mxu0 %v11672_v22  ;;  %v11723_v22 = vld [vmem:[#allocation13 + $0x73c] ss:$12 sps:$4 sm:$0xff]  }
 0xfcc   : > { %v10033_v34 = vpop.f32.mrb[65].mxu0  ;;  %8456 = vmatpush1.bf16.msra.mxu1 %v11669_v62  ;;  %v11721_v62 = vld [vmem:[#allocation13 + $0x738] ss:$12 sps:$4 sm:$0xff]  }
 0xfcd   : > { %v10034_v10 = vadd.f32 %v10033_v34, %v10032_v37  ;;  %v10035_v32 = vpop.f32.mrb[66].mxu0  ;;  %8457 = vmatprep.subr.bf16.mxu1 %v11676_v63  ;;  %v11726_v63 = vld [vmem:[#allocation13 + $0x754] ss:$12 sps:$4 sm:$0xff]   ;;  %v11729_v37 = vld [vmem:[#allocation13 + $0x76c] ss:$12 sps:$4 sm:$0xff]  }
 0xfce   : > { %v10036_v51 = vpop.f32.mrb[67].mxu0  ;;  %10139 = vmatpush3.bf16.msra.mxu0 %v11673_v36  ;;  %v11724_v36 = vld [vmem:[#allocation13 + $0x750] ss:$12 sps:$4 sm:$0xff]  }
 0xfcf   : > { %v10037_v52 = vadd.f32 %v10036_v51, %v10035_v32  ;;  %10140 = vmatprep.subr.bf16.mxu0 %v11677_v14  ;;  %v8593_v4 = vadd.f32 %v10034_v10, %v6760_v2  ;;  %v11727_v14 = vld [vmem:[#allocation13 + $0x768] ss:$12 sps:$4 sm:$0xff]   ;;  %v11732_v34 = vld [vmem:[#allocation13 + $0x784] ss:$12 sps:$4 sm:$0xff]  }
 0xfd0   : > { %8458 = vmatpush1.bf16.msra.mxu1 %v11674_v23  ;;  %v11730_v23 = vld [vmem:[#allocation13 + $0x780] ss:$12 sps:$4 sm:$0xff]   ;;  %v11735_v10 = vld [vmem:[#allocation13 + $0x79c] ss:$12 sps:$4 sm:$0xff]   ;;  %v11733_v32 = vld [vmem:[#allocation13 + $0x798] ss:$12 sps:$4 sm:$0xff]  }
 0xfd1   : > { %8459 = vmatprep.subr.bf16.mxu1 %v11681_v47  ;;  %v8596_v6 = vadd.f32 %v10037_v52, %v6760_v2  ;;  %v11738_v47 = vld [vmem:[#allocation13 + $0x7b4] ss:$12 sps:$4 sm:$0xff]   ;;  %v11736_v51 = vld [vmem:[#allocation13 + $0x7b0] ss:$12 sps:$4 sm:$0xff]  }
 0xfd2   : > { %10141 = vmatpush3.bf16.msra.mxu0 %v11678_v35  ;;  %v11741_v35 = vld [vmem:[#allocation13 + $0x7cc] ss:$12 sps:$4 sm:$0xff]   ;;  %v11739_v52 = vld [vmem:[#allocation13 + $0x7c8] ss:$12 sps:$4 sm:$0xff]  }
 0xfd3   : > { %v11751_v2 = vld [vmem:[#allocation13 + $0x828] ss:$12 sps:$4 sm:$0xff]  }
 0xfd4   : > { %8460 = vmatpush1.bf16.msra.mxu1 %v11679_v53  ;;  %v11744_v53 = vld [vmem:[#allocation13 + $0x7e4] ss:$12 sps:$4 sm:$0xff]  }
 0xfd5   : > { %8796 = vmatmul.mubr.bf16.vlgmr.msra.gmra.mrb[84].mxu0 %v13252_v50  ;;  %8472 = vmatprep.subr.bf16.mxu1 %v11684_v24  ;;  %v11742_v24 = vld [vmem:[#allocation13 + $0x7e0] ss:$12 sps:$4 sm:$0xff]  }
 0xfd7   : > { %8462 = vmatmul.mubr.bf16.vlgmr.msra.gmra.mrb[48].mxu1 %v13235_v56  ;;  %v11697_v56 = vld [vmem:[#allocation13 + $0x678] ss:$12 sps:$4 sm:$0xff]  }
 0xfd8   : > { %8473 = vmatpush1.bf16.msra.mxu1 %v11682_v54  ;;  %8504 = vmatprep.mubr.bf16.mxu1 %v13254_v44  ;;  %v11747_v54 = vld [vmem:[#allocation13 + $0x7fc] ss:$12 sps:$4 sm:$0xff]  }
 0xfd9   : > { %8474 = vmatprep.subr.bf16.mxu1 %v11687_v45  ;;  %v11745_v45 = vld [vmem:[#allocation13 + $0x7f8] ss:$12 sps:$4 sm:$0xff]  }
 0xfdc   : > { %8475 = vmatpush1.bf16.msra.mxu1 %v11685_v33 }
 0xfdd   : > { %8476 = vmatprep.subr.bf16.mxu1 %v11690_v29 }
 0xfe0   : > { %8477 = vmatpush1.bf16.msra.mxu1 %v11688_v49 }
 0xfe1   : > { %8478 = vmatprep.subr.bf16.mxu1 %v11693_v25 }
 0xfe4   : > { %8479 = vmatpush1.bf16.msra.mxu1 %v11691_v41 }
 0xfe5   : > { %8480 = vmatprep.subr.bf16.mxu1 %v11696_v55 }
 0xfe8   : > { %8481 = vmatpush1.bf16.msra.mxu1 %v11694_v57  ;;  %v11748_v57 = vld [vmem:[#allocation13 + $0x810] ss:$12 sps:$4 sm:$0xff]  }
 0xfe9   : > { %8482 = vmatprep.subr.bf16.mxu1 %v11699_v40  ;;  %v11753_v40 = vld [vmem:[#allocation13 + $0x82c] ss:$12 sps:$4 sm:$0xff]  }
 0xfeb   : > { %v10054_v44 = vpop.f32.mrb[68].mxu0 }
 0xfec   : > { %v10055_v60 = vpop.f32.mrb[69].mxu0  ;;  %8483 = vmatpush1.bf16.msra.mxu1 %v11697_v56 }
 0xfed   : > { %v10056_v11 = vadd.f32 %v10055_v60, %v10054_v44  ;;  %v10057_v17 = vpop.f32.mrb[70].mxu0  ;;  %8484 = vmatprep.subr.bf16.mxu1 %v11702_v48  ;;  %v11756_v48 = vld [vmem:[#allocation13 + $0x844] ss:$12 sps:$4 sm:$0xff]   ;;  %v11754_v44 = vld [vmem:[#allocation13 + $0x840] ss:$12 sps:$4 sm:$0xff]  }
 0xfee   : > { %v10058_v5 = vpop.f32.mrb[71].mxu0  ;;  %v11759_v60 = vld [vmem:[#allocation13 + $0x85c] ss:$12 sps:$4 sm:$0xff]  }
 0xfef   : > { %v13268_v46 = vadd.f32 %v10056_v11, %v8593_v4  ;;  %v10059_v7 = vadd.f32 %v10058_v5, %v10057_v17  ;;  %v11762_v4 = vld [vmem:[#allocation13 + $0x874] ss:$12 sps:$4 sm:$0xff]   ;;  %v11760_v11 = vld [vmem:[#allocation13 + $0x870] ss:$12 sps:$4 sm:$0xff]   ;;  %v11765_v17 = vld [vmem:[#allocation13 + $0x88c] ss:$12 sps:$4 sm:$0xff]  }
 0xff0   : > { %8485 = vmatpush1.bf16.msra.mxu1 %v11700_v3  ;;  %v11757_v3 = vld [vmem:[#allocation13 + $0x858] ss:$12 sps:$4 sm:$0xff]  }
 0xff1   : > { %v13270_v9 = vadd.f32 %v10059_v7, %v8596_v6  ;;  %8486 = vmatprep.subr.bf16.mxu1 %v11705_v16  ;;  %v11763_v16 = vld [vmem:[#allocation13 + $0x888] ss:$12 sps:$4 sm:$0xff]   ;;  %v11768_v5 = vld [vmem:[#allocation13 + $0x8a4] ss:$12 sps:$4 sm:$0xff]   ;;  %v11766_v6 = vld [vmem:[#allocation13 + $0x8a0] ss:$12 sps:$4 sm:$0xff]  }
 0xff4   : > { %8487 = vmatpush1.bf16.msra.mxu1 %v11703_v8  ;;  %v11769_v8 = vld [vmem:[#allocation13 + $0x8b8] ss:$12 sps:$4 sm:$0xff]  }
 0xff5   : > { %8488 = vmatprep.subr.bf16.mxu1 %v11708_v27  ;;  %v11774_v27 = vld [vmem:[#allocation13 + $0x8d4] ss:$12 sps:$4 sm:$0xff]  }
 0xff8   : > { %8489 = vmatpush1.bf16.msra.mxu1 %v11706_v43 }
 0xff9   : > { %8490 = vmatprep.subr.bf16.mxu1 %v11711_v12 }
 0xffc   : > { %8491 = vmatpush1.bf16.msra.mxu1 %v11709_v0 }
 0xffd   : > { %8492 = vmatprep.subr.bf16.mxu1 %v11714_v15 }
0x1000   : > { %8493 = vmatpush1.bf16.msra.mxu1 %v11712_v61 }
0x1001   : > { %8494 = vmatprep.subr.bf16.mxu1 %v11717_v31  ;;  %v11772_v31 = vld [vmem:[#allocation13 + $0x8d0] ss:$12 sps:$4 sm:$0xff]  }
0x1004   : > { %8495 = vmatpush1.bf16.msra.mxu1 %v11715_v18  ;;  %v11777_v18 = vld [vmem:[#allocation13 + $0x8ec] ss:$12 sps:$4 sm:$0xff]  }
0x1005   : > { %8496 = vmatprep.subr.bf16.mxu1 %v11720_v19 }
0x1008   : > { %8497 = vmatpush1.bf16.msra.mxu1 %v11718_v20  ;;  %v11775_v20 = vld [vmem:[#allocation13 + $0x8e8] ss:$12 sps:$4 sm:$0xff]  }
0x1009   : > { %8498 = vmatprep.subr.bf16.mxu1 %v11723_v22 }
0x100c   : > { %8499 = vmatpush1.bf16.msra.mxu1 %v11721_v62 }
0x100d   : > { %8500 = vmatprep.subr.bf16.mxu1 %v11726_v63 }
0x1010   : > { %8501 = vmatpush1.bf16.msra.mxu1 %v11724_v36 }
0x1011   : > { %8502 = vmatprep.subr.bf16.mxu1 %v11729_v37 }
0x1014   : > { %8503 = vmatpush1.bf16.msra.mxu1 %v11727_v14 }
0x1015   : > { %8515 = vmatprep.subr.bf16.mxu1 %v11732_v34 }
0x1017   : > { %8505 = vmatmul.mubr.bf16.vlgmr.msra.gmra.mrb[48].mxu1 %v13250_v59 }
0x1018   : > { %8516 = vmatpush1.bf16.msra.mxu1 %v11730_v23  ;;  %8547 = vmatprep.mubr.bf16.mxu1 %v13256_v1  ;;  %v11750_v1 = vld [vmem:[#allocation13 + $0x814] ss:$12 sps:$4 sm:$0xff]  }
0x1019   : > { %8517 = vmatprep.subr.bf16.mxu1 %v11735_v10 }
0x101c   : > { %8518 = vmatpush1.bf16.msra.mxu1 %v11733_v32 }
0x101d   : > { %8519 = vmatprep.subr.bf16.mxu1 %v11738_v47 }
0x1020   : > { %8520 = vmatpush1.bf16.msra.mxu1 %v11736_v51 }
0x1021   : > { %8521 = vmatprep.subr.bf16.mxu1 %v11741_v35 }
0x1024   : > { %8522 = vmatpush1.bf16.msra.mxu1 %v11739_v52 }
0x1025   : > { %8523 = vmatprep.subr.bf16.mxu1 %v11744_v53 }
0x1028   : > { %8524 = vmatpush1.bf16.msra.mxu1 %v11742_v24  ;;  %v10076_v59 = vpop.f32.mrb[72].mxu0 }
0x1029   : > { %v10077_v33 = vpop.f32.mrb[73].mxu0  ;;  %8525 = vmatprep.subr.bf16.mxu1 %v11747_v54 }
0x102a   : > { %v10078_v29 = vadd.f32 %v10077_v33, %v10076_v59  ;;  %v10079_v49 = vpop.f32.mrb[74].mxu0  ;;  %v6752_v59 = vrot.slane %v13264_v58, %v12865_v28 }
0x102b   : > { %v10080_v25 = vpop.f32.mrb[75].mxu0 }
0x102c   : > { %v8675_v41 = vadd.f32 %v10078_v29, %v13268_v46  ;;  %v10081_v55 = vadd.f32 %v10080_v25, %v10079_v49  ;;  %8526 = vmatpush1.bf16.msra.mxu1 %v11745_v45  ;;  %v11771_v46 = vld [vmem:[#allocation13 + $0x8bc] ss:$12 sps:$4 sm:$0xff]   ;;  %v6756_v45 = vrot.slane %v13264_v58, %v12859_v26 }
0x102d   : > { %8527 = vmatprep.subr.bf16.mxu1 %v11750_v1 }
0x102e   : > { %v8678_v56 = vadd.f32 %v10081_v55, %v13270_v9 }
0x1030   : > { %8528 = vmatpush1.bf16.msra.mxu1 %v11748_v57 }
0x1031   : > { %8529 = vmatprep.subr.bf16.mxu1 %v11753_v40 }
0x1034   : > { %8530 = vmatpush1.bf16.msra.mxu1 %v11751_v2 }
0x1035   : > { %8531 = vmatprep.subr.bf16.mxu1 %v11756_v48 }
0x1038   : > { %8532 = vmatpush1.bf16.msra.mxu1 %v11754_v44 }
0x1039   : > { %8533 = vmatprep.subr.bf16.mxu1 %v11759_v60 }
0x103c   : > { %8534 = vmatpush1.bf16.msra.mxu1 %v11757_v3 }
0x103d   : > { %8535 = vmatprep.subr.bf16.mxu1 %v11762_v4 }
0x1040   : > { %8536 = vmatpush1.bf16.msra.mxu1 %v11760_v11 }
0x1041   : > { %8537 = vmatprep.subr.bf16.mxu1 %v11765_v17 }
0x1044   : > { %8538 = vmatpush1.bf16.msra.mxu1 %v11763_v16 }
0x1045   : > { %8539 = vmatprep.subr.bf16.mxu1 %v11768_v5 }
0x1048   : > { %v10098_v7 = vpop.f32.mrb[76].mxu0  ;;  %8540 = vmatpush1.bf16.msra.mxu1 %v11766_v6 }
0x1049   : > { %v10099_v9 = vpop.f32.mrb[77].mxu0  ;;  %8541 = vmatprep.subr.bf16.mxu1 %v11771_v46 }
0x104a   : > { %v10100_v43 = vadd.f32 %v10099_v9, %v10098_v7  ;;  %v10101_v12 = vpop.f32.mrb[78].mxu0 }
0x104b   : > { %v10102_v0 = vpop.f32.mrb[79].mxu0 }
0x104c   : > { %v8716_v15 = vadd.f32 %v10100_v43, %v8675_v41  ;;  %v10103_v61 = vadd.f32 %v10102_v0, %v10101_v12  ;;  %8542 = vmatpush1.bf16.msra.mxu1 %v11769_v8 }
0x104d   : > { %8543 = vmatprep.subr.bf16.mxu1 %v11774_v27 }
0x104e   : > { %v8719_v19 = vadd.f32 %v10103_v61, %v8678_v56 }
0x1050   : > { %8544 = vmatpush1.bf16.msra.mxu1 %v11772_v31 }
0x1051   : > { %8545 = vmatprep.subr.bf16.mxu1 %v11777_v18 }
0x1054   : > { %8546 = vmatpush1.bf16.msra.mxu1 %v11775_v20 }
0x1057   : > { %8548 = vmatmul.mubr.bf16.vlgmr.msra.gmra.mrb[48].mxu1 %v13252_v50 }
0x1088   : > { %v10120_v22 = vpop.f32.mrb[80].mxu0 }
0x1089   : > { %v10121_v62 = vpop.f32.mrb[81].mxu0 }
0x108a   : > { %v10122_v63 = vadd.f32 %v10121_v62, %v10120_v22  ;;  %v10123_v36 = vpop.f32.mrb[82].mxu0 }
0x108b   : > { %v10124_v37 = vpop.f32.mrb[83].mxu0 }
0x108c   : > { %v8757_v14 = vadd.f32 %v10122_v63, %v8716_v15  ;;  %v10125_v34 = vadd.f32 %v10124_v37, %v10123_v36 }
0x108e   : > { %v8760_v23 = vadd.f32 %v10125_v34, %v8719_v19 }
0x10a8   : > { %v10142_v10 = vpop.f32.mrb[84].mxu0 }
0x10a9   : > { %v10143_v32 = vpop.f32.mrb[85].mxu0 }
0x10aa   : > { %v10144_v47 = vadd.f32 %v10143_v32, %v10142_v10  ;;  %v10145_v51 = vpop.f32.mrb[86].mxu0 }
0x10ab   : > { %v10146_v35 = vpop.f32.mrb[87].mxu0 }
0x10ac   : > { %v8798_v52 = vadd.f32 %v10144_v47, %v8757_v14  ;;  %v10147_v53 = vadd.f32 %v10146_v35, %v10145_v51 }
0x10ae   : > { %v8806_v24 = vadd.f32 %v8798_v52, %v13095_v38  ;;  %v8801_v50 = vadd.f32 %v10147_v53, %v8760_v23 }
0x10b0   : > { %8812 = vst [vmem:[%s619_s21 + $0x10] sm:$0xff] %v8806_v24  ;;  %v8809_v54 = vadd.f32 %v8801_v50, %v13104_v42 }
0x10b2   : > { %8815 = vst [vmem:[%s619_s21 + $0x28] sm:$0xff] %v8809_v54 }
0x112a   : > { %v8549_v33 = vpop.f32.mrb[48].mxu1 }
0x112b   : > { %v10288_v1 = vadd.f32 %v8549_v33, %v6752_v59  ;;  %v8551_v29 = vpop.f32.mrb[49].mxu1 }
0x112c   : > { %v10289_v49 = vadd.f32 %v8551_v29, %v6756_v45  ;;  %v8553_v38 = vpop.f32.mrb[50].mxu1 }
0x112d   : > { %v8804_v25 = vadd.f32 %v10288_v1, %v13088_v21  ;;  %v10290_v41 = vadd.f32 %v8553_v38, %v6752_v59  ;;  %v8555_v42 = vpop.f32.mrb[51].mxu1 }
0x112e   : > { %v8805_v28 = vadd.f32 %v10289_v49, %v13092_v30  ;;  %v10291_v26 = vadd.f32 %v8555_v42, %v6756_v45 }
0x112f   : > { %8810 = vst [vmem:[%s619_s21] sm:$0xff] %v8804_v25  ;;  %v8807_v58 = vadd.f32 %v10290_v41, %v13097_v39 }
0x1130   : > { %8811 = vst [vmem:[%s619_s21 + $0x8] sm:$0xff] %v8805_v28  ;;  %v8808_v55 = vadd.f32 %v10291_v26, %v13100_v13 }
0x1131   : > { %8813 = vst [vmem:[%s619_s21 + $0x18] sm:$0xff] %v8807_v58 }
0x1132   : > { %8814 = vst [vmem:[%s619_s21 + $0x20] sm:$0xff] %v8808_v55 }
0x1133   : > { %12219 = shalt.err (!%p12216_p7)
}
0x1134   : > { %s12220_s18 = scalar_lea.hbm %s13295_s3, 768  ;;  %s12224_s23 = scalar_lea.hbm %s13403_s1, 1536 }
0x1135   : > { %p12221_p5 = scmp.ne.s32.totalorder %s13295_s3, %s12220_s18  ;;  %p12225_p13 = scmp.lt.u32.totalorder %s13295_s3, %s13403_s1 }
0x1136   : > { %p12226_p1 = scmp.lt.u32.totalorder %s12224_s23, %s12220_s18  ;;  %p12228_p2 = scmp.lt.u32.totalorder %s12220_s18, %s13295_s3 }
0x1137   : > { %p12222_p9 = pnand %p12221_p5, %p13404_p8 }
0x1138   : > { %p12227_p3 = por %p12226_p1, %p12225_p13 }
0x1139   : > { %p12223_p12 = pneg %p12222_p9 }
0x113a   : > { %p12229_p4 = por %p12228_p2, %p12227_p3 }
0x113c   : > { %p12230_p10 = pnand %p12229_p4, %p12223_p12 }
0x113e   : > { %12233 = shalt.err (!%p12230_p10)
}
0x113f   : > { %s12326_s15 = smov 384   ;;  %s12327_s13 = smov 24  }
0x1140   : > { %10406 = dma.vmem_to_hbm [thread:$0]  (%p13404_p8), %s13287_s25, 768, %s13295_s3, %s8817_s19, %s12326_s15, %s12326_s15, %s12327_s13  }
0x1141 PF: > { %s13405_s20 = sld [smem:[#allocation32_spill]]  ;;  %p13406_p11 = scmp.ne.s32.totalorder %s13385_s24, 0 }
0x1142   : > { %p13407_p0 = scmp.ge.s32.totalorder %s12296_s28, 2 }
0x1144   : > { %p10450_p6 = pnand %p13407_p0, %p13406_p11 }
0x1147   : > { %s8846_s21 = sand.u32 1, %s13405_s20  }
0x1148   : > { %s8847_s18 = scalar_lea.sflag [#allocation4], %s8846_s21 }
0x1149   : > { %12279 = dma.done.wait (!%p10450_p6), %s8847_s18, 768  }
0x114a   : > { %12281 = vsyncadd (!%p10450_p6), %s8847_s18, 4294966528  ;;  %p32_p7 = scmp.ge.s32.totalorder %s12704_s17, 4   ;;  %s13408_s25 = smov %s12288_s26 }
0x114b   : > { %s13409_s26 = smov %s12292_s27  ;;  %s13410_s27 = smov %s12715_s30 }
0x114c   : > { %s13411_s28 = smov %s12704_s17  ;;  %34 = sbr.rel (!%p32_p7) target bundleno = 17 (0x11), region = 165 }
0x1153   :  { %8852 = vsyncpa [#allocation3], 1 }
0x1154   :  { %8854 = vsyncpa [#allocation3 + $0x1], 1 }
0x1155   :  { %8855 = vsyncpa [#allocation6], 1 }
0x1156   :  { %8856 = vsyncpa [#allocation9], 1 }
0x1157   :  { %8857 = vsyncpa [#allocation12], 1 }
0x1158   :  { %8858 = vsyncpa [#allocation15], 1 }
0x1159   :  { %8859 = vsyncpa [#allocation18], 1 }
0x115a   :  { %8860 = vsyncpa [#allocation21], 1 }
0x115b   :  { %8861 = vsyncpa [#allocation4], 1 }
0x115c   :  { %8863 = vsyncpa [#allocation4 + $0x1], 1 }

</bundles_post_ra>
